<compile_context>
chip_gen: v6e
topology: v6e:2x2x1
jax: 0.10.0
libtpu: 0.0.40
codegen_flags: <defaults>
</compile_context>

<pallas_src>
import numpy as np
import jax
import jax.numpy as jnp
from jax import lax
from jax.experimental import pallas as pl
from jax.experimental.pallas import tpu as pltpu

D_PAD = 128    # embedding dim padded to a full lane width
K_PAD = 128    # diagnosis factor dim (concept_num) padded to a full lane width
B_BLK = 8      # entities per grid step in the fusion kernels
P_BLK = 128    # (student, item) pairs per grid step in the diagnosis kernel

_PAR = pltpu.CompilerParams(dimension_semantics=("parallel",))


# ----------------------------------------------------------------------------
# helpers usable inside kernels
# ----------------------------------------------------------------------------
def _sigmoid(x):
    # exact logistic, routed through the EUP tanh unit
    return 0.5 * (jnp.tanh(0.5 * x) + 1.0)


def _attended_fusion(nbr, mask, wa_row, wf_t):
    """fusion_inside_fun, batched over entities.

    nbr    : (B, N, D_PAD) padded neighbor embeddings
    mask   : (B, N)        1.0 for valid neighbors, 0.0 for padding
    wa_row : (1, D_PAD)    neighbor half of the inside-attention weight
    wf_t   : (D_PAD, D_PAD) fusion Linear weight, transposed & zero padded

    The self half of the attention input and the attention bias are constant
    along the softmax (neighbor) axis and cancel exactly, so only the neighbor
    half of the attention weight is needed.  By linearity,
    sum_n a_n (x_n Wf^T) == (sum_n a_n x_n) Wf^T, so the (d, d) matmul runs
    once per entity on the attention-weighted neighbor sum.
    """
    logits = jnp.sum(nbr * wa_row, axis=-1)                        # (B, N)
    logits = jnp.where(mask > 0.0, logits, jnp.float32(-1e30))
    mx = jnp.max(logits, axis=-1, keepdims=True)                   # (B, 1)
    ex = jnp.exp(logits - mx) * mask                               # 0 for padding / empty rows
    denom = jnp.sum(ex, axis=-1, keepdims=True)
    att = ex * pl.reciprocal(denom + 1e-20, approx=True)           # (B, N)
    weighted = jnp.sum(att[:, :, None] * nbr, axis=1)              # (B, D_PAD)
    return jnp.dot(weighted, wf_t, preferred_element_type=jnp.float32)


# ----------------------------------------------------------------------------
# Pallas kernels
# ----------------------------------------------------------------------------
def _pair_fusion_kernel(self_ref, nbr1_ref, m1_ref, nbr2_ref, m2_ref,
                        wf1t_ref, wa1_ref, wf2t_ref, wa2_ref, out_ref):
    # conc_or_item_Fusion.forward; the external attention is a softmax over a
    # single row (== 1.0), so result = self + fusion1 + fusion2 exactly.
    f1 = _attended_fusion(nbr1_ref[...], m1_ref[...], wa1_ref[...], wf1t_ref[...])
    f2 = _attended_fusion(nbr2_ref[...], m2_ref[...], wa2_ref[...], wf2t_ref[...])
    out_ref[...] = self_ref[...] + f1 + f2


def _stu_fusion_kernel(self_ref, nbr_ref, m_ref, wft_ref, wa_ref, out_ref):
    # stu_Fusion.forward
    f = _attended_fusion(nbr_ref[...], m_ref[...], wa_ref[...], wft_ref[...])
    out_ref[...] = self_ref[...] + f


def _diagnosis_kernel(stu_ref, item_ref, conc_ref, cmask_ref,
                      ws_self_ref, wi_self_ref, wconc_ref, wpred_ref, bp_ref,
                      out_ref):
    # Diagnosis.forward for a block of (student, item) pairs; masked mean over
    # the (padded) concepts attached to each item.  Pairs sit on sublanes for
    # the matmuls; the final per-pair scalars are produced directly as a
    # lane-dense (1, P_BLK) row via an A @ B^T contraction (no (P,1) stores).
    kp = ws_self_ref.shape[1]
    n_conc = conc_ref.shape[0]
    p_blk = stu_ref.shape[0]

    stu_lin = jnp.dot(stu_ref[...], ws_self_ref[...],
                      preferred_element_type=jnp.float32)          # (P, K_PAD)
    item_lin = jnp.dot(item_ref[...], wi_self_ref[...],
                       preferred_element_type=jnp.float32)         # (P, K_PAD)

    acc = jnp.zeros((1, p_blk), jnp.float32)
    cnt = jnp.zeros((1, p_blk), jnp.float32)
    for c in range(n_conc):                                        # static, small
        # one fused matmul produces both factor-layer pre-activations
        sq = jnp.dot(conc_ref[c], wconc_ref[...],
                     preferred_element_type=jnp.float32)           # (P, 2*K_PAD)
        s = _sigmoid(sq[:, :kp] + stu_lin)                         # stu_factor_layer
        q = _sigmoid(sq[:, kp:] + item_lin)                        # item_factor_layer
        # predict_layer logit, contracted straight into a (1, P_BLK) row
        logit = lax.dot_general(wpred_ref[...], s - q,
                                (((1,), (1,)), ((), ())),
                                preferred_element_type=jnp.float32) + bp_ref[...]
        m = cmask_ref[c:c + 1, :]                                  # (1, P_BLK)
        acc = acc + _sigmoid(logit) * m
        cnt = cnt + m
    # masked mean over concepts; guard pairs with zero attached concepts
    out_ref[...] = acc / jnp.maximum(cnt, 1.0)


# ----------------------------------------------------------------------------
# pallas_call wrappers (gridded over the entity / pair dimension)
# ----------------------------------------------------------------------------
def pair_fusion(self_e, nbr1, m1, nbr2, m2, p):
    B, D = self_e.shape
    n1 = nbr1.shape[1]
    n2 = nbr2.shape[1]
    return pl.pallas_call(
        _pair_fusion_kernel,
        out_shape=jax.ShapeDtypeStruct((B, D), jnp.float32),
        grid=(B // B_BLK,),
        in_specs=[
            pl.BlockSpec((B_BLK, D), lambda i: (i, 0)),
            pl.BlockSpec((B_BLK, n1, D), lambda i: (i, 0, 0)),
            pl.BlockSpec((B_BLK, n1), lambda i: (i, 0)),
            pl.BlockSpec((B_BLK, n2, D), lambda i: (i, 0, 0)),
            pl.BlockSpec((B_BLK, n2), lambda i: (i, 0)),
            pl.BlockSpec((D, D), lambda i: (0, 0)),
            pl.BlockSpec((1, D), lambda i: (0, 0)),
            pl.BlockSpec((D, D), lambda i: (0, 0)),
            pl.BlockSpec((1, D), lambda i: (0, 0)),
        ],
        out_specs=pl.BlockSpec((B_BLK, D), lambda i: (i, 0)),
        compiler_params=_PAR,
    )(self_e, nbr1, m1, nbr2, m2, p['Wf1T'], p['wa1'], p['Wf2T'], p['wa2'])


def stu_fusion(self_e, nbr, m, p):
    B, D = self_e.shape
    n = nbr.shape[1]
    return pl.pallas_call(
        _stu_fusion_kernel,
        out_shape=jax.ShapeDtypeStruct((B, D), jnp.float32),
        grid=(B // B_BLK,),
        in_specs=[
            pl.BlockSpec((B_BLK, D), lambda i: (i, 0)),
            pl.BlockSpec((B_BLK, n, D), lambda i: (i, 0, 0)),
            pl.BlockSpec((B_BLK, n), lambda i: (i, 0)),
            pl.BlockSpec((D, D), lambda i: (0, 0)),
            pl.BlockSpec((1, D), lambda i: (0, 0)),
        ],
        out_specs=pl.BlockSpec((B_BLK, D), lambda i: (i, 0)),
        compiler_params=_PAR,
    )(self_e, nbr, m, p['WfT'], p['wa'])


def diagnosis(stu_p, item_p, conc_p, cmask_t, dp):
    P, D = stu_p.shape
    C = conc_p.shape[0]
    k2 = dp['WconcT'].shape[1]
    nblk = P // P_BLK
    out = pl.pallas_call(
        _diagnosis_kernel,
        out_shape=jax.ShapeDtypeStruct((nblk, P_BLK), jnp.float32),
        grid=(nblk,),
        in_specs=[
            pl.BlockSpec((P_BLK, D), lambda i: (i, 0)),        # stu fusion rows
            pl.BlockSpec((P_BLK, D), lambda i: (i, 0)),        # item fusion rows
            pl.BlockSpec((C, P_BLK, D), lambda i: (0, i, 0)),  # concepts per pair
            pl.BlockSpec((C, P_BLK), lambda i: (0, i)),        # concept mask (transposed)
            pl.BlockSpec((D, K_PAD), lambda i: (0, 0)),        # Wstu self half (T, padded)
            pl.BlockSpec((D, K_PAD), lambda i: (0, 0)),        # Witem self half (T, padded)
            pl.BlockSpec((D, k2), lambda i: (0, 0)),           # [Wstu_conc | Witem_conc]
            pl.BlockSpec((1, K_PAD), lambda i: (0, 0)),        # Wpred (padded)
            pl.BlockSpec((1, 1), lambda i: (0, 0)),            # bpred
        ],
        out_specs=pl.BlockSpec((1, P_BLK), lambda i: (i, 0)),
        compiler_params=_PAR,
    )(stu_p, item_p, conc_p, cmask_t, dp['WsSelfT'], dp['WiSelfT'],
      dp['WconcT'], dp['wpred'], dp['bpred'])
    return out.reshape(-1)


# ----------------------------------------------------------------------------
# Fusion pass (Fusion.forward) built from the kernels above
# ----------------------------------------------------------------------------
def run_fusion_pass(concept_e, item_e, stu_e, fp, g):
    # concept fusion: neighbors = (related concepts, items containing the concept)
    cc_nbr = concept_e[g['cc_idx']]
    ci_nbr = item_e[g['ci_idx']]
    conc_f = pair_fusion(concept_e, cc_nbr, g['cc_mask'],
                         ci_nbr, g['ci_mask'], fp['conc'])
    # item fusion: neighbors = (its concepts, students who answered it)
    ic_nbr = concept_e[g['ic_idx']]
    is_nbr = stu_e[g['is_idx']]
    item_f = pair_fusion(item_e, ic_nbr, g['ic_mask'],
                         is_nbr, g['is_mask'], fp['item'])
    # student fusion: neighbors = items answered
    si_nbr = item_e[g['si_idx']]
    stu_f = stu_fusion(stu_e, si_nbr, g['si_mask'], fp['stu'])
    return conc_f, item_f, stu_f


# ----------------------------------------------------------------------------
# host-side glue: padding & parameter preprocessing (done once at init)
# ----------------------------------------------------------------------------
def _pad_lists(lists, n_rows):
    m = max(1, max((len(l) for l in lists), default=1))
    idx = np.zeros((n_rows, m), dtype=np.int32)
    msk = np.zeros((n_rows, m), dtype=np.float32)
    for i, l in enumerate(lists):
        idx[i, :len(l)] = l
        msk[i, :len(l)] = 1.0
    return idx, msk


def _pad2(x, rows, cols):
    out = np.zeros((rows, cols), dtype=np.float32)
    x = np.asarray(x, dtype=np.float32)
    out[:x.shape[0], :x.shape[1]] = x
    return out


def _round_up(n, m):
    return ((n + m - 1) // m) * m


if __name__ == "__main__":
    STU_NUM, ITEM_NUM, CONC_NUM, EMB_DIM = 4, 6, 8, 6

    # ---- synthetic graphs (1-based ids, stand-ins for the pandas DataFrames)
    concept_graph = {1: [2], 2: [1, 3], 3: [2, 4], 4: [3, 5],
                     5: [4, 6], 6: [5, 7], 7: [6, 8], 8: [7]}
    item_concept = {1: [1, 2], 2: [2, 3], 3: [3, 4],
                    4: [4, 5, 6], 5: [5, 6, 7], 6: [6, 7, 8]}
    stu_item = {1: [1, 2, 3], 2: [2, 3, 4], 3: [3, 4, 5], 4: [4, 5, 6]}

    conc_items = {c: [] for c in range(1, CONC_NUM + 1)}
    for it, cs in item_concept.items():
        for c in cs:
            conc_items[c].append(it)
    item_stus = {it: [] for it in range(1, ITEM_NUM + 1)}
    for s, its in stu_item.items():
        for it in its:
            item_stus[it].append(s)

    CONC_PAD = _round_up(CONC_NUM, B_BLK)
    ITEM_PAD = _round_up(ITEM_NUM, B_BLK)
    STU_PAD = _round_up(STU_NUM, B_BLK)

    # ids 1..N are all present, so position = id - 1 (matches the *_df lookups)
    cc_idx, cc_mask = _pad_lists([[c2 - 1 for c2 in concept_graph.get(c, [])]
                                  for c in range(1, CONC_NUM + 1)], CONC_PAD)
    ci_idx, ci_mask = _pad_lists([[it - 1 for it in sorted(set(conc_items[c]))]
                                  for c in range(1, CONC_NUM + 1)], CONC_PAD)
    ic_idx, ic_mask = _pad_lists([[c - 1 for c in sorted(set(item_concept[it]))]
                                  for it in range(1, ITEM_NUM + 1)], ITEM_PAD)
    is_idx, is_mask = _pad_lists([[s - 1 for s in sorted(set(item_stus[it]))]
                                  for it in range(1, ITEM_NUM + 1)], ITEM_PAD)
    si_idx, si_mask = _pad_lists([[it - 1 for it in sorted(set(stu_item[s]))]
                                  for s in range(1, STU_NUM + 1)], STU_PAD)

    # "if concept not in concept_graph.index: concepts_fusion[i] = conci_emb":
    # zero BOTH neighbor masks for such concepts -> fused row == self embedding.
    has_cc = np.array([1.0 if c in concept_graph else 0.0
                       for c in range(1, CONC_NUM + 1)], np.float32)
    cc_mask[:CONC_NUM] *= has_cc[:, None]
    ci_mask[:CONC_NUM] *= has_cc[:, None]

    # (student, item) pairs in the same order as the original loops, plus the
    # concepts attached to each item (padded + masked); pairs padded to P_BLK.
    pair_stu, pair_item, pair_conc = [], [], []
    for s in sorted(stu_item):
        for it in sorted(set(stu_item[s])):
            pair_stu.append(s - 1)
            pair_item.append(it - 1)
            pair_conc.append([c - 1 for c in sorted(set(item_concept[it]))])
    P_REAL = len(pair_stu)
    P_PAD = _round_up(P_REAL, P_BLK)
    pair_conc_idx, pair_conc_mask = _pad_lists(pair_conc, P_PAD)
    pair_stu_arr = np.zeros((P_PAD,), np.int32)
    pair_stu_arr[:P_REAL] = pair_stu
    pair_item_arr = np.zeros((P_PAD,), np.int32)
    pair_item_arr[:P_REAL] = pair_item

    G = dict(
        cc_idx=jnp.asarray(cc_idx), cc_mask=jnp.asarray(cc_mask),
        ci_idx=jnp.asarray(ci_idx), ci_mask=jnp.asarray(ci_mask),
        ic_idx=jnp.asarray(ic_idx), ic_mask=jnp.asarray(ic_mask),
        is_idx=jnp.asarray(is_idx), is_mask=jnp.asarray(is_mask),
        si_idx=jnp.asarray(si_idx), si_mask=jnp.asarray(si_mask),
        pair_stu=jnp.asarray(pair_stu_arr),
        pair_item=jnp.asarray(pair_item_arr),
        pair_conc_idx_T=jnp.asarray(pair_conc_idx.T),   # (C, P_PAD)
        pair_cmask_T=jnp.asarray(pair_conc_mask.T),     # (C, P_PAD)
    )

    # ---- deterministic parameters (shapes follow the nn.Module __init__);
    #      all transposes / zero-padding / weight fusions are done ONCE here.
    keys = iter(jax.random.split(jax.random.PRNGKey(0), 64))

    def rnd(shape, scale=1.0):
        return np.asarray(scale * jax.random.normal(next(keys), shape),
                          dtype=np.float32)

    stu_emb = jnp.asarray(_pad2(rnd((STU_NUM, EMB_DIM)), STU_PAD, D_PAD))
    item_emb = jnp.asarray(_pad2(rnd((ITEM_NUM, EMB_DIM)), ITEM_PAD, D_PAD))
    conc_emb = jnp.asarray(_pad2(rnd((CONC_NUM, EMB_DIM)), CONC_PAD, D_PAD))

    def pair_branch():
        # conc_or_item_Fusion: fusion1/fusion2 (d,d no bias), attention*_inside
        # Linear(2d -> 1).  The self half of the attention weight and its bias
        # are constant along the softmax axis and cancel; the *_external
        # attention layers are softmax over one row (== 1) and also cancel.
        wf1 = rnd((EMB_DIM, EMB_DIM), 0.3)
        wf2 = rnd((EMB_DIM, EMB_DIM), 0.3)
        wa1 = rnd((2 * EMB_DIM,), 0.3)
        wa2 = rnd((2 * EMB_DIM,), 0.3)
        return dict(
            Wf1T=jnp.asarray(_pad2(wf1.T, D_PAD, D_PAD)),
            Wf2T=jnp.asarray(_pad2(wf2.T, D_PAD, D_PAD)),
            wa1=jnp.asarray(_pad2(wa1[EMB_DIM:].reshape(1, -1), 1, D_PAD)),
            wa2=jnp.asarray(_pad2(wa2[EMB_DIM:].reshape(1, -1), 1, D_PAD)),
        )

    wf_s = rnd((EMB_DIM, EMB_DIM), 0.3)
    wa_s = rnd((2 * EMB_DIM,), 0.3)
    FP = dict(
        conc=pair_branch(), item=pair_branch(),
        stu=dict(WfT=jnp.asarray(_pad2(wf_s.T, D_PAD, D_PAD)),
                 wa=jnp.asarray(_pad2(wa_s[EMB_DIM:].reshape(1, -1), 1, D_PAD))))
    # NOTE: RCD_Net.forward applies fusion_layer1 twice (fusion_layer2 is
    # unused in the original forward), so one weight set is reused below.

    w_stu = rnd((CONC_NUM, 2 * EMB_DIM), 0.3)     # stu_factor_layer weight
    w_item = rnd((CONC_NUM, 2 * EMB_DIM), 0.3)    # item_factor_layer weight
    w_pred = rnd((1, CONC_NUM), 0.3)              # predict_layer weight
    b_pred = rnd((1, 1), 0.3)                     # predict_layer bias
    ws_conc_t = _pad2(w_stu[:, EMB_DIM:].T, D_PAD, K_PAD)
    wi_conc_t = _pad2(w_item[:, EMB_DIM:].T, D_PAD, K_PAD)
    DIAG = dict(
        WsSelfT=jnp.asarray(_pad2(w_stu[:, :EMB_DIM].T, D_PAD, K_PAD)),
        WiSelfT=jnp.asarray(_pad2(w_item[:, :EMB_DIM].T, D_PAD, K_PAD)),
        WconcT=jnp.asarray(np.concatenate([ws_conc_t, wi_conc_t], axis=1)),
        wpred=jnp.asarray(_pad2(w_pred, 1, K_PAD)),
        bpred=jnp.asarray(b_pred),
    )

    # ---- full forward pass
    @jax.jit
    def forward(emb_c, emb_i, emb_s):
        c1, i1, s1 = run_fusion_pass(emb_c, emb_i, emb_s, FP, G)
        c2, i2, s2 = run_fusion_pass(c1, i1, s1, FP, G)   # fusion_layer1 twice
        stu_p = s2[G['pair_stu']]                         # (P_PAD, D_PAD)
        item_p = i2[G['pair_item']]                       # (P_PAD, D_PAD)
        conc_p = c2[G['pair_conc_idx_T']]                 # (C, P_PAD, D_PAD)
        pred = diagnosis(stu_p, item_p, conc_p, G['pair_cmask_T'], DIAG)
        return pred[:P_REAL]

    pred = jax.block_until_ready(forward(conc_emb, item_emb, stu_emb))

    assert pred.shape == (P_REAL,)
    assert bool(jnp.all(jnp.isfinite(pred)))
    assert float(pred.min()) >= 0.0 and float(pred.max()) <= 1.0
    print("KERNEL_OK")
</pallas_src>

<mosaic_0001>
module attributes {stable_mosaic.version = 11 : i64} {
  func.func @_stu_fusion_kernel(%arg0: i32, %arg1: memref<8x128xf32, #tpu.memory_space<vmem>>, %arg2: memref<8x3x128xf32, #tpu.memory_space<vmem>>, %arg3: memref<8x3xf32, #tpu.memory_space<vmem>>, %arg4: memref<128x128xf32, #tpu.memory_space<vmem>>, %arg5: memref<1x128xf32, #tpu.memory_space<vmem>>, %arg6: memref<8x128xf32, #tpu.memory_space<vmem>>) attributes {dimension_semantics = [#tpu.dimension_semantics<parallel>], iteration_bounds = array<i64: 1>, scalar_prefetch = 0 : i64, scratch_operands = 0 : i64, tpu.core_type = #tpu.core_type<tc>, window_params = [{transform_indices = @transform_0, window_bounds = array<i64: 8, 128>}, {transform_indices = @transform_1, window_bounds = array<i64: 8, 3, 128>}, {transform_indices = @transform_2, window_bounds = array<i64: 8, 3>}, {pipeline_mode = #tpu.pipeline_mode<synchronous>, transform_indices = @transform_3, window_bounds = array<i64: 128, 128>}, {pipeline_mode = #tpu.pipeline_mode<synchronous>, transform_indices = @transform_4, window_bounds = array<i64: 1, 128>}, {transform_indices = @transform_5, window_bounds = array<i64: 8, 128>}]} {
    %c0 = arith.constant 0 : index
    %c0_0 = arith.constant 0 : index
    %c0_1 = arith.constant 0 : index
    %0 = vector.load %arg2[%c0, %c0_0, %c0_1] : memref<8x3x128xf32, #tpu.memory_space<vmem>>, vector<8x3x128xf32>
    %c0_2 = arith.constant 0 : index
    %c0_3 = arith.constant 0 : index
    %1 = vector.load %arg3[%c0_2, %c0_3] : memref<8x3xf32, #tpu.memory_space<vmem>>, vector<8x3xf32>
    %c0_4 = arith.constant 0 : index
    %c0_5 = arith.constant 0 : index
    %2 = vector.load %arg5[%c0_4, %c0_5] : memref<1x128xf32, #tpu.memory_space<vmem>>, vector<1x128xf32>
    %c0_6 = arith.constant 0 : index
    %c0_7 = arith.constant 0 : index
    %3 = vector.load %arg4[%c0_6, %c0_7] : memref<128x128xf32, #tpu.memory_space<vmem>>, vector<128x128xf32>
    %4 = vector.shape_cast %2 : vector<1x128xf32> to vector<1x1x128xf32>
    %5 = vector.broadcast %4 : vector<1x1x128xf32> to vector<8x3x128xf32>
    %6 = arith.mulf %0, %5 : vector<8x3x128xf32>
    %cst = arith.constant dense<0.000000e+00> : vector<8x3xf32>
    %7 = vector.multi_reduction <add>, %6, %cst [2] : vector<8x3x128xf32> to vector<8x3xf32>
    %cst_8 = arith.constant 0.000000e+00 : f32
    %8 = vector.broadcast %cst_8 : f32 to vector<8x3xf32>
    %9 = arith.cmpf ogt, %1, %8 : vector<8x3xf32>
    %cst_9 = arith.constant -1.000000e+30 : f32
    %10 = vector.broadcast %cst_9 : f32 to vector<8x3xf32>
    %11 = arith.select %9, %7, %10 : vector<8x3xi1>, vector<8x3xf32>
    %cst_10 = arith.constant dense<0xFF800000> : vector<8xf32>
    %12 = vector.multi_reduction <maximumf>, %11, %cst_10 [1] : vector<8x3xf32> to vector<8xf32>
    %13 = vector.shape_cast %12 : vector<8xf32> to vector<8x1xf32>
    %14 = vector.broadcast %13 : vector<8x1xf32> to vector<8x3xf32>
    %15 = arith.subf %11, %14 : vector<8x3xf32>
    %16 = math.exp %15 : vector<8x3xf32>
    %17 = arith.mulf %16, %1 : vector<8x3xf32>
    %cst_11 = arith.constant dense<0.000000e+00> : vector<8xf32>
    %18 = vector.multi_reduction <add>, %17, %cst_11 [1] : vector<8x3xf32> to vector<8xf32>
    %19 = vector.shape_cast %18 : vector<8xf32> to vector<8x1xf32>
    %cst_12 = arith.constant 9.99999968E-21 : f32
    %20 = vector.broadcast %cst_12 : f32 to vector<8x1xf32>
    %21 = arith.addf %19, %20 : vector<8x1xf32>
    %22 = tpu.reciprocal %21 {approx = true} : vector<8x1xf32> -> vector<8x1xf32>
    %23 = vector.broadcast %22 : vector<8x1xf32> to vector<8x3xf32>
    %24 = arith.mulf %17, %23 : vector<8x3xf32>
    %25 = vector.shape_cast %24 : vector<8x3xf32> to vector<8x3x1xf32>
    %26 = vector.broadcast %25 : vector<8x3x1xf32> to vector<8x3x128xf32>
    %27 = arith.mulf %26, %0 : vector<8x3x128xf32>
    %cst_13 = arith.constant dense<0.000000e+00> : vector<8x128xf32>
    %28 = vector.multi_reduction <add>, %27, %cst_13 [1] : vector<8x3x128xf32> to vector<8x128xf32>
    %cst_14 = arith.constant dense<0.000000e+00> : vector<8x128xf32>
    %29 = tpu.matmul %28, %3, %cst_14 {dimension_numbers = #tpu.dot_dimension_numbers<[1], [0], [0], [1], [0, 0, 1, 1], [], []>} : vector<8x128xf32>, vector<128x128xf32>, vector<8x128xf32> -> vector<8x128xf32>
    %c0_15 = arith.constant 0 : index
    %c0_16 = arith.constant 0 : index
    %30 = vector.load %arg1[%c0_15, %c0_16] : memref<8x128xf32, #tpu.memory_space<vmem>>, vector<8x128xf32>
    %31 = arith.addf %30, %29 : vector<8x128xf32>
    %c0_17 = arith.constant 0 : index
    %c0_18 = arith.constant 0 : index
    %32 = vector.load %arg6[%c0_17, %c0_18] : memref<8x128xf32, #tpu.memory_space<vmem>>, vector<8x128xf32>
    tpu.vector_store %arg6[%c0_17, %c0_18], %31 {strides = array<i32>} : memref<8x128xf32, #tpu.memory_space<vmem>>, vector<8x128xf32>,
    return
  }
  func.func @transform_0(%arg0: i32) -> (i32, i32) {
    %c0_i32 = arith.constant 0 : i32
    %c0_i32_0 = arith.constant 0 : i32
    return %arg0, %c0_i32 : i32, i32
  }
  func.func @transform_1(%arg0: i32) -> (i32, i32, i32) {
    %c0_i32 = arith.constant 0 : i32
    %c0_i32_0 = arith.constant 0 : i32
    %c0_i32_1 = arith.constant 0 : i32
    return %arg0, %c0_i32, %c0_i32_0 : i32, i32, i32
  }
  func.func @transform_2(%arg0: i32) -> (i32, i32) {
    %c0_i32 = arith.constant 0 : i32
    %c0_i32_0 = arith.constant 0 : i32
    return %arg0, %c0_i32 : i32, i32
  }
  func.func @transform_3(%arg0: i32) -> (i32, i32) {
    %c0_i32 = arith.constant 0 : i32
    %c0_i32_0 = arith.constant 0 : i32
    %c0_i32_1 = arith.constant 0 : i32
    return %c0_i32, %c0_i32_0 : i32, i32
  }
  func.func @transform_4(%arg0: i32) -> (i32, i32) {
    %c0_i32 = arith.constant 0 : i32
    %c0_i32_0 = arith.constant 0 : i32
    %c0_i32_1 = arith.constant 0 : i32
    return %c0_i32, %c0_i32_0 : i32, i32
  }
  func.func @transform_5(%arg0: i32) -> (i32, i32) {
    %c0_i32 = arith.constant 0 : i32
    %c0_i32_0 = arith.constant 0 : i32
    return %arg0, %c0_i32 : i32, i32
  }
}

module attributes {stable_mosaic.version = 11 : i64} {
  func.func @_pair_fusion_kernel(%arg0: i32, %arg1: memref<8x128xf32, #tpu.memory_space<vmem>>, %arg2: memref<8x2x128xf32, #tpu.memory_space<vmem>>, %arg3: memref<8x2xf32, #tpu.memory_space<vmem>>, %arg4: memref<8x3x128xf32, #tpu.memory_space<vmem>>, %arg5: memref<8x3xf32, #tpu.memory_space<vmem>>, %arg6: memref<128x128xf32, #tpu.memory_space<vmem>>, %arg7: memref<1x128xf32, #tpu.memory_space<vmem>>, %arg8: memref<128x128xf32, #tpu.memory_space<vmem>>, %arg9: memref<1x128xf32, #tpu.memory_space<vmem>>, %arg10: memref<8x128xf32, #tpu.memory_space<vmem>>) attributes {dimension_semantics = [#tpu.dimension_semantics<parallel>], iteration_bounds = array<i64: 1>, scalar_prefetch = 0 : i64, scratch_operands = 0 : i64, tpu.core_type = #tpu.core_type<tc>, window_params = [{transform_indices = @transform_0, window_bounds = array<i64: 8, 128>}, {transform_indices = @transform_1, window_bounds = array<i64: 8, 2, 128>}, {transform_indices = @transform_2, window_bounds = array<i64: 8, 2>}, {transform_indices = @transform_3, window_bounds = array<i64: 8, 3, 128>}, {transform_indices = @transform_4, window_bounds = array<i64: 8, 3>}, {pipeline_mode = #tpu.pipeline_mode<synchronous>, transform_indices = @transform_5, window_bounds = array<i64: 128, 128>}, {pipeline_mode = #tpu.pipeline_mode<synchronous>, transform_indices = @transform_6, window_bounds = array<i64: 1, 128>}, {pipeline_mode = #tpu.pipeline_mode<synchronous>, transform_indices = @transform_7, window_bounds = array<i64: 128, 128>}, {pipeline_mode = #tpu.pipeline_mode<synchronous>, transform_indices = @transform_8, window_bounds = array<i64: 1, 128>}, {transform_indices = @transform_9, window_bounds = array<i64: 8, 128>}]} {
    %c0 = arith.constant 0 : index
    %c0_0 = arith.constant 0 : index
    %c0_1 = arith.constant 0 : index
    %0 = vector.load %arg2[%c0, %c0_0, %c0_1] : memref<8x2x128xf32, #tpu.memory_space<vmem>>, vector<8x2x128xf32>
    %c0_2 = arith.constant 0 : index
    %c0_3 = arith.constant 0 : index
    %1 = vector.load %arg3[%c0_2, %c0_3] : memref<8x2xf32, #tpu.memory_space<vmem>>, vector<8x2xf32>
    %c0_4 = arith.constant 0 : index
    %c0_5 = arith.constant 0 : index
    %2 = vector.load %arg7[%c0_4, %c0_5] : memref<1x128xf32, #tpu.memory_space<vmem>>, vector<1x128xf32>
    %c0_6 = arith.constant 0 : index
    %c0_7 = arith.constant 0 : index
    %3 = vector.load %arg6[%c0_6, %c0_7] : memref<128x128xf32, #tpu.memory_space<vmem>>, vector<128x128xf32>
    %4 = vector.shape_cast %2 : vector<1x128xf32> to vector<1x1x128xf32>
    %5 = vector.broadcast %4 : vector<1x1x128xf32> to vector<8x2x128xf32>
    %6 = arith.mulf %0, %5 : vector<8x2x128xf32>
    %cst = arith.constant dense<0.000000e+00> : vector<8x2xf32>
    %7 = vector.multi_reduction <add>, %6, %cst [2] : vector<8x2x128xf32> to vector<8x2xf32>
    %cst_8 = arith.constant 0.000000e+00 : f32
    %8 = vector.broadcast %cst_8 : f32 to vector<8x2xf32>
    %9 = arith.cmpf ogt, %1, %8 : vector<8x2xf32>
    %cst_9 = arith.constant -1.000000e+30 : f32
    %10 = vector.broadcast %cst_9 : f32 to vector<8x2xf32>
    %11 = arith.select %9, %7, %10 : vector<8x2xi1>, vector<8x2xf32>
    %cst_10 = arith.constant dense<0xFF800000> : vector<8xf32>
    %12 = vector.multi_reduction <maximumf>, %11, %cst_10 [1] : vector<8x2xf32> to vector<8xf32>
    %13 = vector.shape_cast %12 : vector<8xf32> to vector<8x1xf32>
    %14 = vector.broadcast %13 : vector<8x1xf32> to vector<8x2xf32>
    %15 = arith.subf %11, %14 : vector<8x2xf32>
    %16 = math.exp %15 : vector<8x2xf32>
    %17 = arith.mulf %16, %1 : vector<8x2xf32>
    %cst_11 = arith.constant dense<0.000000e+00> : vector<8xf32>
    %18 = vector.multi_reduction <add>, %17, %cst_11 [1] : vector<8x2xf32> to vector<8xf32>
    %19 = vector.shape_cast %18 : vector<8xf32> to vector<8x1xf32>
    %cst_12 = arith.constant 9.99999968E-21 : f32
    %20 = vector.broadcast %cst_12 : f32 to vector<8x1xf32>
    %21 = arith.addf %19, %20 : vector<8x1xf32>
    %22 = tpu.reciprocal %21 {approx = true} : vector<8x1xf32> -> vector<8x1xf32>
    %23 = vector.broadcast %22 : vector<8x1xf32> to vector<8x2xf32>
    %24 = arith.mulf %17, %23 : vector<8x2xf32>
    %25 = vector.shape_cast %24 : vector<8x2xf32> to vector<8x2x1xf32>
    %26 = vector.broadcast %25 : vector<8x2x1xf32> to vector<8x2x128xf32>
    %27 = arith.mulf %26, %0 : vector<8x2x128xf32>
    %cst_13 = arith.constant dense<0.000000e+00> : vector<8x128xf32>
    %28 = vector.multi_reduction <add>, %27, %cst_13 [1] : vector<8x2x128xf32> to vector<8x128xf32>
    %cst_14 = arith.constant dense<0.000000e+00> : vector<8x128xf32>
    %29 = tpu.matmul %28, %3, %cst_14 {dimension_numbers = #tpu.dot_dimension_numbers<[1], [0], [0], [1], [0, 0, 1, 1], [], []>} : vector<8x128xf32>, vector<128x128xf32>, vector<8x128xf32> -> vector<8x128xf32>
    %c0_15 = arith.constant 0 : index
    %c0_16 = arith.constant 0 : index
    %c0_17 = arith.constant 0 : index
    %30 = vector.load %arg4[%c0_15, %c0_16, %c0_17] : memref<8x3x128xf32, #tpu.memory_space<vmem>>, vector<8x3x128xf32>
    %c0_18 = arith.constant 0 : index
    %c0_19 = arith.constant 0 : index
    %31 = vector.load %arg5[%c0_18, %c0_19] : memref<8x3xf32, #tpu.memory_space<vmem>>, vector<8x3xf32>
    %c0_20 = arith.constant 0 : index
    %c0_21 = arith.constant 0 : index
    %32 = vector.load %arg9[%c0_20, %c0_21] : memref<1x128xf32, #tpu.memory_space<vmem>>, vector<1x128xf32>
    %c0_22 = arith.constant 0 : index
    %c0_23 = arith.constant 0 : index
    %33 = vector.load %arg8[%c0_22, %c0_23] : memref<128x128xf32, #tpu.memory_space<vmem>>, vector<128x128xf32>
    %34 = vector.shape_cast %32 : vector<1x128xf32> to vector<1x1x128xf32>
    %35 = vector.broadcast %34 : vector<1x1x128xf32> to vector<8x3x128xf32>
    %36 = arith.mulf %30, %35 : vector<8x3x128xf32>
    %cst_24 = arith.constant dense<0.000000e+00> : vector<8x3xf32>
    %37 = vector.multi_reduction <add>, %36, %cst_24 [2] : vector<8x3x128xf32> to vector<8x3xf32>
    %cst_25 = arith.constant 0.000000e+00 : f32
    %38 = vector.broadcast %cst_25 : f32 to vector<8x3xf32>
    %39 = arith.cmpf ogt, %31, %38 : vector<8x3xf32>
    %cst_26 = arith.constant -1.000000e+30 : f32
    %40 = vector.broadcast %cst_26 : f32 to vector<8x3xf32>
    %41 = arith.select %39, %37, %40 : vector<8x3xi1>, vector<8x3xf32>
    %cst_27 = arith.constant dense<0xFF800000> : vector<8xf32>
    %42 = vector.multi_reduction <maximumf>, %41, %cst_27 [1] : vector<8x3xf32> to vector<8xf32>
    %43 = vector.shape_cast %42 : vector<8xf32> to vector<8x1xf32>
    %44 = vector.broadcast %43 : vector<8x1xf32> to vector<8x3xf32>
    %45 = arith.subf %41, %44 : vector<8x3xf32>
    %46 = math.exp %45 : vector<8x3xf32>
    %47 = arith.mulf %46, %31 : vector<8x3xf32>
    %cst_28 = arith.constant dense<0.000000e+00> : vector<8xf32>
    %48 = vector.multi_reduction <add>, %47, %cst_28 [1] : vector<8x3xf32> to vector<8xf32>
    %49 = vector.shape_cast %48 : vector<8xf32> to vector<8x1xf32>
    %cst_29 = arith.constant 9.99999968E-21 : f32
    %50 = vector.broadcast %cst_29 : f32 to vector<8x1xf32>
    %51 = arith.addf %49, %50 : vector<8x1xf32>
    %52 = tpu.reciprocal %51 {approx = true} : vector<8x1xf32> -> vector<8x1xf32>
    %53 = vector.broadcast %52 : vector<8x1xf32> to vector<8x3xf32>
    %54 = arith.mulf %47, %53 : vector<8x3xf32>
    %55 = vector.shape_cast %54 : vector<8x3xf32> to vector<8x3x1xf32>
    %56 = vector.broadcast %55 : vector<8x3x1xf32> to vector<8x3x128xf32>
    %57 = arith.mulf %56, %30 : vector<8x3x128xf32>
    %cst_30 = arith.constant dense<0.000000e+00> : vector<8x128xf32>
    %58 = vector.multi_reduction <add>, %57, %cst_30 [1] : vector<8x3x128xf32> to vector<8x128xf32>
    %cst_31 = arith.constant dense<0.000000e+00> : vector<8x128xf32>
    %59 = tpu.matmul %58, %33, %cst_31 {dimension_numbers = #tpu.dot_dimension_numbers<[1], [0], [0], [1], [0, 0, 1, 1], [], []>} : vector<8x128xf32>, vector<128x128xf32>, vector<8x128xf32> -> vector<8x128xf32>
    %c0_32 = arith.constant 0 : index
    %c0_33 = arith.constant 0 : index
    %60 = vector.load %arg1[%c0_32, %c0_33] : memref<8x128xf32, #tpu.memory_space<vmem>>, vector<8x128xf32>
    %61 = arith.addf %60, %29 : vector<8x128xf32>
    %62 = arith.addf %61, %59 : vector<8x128xf32>
    %c0_34 = arith.constant 0 : index
    %c0_35 = arith.constant 0 : index
    %63 = vector.load %arg10[%c0_34, %c0_35] : memref<8x128xf32, #tpu.memory_space<vmem>>, vector<8x128xf32>
    tpu.vector_store %arg10[%c0_34, %c0_35], %62 {strides = array<i32>} : memref<8x128xf32, #tpu.memory_space<vmem>>, vector<8x128xf32>,
    return
  }
  func.func @transform_0(%arg0: i32) -> (i32, i32) {
    %c0_i32 = arith.constant 0 : i32
    %c0_i32_0 = arith.constant 0 : i32
    return %arg0, %c0_i32 : i32, i32
  }
  func.func @transform_1(%arg0: i32) -> (i32, i32, i32) {
    %c0_i32 = arith.constant 0 : i32
    %c0_i32_0 = arith.constant 0 : i32
    %c0_i32_1 = arith.constant 0 : i32
    return %arg0, %c0_i32, %c0_i32_0 : i32, i32, i32
  }
  func.func @transform_2(%arg0: i32) -> (i32, i32) {
    %c0_i32 = arith.constant 0 : i32
    %c0_i32_0 = arith.constant 0 : i32
    return %arg0, %c0_i32 : i32, i32
  }
  func.func @transform_3(%arg0: i32) -> (i32, i32, i32) {
    %c0_i32 = arith.constant 0 : i32
    %c0_i32_0 = arith.constant 0 : i32
    %c0_i32_1 = arith.constant 0 : i32
    return %arg0, %c0_i32, %c0_i32_0 : i32, i32, i32
  }
  func.func @transform_4(%arg0: i32) -> (i32, i32) {
    %c0_i32 = arith.constant 0 : i32
    %c0_i32_0 = arith.constant 0 : i32
    return %arg0, %c0_i32 : i32, i32
  }
  func.func @transform_5(%arg0: i32) -> (i32, i32) {
    %c0_i32 = arith.constant 0 : i32
    %c0_i32_0 = arith.constant 0 : i32
    %c0_i32_1 = arith.constant 0 : i32
    return %c0_i32, %c0_i32_0 : i32, i32
  }
  func.func @transform_6(%arg0: i32) -> (i32, i32) {
    %c0_i32 = arith.constant 0 : i32
    %c0_i32_0 = arith.constant 0 : i32
    %c0_i32_1 = arith.constant 0 : i32
    return %c0_i32, %c0_i32_0 : i32, i32
  }
  func.func @transform_7(%arg0: i32) -> (i32, i32) {
    %c0_i32 = arith.constant 0 : i32
    %c0_i32_0 = arith.constant 0 : i32
    %c0_i32_1 = arith.constant 0 : i32
    return %c0_i32, %c0_i32_0 : i32, i32
  }
  func.func @transform_8(%arg0: i32) -> (i32, i32) {
    %c0_i32 = arith.constant 0 : i32
    %c0_i32_0 = arith.constant 0 : i32
    %c0_i32_1 = arith.constant 0 : i32
    return %c0_i32, %c0_i32_0 : i32, i32
  }
  func.func @transform_9(%arg0: i32) -> (i32, i32) {
    %c0_i32 = arith.constant 0 : i32
    %c0_i32_0 = arith.constant 0 : i32
    return %arg0, %c0_i32 : i32, i32
  }
}

module attributes {stable_mosaic.version = 11 : i64} {
  func.func @_pair_fusion_kernel(%arg0: i32, %arg1: memref<8x128xf32, #tpu.memory_space<vmem>>, %arg2: memref<8x3x128xf32, #tpu.memory_space<vmem>>, %arg3: memref<8x3xf32, #tpu.memory_space<vmem>>, %arg4: memref<8x3x128xf32, #tpu.memory_space<vmem>>, %arg5: memref<8x3xf32, #tpu.memory_space<vmem>>, %arg6: memref<128x128xf32, #tpu.memory_space<vmem>>, %arg7: memref<1x128xf32, #tpu.memory_space<vmem>>, %arg8: memref<128x128xf32, #tpu.memory_space<vmem>>, %arg9: memref<1x128xf32, #tpu.memory_space<vmem>>, %arg10: memref<8x128xf32, #tpu.memory_space<vmem>>) attributes {dimension_semantics = [#tpu.dimension_semantics<parallel>], iteration_bounds = array<i64: 1>, scalar_prefetch = 0 : i64, scratch_operands = 0 : i64, tpu.core_type = #tpu.core_type<tc>, window_params = [{transform_indices = @transform_0, window_bounds = array<i64: 8, 128>}, {transform_indices = @transform_1, window_bounds = array<i64: 8, 3, 128>}, {transform_indices = @transform_2, window_bounds = array<i64: 8, 3>}, {transform_indices = @transform_3, window_bounds = array<i64: 8, 3, 128>}, {transform_indices = @transform_4, window_bounds = array<i64: 8, 3>}, {pipeline_mode = #tpu.pipeline_mode<synchronous>, transform_indices = @transform_5, window_bounds = array<i64: 128, 128>}, {pipeline_mode = #tpu.pipeline_mode<synchronous>, transform_indices = @transform_6, window_bounds = array<i64: 1, 128>}, {pipeline_mode = #tpu.pipeline_mode<synchronous>, transform_indices = @transform_7, window_bounds = array<i64: 128, 128>}, {pipeline_mode = #tpu.pipeline_mode<synchronous>, transform_indices = @transform_8, window_bounds = array<i64: 1, 128>}, {transform_indices = @transform_9, window_bounds = array<i64: 8, 128>}]} {
    %c0 = arith.constant 0 : index
    %c0_0 = arith.constant 0 : index
    %c0_1 = arith.constant 0 : index
    %0 = vector.load %arg2[%c0, %c0_0, %c0_1] : memref<8x3x128xf32, #tpu.memory_space<vmem>>, vector<8x3x128xf32>
    %c0_2 = arith.constant 0 : index
    %c0_3 = arith.constant 0 : index
    %1 = vector.load %arg3[%c0_2, %c0_3] : memref<8x3xf32, #tpu.memory_space<vmem>>, vector<8x3xf32>
    %c0_4 = arith.constant 0 : index
    %c0_5 = arith.constant 0 : index
    %2 = vector.load %arg7[%c0_4, %c0_5] : memref<1x128xf32, #tpu.memory_space<vmem>>, vector<1x128xf32>
    %c0_6 = arith.constant 0 : index
    %c0_7 = arith.constant 0 : index
    %3 = vector.load %arg6[%c0_6, %c0_7] : memref<128x128xf32, #tpu.memory_space<vmem>>, vector<128x128xf32>
    %4 = vector.shape_cast %2 : vector<1x128xf32> to vector<1x1x128xf32>
    %5 = vector.broadcast %4 : vector<1x1x128xf32> to vector<8x3x128xf32>
    %6 = arith.mulf %0, %5 : vector<8x3x128xf32>
    %cst = arith.constant dense<0.000000e+00> : vector<8x3xf32>
    %7 = vector.multi_reduction <add>, %6, %cst [2] : vector<8x3x128xf32> to vector<8x3xf32>
    %cst_8 = arith.constant 0.000000e+00 : f32
    %8 = vector.broadcast %cst_8 : f32 to vector<8x3xf32>
    %9 = arith.cmpf ogt, %1, %8 : vector<8x3xf32>
    %cst_9 = arith.constant -1.000000e+30 : f32
    %10 = vector.broadcast %cst_9 : f32 to vector<8x3xf32>
    %11 = arith.select %9, %7, %10 : vector<8x3xi1>, vector<8x3xf32>
    %cst_10 = arith.constant dense<0xFF800000> : vector<8xf32>
    %12 = vector.multi_reduction <maximumf>, %11, %cst_10 [1] : vector<8x3xf32> to vector<8xf32>
    %13 = vector.shape_cast %12 : vector<8xf32> to vector<8x1xf32>
    %14 = vector.broadcast %13 : vector<8x1xf32> to vector<8x3xf32>
    %15 = arith.subf %11, %14 : vector<8x3xf32>
    %16 = math.exp %15 : vector<8x3xf32>
    %17 = arith.mulf %16, %1 : vector<8x3xf32>
    %cst_11 = arith.constant dense<0.000000e+00> : vector<8xf32>
    %18 = vector.multi_reduction <add>, %17, %cst_11 [1] : vector<8x3xf32> to vector<8xf32>
    %19 = vector.shape_cast %18 : vector<8xf32> to vector<8x1xf32>
    %cst_12 = arith.constant 9.99999968E-21 : f32
    %20 = vector.broadcast %cst_12 : f32 to vector<8x1xf32>
    %21 = arith.addf %19, %20 : vector<8x1xf32>
    %22 = tpu.reciprocal %21 {approx = true} : vector<8x1xf32> -> vector<8x1xf32>
    %23 = vector.broadcast %22 : vector<8x1xf32> to vector<8x3xf32>
    %24 = arith.mulf %17, %23 : vector<8x3xf32>
    %25 = vector.shape_cast %24 : vector<8x3xf32> to vector<8x3x1xf32>
    %26 = vector.broadcast %25 : vector<8x3x1xf32> to vector<8x3x128xf32>
    %27 = arith.mulf %26, %0 : vector<8x3x128xf32>
    %cst_13 = arith.constant dense<0.000000e+00> : vector<8x128xf32>
    %28 = vector.multi_reduction <add>, %27, %cst_13 [1] : vector<8x3x128xf32> to vector<8x128xf32>
    %cst_14 = arith.constant dense<0.000000e+00> : vector<8x128xf32>
    %29 = tpu.matmul %28, %3, %cst_14 {dimension_numbers = #tpu.dot_dimension_numbers<[1], [0], [0], [1], [0, 0, 1, 1], [], []>} : vector<8x128xf32>, vector<128x128xf32>, vector<8x128xf32> -> vector<8x128xf32>
    %c0_15 = arith.constant 0 : index
    %c0_16 = arith.constant 0 : index
    %c0_17 = arith.constant 0 : index
    %30 = vector.load %arg4[%c0_15, %c0_16, %c0_17] : memref<8x3x128xf32, #tpu.memory_space<vmem>>, vector<8x3x128xf32>
    %c0_18 = arith.constant 0 : index
    %c0_19 = arith.constant 0 : index
    %31 = vector.load %arg5[%c0_18, %c0_19] : memref<8x3xf32, #tpu.memory_space<vmem>>, vector<8x3xf32>
    %c0_20 = arith.constant 0 : index
    %c0_21 = arith.constant 0 : index
    %32 = vector.load %arg9[%c0_20, %c0_21] : memref<1x128xf32, #tpu.memory_space<vmem>>, vector<1x128xf32>
    %c0_22 = arith.constant 0 : index
    %c0_23 = arith.constant 0 : index
    %33 = vector.load %arg8[%c0_22, %c0_23] : memref<128x128xf32, #tpu.memory_space<vmem>>, vector<128x128xf32>
    %34 = vector.shape_cast %32 : vector<1x128xf32> to vector<1x1x128xf32>
    %35 = vector.broadcast %34 : vector<1x1x128xf32> to vector<8x3x128xf32>
    %36 = arith.mulf %30, %35 : vector<8x3x128xf32>
    %cst_24 = arith.constant dense<0.000000e+00> : vector<8x3xf32>
    %37 = vector.multi_reduction <add>, %36, %cst_24 [2] : vector<8x3x128xf32> to vector<8x3xf32>
    %cst_25 = arith.constant 0.000000e+00 : f32
    %38 = vector.broadcast %cst_25 : f32 to vector<8x3xf32>
    %39 = arith.cmpf ogt, %31, %38 : vector<8x3xf32>
    %cst_26 = arith.constant -1.000000e+30 : f32
    %40 = vector.broadcast %cst_26 : f32 to vector<8x3xf32>
    %41 = arith.select %39, %37, %40 : vector<8x3xi1>, vector<8x3xf32>
    %cst_27 = arith.constant dense<0xFF800000> : vector<8xf32>
    %42 = vector.multi_reduction <maximumf>, %41, %cst_27 [1] : vector<8x3xf32> to vector<8xf32>
    %43 = vector.shape_cast %42 : vector<8xf32> to vector<8x1xf32>
    %44 = vector.broadcast %43 : vector<8x1xf32> to vector<8x3xf32>
    %45 = arith.subf %41, %44 : vector<8x3xf32>
    %46 = math.exp %45 : vector<8x3xf32>
    %47 = arith.mulf %46, %31 : vector<8x3xf32>
    %cst_28 = arith.constant dense<0.000000e+00> : vector<8xf32>
    %48 = vector.multi_reduction <add>, %47, %cst_28 [1] : vector<8x3xf32> to vector<8xf32>
    %49 = vector.shape_cast %48 : vector<8xf32> to vector<8x1xf32>
    %cst_29 = arith.constant 9.99999968E-21 : f32
    %50 = vector.broadcast %cst_29 : f32 to vector<8x1xf32>
    %51 = arith.addf %49, %50 : vector<8x1xf32>
    %52 = tpu.reciprocal %51 {approx = true} : vector<8x1xf32> -> vector<8x1xf32>
    %53 = vector.broadcast %52 : vector<8x1xf32> to vector<8x3xf32>
    %54 = arith.mulf %47, %53 : vector<8x3xf32>
    %55 = vector.shape_cast %54 : vector<8x3xf32> to vector<8x3x1xf32>
    %56 = vector.broadcast %55 : vector<8x3x1xf32> to vector<8x3x128xf32>
    %57 = arith.mulf %56, %30 : vector<8x3x128xf32>
    %cst_30 = arith.constant dense<0.000000e+00> : vector<8x128xf32>
    %58 = vector.multi_reduction <add>, %57, %cst_30 [1] : vector<8x3x128xf32> to vector<8x128xf32>
    %cst_31 = arith.constant dense<0.000000e+00> : vector<8x128xf32>
    %59 = tpu.matmul %58, %33, %cst_31 {dimension_numbers = #tpu.dot_dimension_numbers<[1], [0], [0], [1], [0, 0, 1, 1], [], []>} : vector<8x128xf32>, vector<128x128xf32>, vector<8x128xf32> -> vector<8x128xf32>
    %c0_32 = arith.constant 0 : index
    %c0_33 = arith.constant 0 : index
    %60 = vector.load %arg1[%c0_32, %c0_33] : memref<8x128xf32, #tpu.memory_space<vmem>>, vector<8x128xf32>
    %61 = arith.addf %60, %29 : vector<8x128xf32>
    %62 = arith.addf %61, %59 : vector<8x128xf32>
    %c0_34 = arith.constant 0 : index
    %c0_35 = arith.constant 0 : index
    %63 = vector.load %arg10[%c0_34, %c0_35] : memref<8x128xf32, #tpu.memory_space<vmem>>, vector<8x128xf32>
    tpu.vector_store %arg10[%c0_34, %c0_35], %62 {strides = array<i32>} : memref<8x128xf32, #tpu.memory_space<vmem>>, vector<8x128xf32>,
    return
  }
  func.func @transform_0(%arg0: i32) -> (i32, i32) {
    %c0_i32 = arith.constant 0 : i32
    %c0_i32_0 = arith.constant 0 : i32
    return %arg0, %c0_i32 : i32, i32
  }
  func.func @transform_1(%arg0: i32) -> (i32, i32, i32) {
    %c0_i32 = arith.constant 0 : i32
    %c0_i32_0 = arith.constant 0 : i32
    %c0_i32_1 = arith.constant 0 : i32
    return %arg0, %c0_i32, %c0_i32_0 : i32, i32, i32
  }
  func.func @transform_2(%arg0: i32) -> (i32, i32) {
    %c0_i32 = arith.constant 0 : i32
    %c0_i32_0 = arith.constant 0 : i32
    return %arg0, %c0_i32 : i32, i32
  }
  func.func @transform_3(%arg0: i32) -> (i32, i32, i32) {
    %c0_i32 = arith.constant 0 : i32
    %c0_i32_0 = arith.constant 0 : i32
    %c0_i32_1 = arith.constant 0 : i32
    return %arg0, %c0_i32, %c0_i32_0 : i32, i32, i32
  }
  func.func @transform_4(%arg0: i32) -> (i32, i32) {
    %c0_i32 = arith.constant 0 : i32
    %c0_i32_0 = arith.constant 0 : i32
    return %arg0, %c0_i32 : i32, i32
  }
  func.func @transform_5(%arg0: i32) -> (i32, i32) {
    %c0_i32 = arith.constant 0 : i32
    %c0_i32_0 = arith.constant 0 : i32
    %c0_i32_1 = arith.constant 0 : i32
    return %c0_i32, %c0_i32_0 : i32, i32
  }
  func.func @transform_6(%arg0: i32) -> (i32, i32) {
    %c0_i32 = arith.constant 0 : i32
    %c0_i32_0 = arith.constant 0 : i32
    %c0_i32_1 = arith.constant 0 : i32
    return %c0_i32, %c0_i32_0 : i32, i32
  }
  func.func @transform_7(%arg0: i32) -> (i32, i32) {
    %c0_i32 = arith.constant 0 : i32
    %c0_i32_0 = arith.constant 0 : i32
    %c0_i32_1 = arith.constant 0 : i32
    return %c0_i32, %c0_i32_0 : i32, i32
  }
  func.func @transform_8(%arg0: i32) -> (i32, i32) {
    %c0_i32 = arith.constant 0 : i32
    %c0_i32_0 = arith.constant 0 : i32
    %c0_i32_1 = arith.constant 0 : i32
    return %c0_i32, %c0_i32_0 : i32, i32
  }
  func.func @transform_9(%arg0: i32) -> (i32, i32) {
    %c0_i32 = arith.constant 0 : i32
    %c0_i32_0 = arith.constant 0 : i32
    return %arg0, %c0_i32 : i32, i32
  }
}

module attributes {stable_mosaic.version = 11 : i64} {
  func.func @_diagnosis_kernel(%arg0: i32, %arg1: memref<128x128xf32, #tpu.memory_space<vmem>>, %arg2: memref<128x128xf32, #tpu.memory_space<vmem>>, %arg3: memref<3x128x128xf32, #tpu.memory_space<vmem>>, %arg4: memref<3x128xf32, #tpu.memory_space<vmem>>, %arg5: memref<128x128xf32, #tpu.memory_space<vmem>>, %arg6: memref<128x128xf32, #tpu.memory_space<vmem>>, %arg7: memref<128x256xf32, #tpu.memory_space<vmem>>, %arg8: memref<1x128xf32, #tpu.memory_space<vmem>>, %arg9: memref<1x1xf32, #tpu.memory_space<vmem>>, %arg10: memref<1x128xf32, #tpu.memory_space<vmem>>) attributes {dimension_semantics = [#tpu.dimension_semantics<parallel>], iteration_bounds = array<i64: 1>, scalar_prefetch = 0 : i64, scratch_operands = 0 : i64, tpu.core_type = #tpu.core_type<tc>, window_params = [{transform_indices = @transform_0, window_bounds = array<i64: 128, 128>}, {transform_indices = @transform_1, window_bounds = array<i64: 128, 128>}, {transform_indices = @transform_2, window_bounds = array<i64: 3, 128, 128>}, {transform_indices = @transform_3, window_bounds = array<i64: 3, 128>}, {pipeline_mode = #tpu.pipeline_mode<synchronous>, transform_indices = @transform_4, window_bounds = array<i64: 128, 128>}, {pipeline_mode = #tpu.pipeline_mode<synchronous>, transform_indices = @transform_5, window_bounds = array<i64: 128, 128>}, {pipeline_mode = #tpu.pipeline_mode<synchronous>, transform_indices = @transform_6, window_bounds = array<i64: 128, 256>}, {pipeline_mode = #tpu.pipeline_mode<synchronous>, transform_indices = @transform_7, window_bounds = array<i64: 1, 128>}, {pipeline_mode = #tpu.pipeline_mode<synchronous>, transform_indices = @transform_8, window_bounds = array<i64: 1, 1>}, {transform_indices = @transform_9, window_bounds = array<i64: 1, 128>}]} {
    %c0 = arith.constant 0 : index
    %c0_0 = arith.constant 0 : index
    %0 = vector.load %arg1[%c0, %c0_0] : memref<128x128xf32, #tpu.memory_space<vmem>>, vector<128x128xf32>
    %c0_1 = arith.constant 0 : index
    %c0_2 = arith.constant 0 : index
    %1 = vector.load %arg5[%c0_1, %c0_2] : memref<128x128xf32, #tpu.memory_space<vmem>>, vector<128x128xf32>
    %cst = arith.constant dense<0.000000e+00> : vector<128x128xf32>
    %2 = tpu.matmul %0, %1, %cst {dimension_numbers = #tpu.dot_dimension_numbers<[1], [0], [0], [1], [0, 0, 1, 1], [], []>} : vector<128x128xf32>, vector<128x128xf32>, vector<128x128xf32> -> vector<128x128xf32>
    %c0_3 = arith.constant 0 : index
    %c0_4 = arith.constant 0 : index
    %3 = vector.load %arg2[%c0_3, %c0_4] : memref<128x128xf32, #tpu.memory_space<vmem>>, vector<128x128xf32>
    %c0_5 = arith.constant 0 : index
    %c0_6 = arith.constant 0 : index
    %4 = vector.load %arg6[%c0_5, %c0_6] : memref<128x128xf32, #tpu.memory_space<vmem>>, vector<128x128xf32>
    %cst_7 = arith.constant dense<0.000000e+00> : vector<128x128xf32>
    %5 = tpu.matmul %3, %4, %cst_7 {dimension_numbers = #tpu.dot_dimension_numbers<[1], [0], [0], [1], [0, 0, 1, 1], [], []>} : vector<128x128xf32>, vector<128x128xf32>, vector<128x128xf32> -> vector<128x128xf32>
    %cst_8 = arith.constant 0.000000e+00 : f32
    %6 = vector.broadcast %cst_8 : f32 to vector<1x128xf32>
    %cst_9 = arith.constant 0.000000e+00 : f32
    %7 = vector.broadcast %cst_9 : f32 to vector<1x128xf32>
    %c0_10 = arith.constant 0 : index
    %c0_11 = arith.constant 0 : index
    %c0_12 = arith.constant 0 : index
    %8 = vector.load %arg3[%c0_10, %c0_11, %c0_12] : memref<3x128x128xf32, #tpu.memory_space<vmem>>, vector<1x128x128xf32>
    %9 = vector.shape_cast %8 : vector<1x128x128xf32> to vector<128x128xf32>
    %c0_13 = arith.constant 0 : index
    %c0_14 = arith.constant 0 : index
    %10 = vector.load %arg7[%c0_13, %c0_14] : memref<128x256xf32, #tpu.memory_space<vmem>>, vector<128x256xf32>
    %cst_15 = arith.constant dense<0.000000e+00> : vector<128x256xf32>
    %11 = tpu.matmul %9, %10, %cst_15 {dimension_numbers = #tpu.dot_dimension_numbers<[1], [0], [0], [1], [0, 0, 1, 1], [], []>} : vector<128x128xf32>, vector<128x256xf32>, vector<128x256xf32> -> vector<128x256xf32>
    %12 = vector.extract_strided_slice %11 {offsets = [0, 0], sizes = [128, 128], strides = [1, 1]} : vector<128x256xf32> to vector<128x128xf32>
    %13 = arith.addf %12, %2 : vector<128x128xf32>
    %cst_16 = arith.constant 5.000000e-01 : f32
    %14 = vector.broadcast %cst_16 : f32 to vector<128x128xf32>
    %15 = arith.mulf %14, %13 : vector<128x128xf32>
    %16 = math.tanh %15 : vector<128x128xf32>
    %cst_17 = arith.constant 1.000000e+00 : f32
    %17 = vector.broadcast %cst_17 : f32 to vector<128x128xf32>
    %18 = arith.addf %16, %17 : vector<128x128xf32>
    %cst_18 = arith.constant 5.000000e-01 : f32
    %19 = vector.broadcast %cst_18 : f32 to vector<128x128xf32>
    %20 = arith.mulf %19, %18 : vector<128x128xf32>
    %21 = vector.extract_strided_slice %11 {offsets = [0, 128], sizes = [128, 128], strides = [1, 1]} : vector<128x256xf32> to vector<128x128xf32>
    %22 = arith.addf %21, %5 : vector<128x128xf32>
    %cst_19 = arith.constant 5.000000e-01 : f32
    %23 = vector.broadcast %cst_19 : f32 to vector<128x128xf32>
    %24 = arith.mulf %23, %22 : vector<128x128xf32>
    %25 = math.tanh %24 : vector<128x128xf32>
    %cst_20 = arith.constant 1.000000e+00 : f32
    %26 = vector.broadcast %cst_20 : f32 to vector<128x128xf32>
    %27 = arith.addf %25, %26 : vector<128x128xf32>
    %cst_21 = arith.constant 5.000000e-01 : f32
    %28 = vector.broadcast %cst_21 : f32 to vector<128x128xf32>
    %29 = arith.mulf %28, %27 : vector<128x128xf32>
    %c0_22 = arith.constant 0 : index
    %c0_23 = arith.constant 0 : index
    %30 = vector.load %arg8[%c0_22, %c0_23] : memref<1x128xf32, #tpu.memory_space<vmem>>, vector<1x128xf32>
    %31 = arith.subf %20, %29 : vector<128x128xf32>
    %cst_24 = arith.constant dense<0.000000e+00> : vector<1x128xf32>
    %32 = tpu.matmul %30, %31, %cst_24 {dimension_numbers = #tpu.dot_dimension_numbers<[1], [1], [0], [0], [0, 0, 1, 0], [], []>} : vector<1x128xf32>, vector<128x128xf32>, vector<1x128xf32> -> vector<1x128xf32>
    %c0_25 = arith.constant 0 : index
    %c0_26 = arith.constant 0 : index
    %33 = vector.load %arg9[%c0_25, %c0_26] : memref<1x1xf32, #tpu.memory_space<vmem>>, vector<1x1xf32>
    %34 = vector.broadcast %33 : vector<1x1xf32> to vector<1x128xf32>
    %35 = arith.addf %32, %34 : vector<1x128xf32>
    %c0_27 = arith.constant 0 : index
    %c0_28 = arith.constant 0 : index
    %36 = vector.load %arg4[%c0_27, %c0_28] : memref<3x128xf32, #tpu.memory_space<vmem>>, vector<1x128xf32>
    %cst_29 = arith.constant 5.000000e-01 : f32
    %37 = vector.broadcast %cst_29 : f32 to vector<1x128xf32>
    %38 = arith.mulf %37, %35 : vector<1x128xf32>
    %39 = math.tanh %38 : vector<1x128xf32>
    %cst_30 = arith.constant 1.000000e+00 : f32
    %40 = vector.broadcast %cst_30 : f32 to vector<1x128xf32>
    %41 = arith.addf %39, %40 : vector<1x128xf32>
    %cst_31 = arith.constant 5.000000e-01 : f32
    %42 = vector.broadcast %cst_31 : f32 to vector<1x128xf32>
    %43 = arith.mulf %42, %41 : vector<1x128xf32>
    %44 = arith.mulf %43, %36 : vector<1x128xf32>
    %45 = arith.addf %6, %44 : vector<1x128xf32>
    %46 = arith.addf %7, %36 : vector<1x128xf32>
    %c1 = arith.constant 1 : index
    %c0_32 = arith.constant 0 : index
    %c0_33 = arith.constant 0 : index
    %47 = vector.load %arg3[%c1, %c0_32, %c0_33] : memref<3x128x128xf32, #tpu.memory_space<vmem>>, vector<1x128x128xf32>
    %48 = vector.shape_cast %47 : vector<1x128x128xf32> to vector<128x128xf32>
    %c0_34 = arith.constant 0 : index
    %c0_35 = arith.constant 0 : index
    %49 = vector.load %arg7[%c0_34, %c0_35] : memref<128x256xf32, #tpu.memory_space<vmem>>, vector<128x256xf32>
    %cst_36 = arith.constant dense<0.000000e+00> : vector<128x256xf32>
    %50 = tpu.matmul %48, %49, %cst_36 {dimension_numbers = #tpu.dot_dimension_numbers<[1], [0], [0], [1], [0, 0, 1, 1], [], []>} : vector<128x128xf32>, vector<128x256xf32>, vector<128x256xf32> -> vector<128x256xf32>
    %51 = vector.extract_strided_slice %50 {offsets = [0, 0], sizes = [128, 128], strides = [1, 1]} : vector<128x256xf32> to vector<128x128xf32>
    %52 = arith.addf %51, %2 : vector<128x128xf32>
    %cst_37 = arith.constant 5.000000e-01 : f32
    %53 = vector.broadcast %cst_37 : f32 to vector<128x128xf32>
    %54 = arith.mulf %53, %52 : vector<128x128xf32>
    %55 = math.tanh %54 : vector<128x128xf32>
    %cst_38 = arith.constant 1.000000e+00 : f32
    %56 = vector.broadcast %cst_38 : f32 to vector<128x128xf32>
    %57 = arith.addf %55, %56 : vector<128x128xf32>
    %cst_39 = arith.constant 5.000000e-01 : f32
    %58 = vector.broadcast %cst_39 : f32 to vector<128x128xf32>
    %59 = arith.mulf %58, %57 : vector<128x128xf32>
    %60 = vector.extract_strided_slice %50 {offsets = [0, 128], sizes = [128, 128], strides = [1, 1]} : vector<128x256xf32> to vector<128x128xf32>
    %61 = arith.addf %60, %5 : vector<128x128xf32>
    %cst_40 = arith.constant 5.000000e-01 : f32
    %62 = vector.broadcast %cst_40 : f32 to vector<128x128xf32>
    %63 = arith.mulf %62, %61 : vector<128x128xf32>
    %64 = math.tanh %63 : vector<128x128xf32>
    %cst_41 = arith.constant 1.000000e+00 : f32
    %65 = vector.broadcast %cst_41 : f32 to vector<128x128xf32>
    %66 = arith.addf %64, %65 : vector<128x128xf32>
    %cst_42 = arith.constant 5.000000e-01 : f32
    %67 = vector.broadcast %cst_42 : f32 to vector<128x128xf32>
    %68 = arith.mulf %67, %66 : vector<128x128xf32>
    %c0_43 = arith.constant 0 : index
    %c0_44 = arith.constant 0 : index
    %69 = vector.load %arg8[%c0_43, %c0_44] : memref<1x128xf32, #tpu.memory_space<vmem>>, vector<1x128xf32>
    %70 = arith.subf %59, %68 : vector<128x128xf32>
    %cst_45 = arith.constant dense<0.000000e+00> : vector<1x128xf32>
    %71 = tpu.matmul %69, %70, %cst_45 {dimension_numbers = #tpu.dot_dimension_numbers<[1], [1], [0], [0], [0, 0, 1, 0], [], []>} : vector<1x128xf32>, vector<128x128xf32>, vector<1x128xf32> -> vector<1x128xf32>
    %c0_46 = arith.constant 0 : index
    %c0_47 = arith.constant 0 : index
    %72 = vector.load %arg9[%c0_46, %c0_47] : memref<1x1xf32, #tpu.memory_space<vmem>>, vector<1x1xf32>
    %73 = vector.broadcast %72 : vector<1x1xf32> to vector<1x128xf32>
    %74 = arith.addf %71, %73 : vector<1x128xf32>
    %c1_48 = arith.constant 1 : index
    %c0_49 = arith.constant 0 : index
    %75 = vector.load %arg4[%c1_48, %c0_49] : memref<3x128xf32, #tpu.memory_space<vmem>>, vector<1x128xf32>
    %cst_50 = arith.constant 5.000000e-01 : f32
    %76 = vector.broadcast %cst_50 : f32 to vector<1x128xf32>
    %77 = arith.mulf %76, %74 : vector<1x128xf32>
    %78 = math.tanh %77 : vector<1x128xf32>
    %cst_51 = arith.constant 1.000000e+00 : f32
    %79 = vector.broadcast %cst_51 : f32 to vector<1x128xf32>
    %80 = arith.addf %78, %79 : vector<1x128xf32>
    %cst_52 = arith.constant 5.000000e-01 : f32
    %81 = vector.broadcast %cst_52 : f32 to vector<1x128xf32>
    %82 = arith.mulf %81, %80 : vector<1x128xf32>
    %83 = arith.mulf %82, %75 : vector<1x128xf32>
    %84 = arith.addf %45, %83 : vector<1x128xf32>
    %85 = arith.addf %46, %75 : vector<1x128xf32>
    %c2 = arith.constant 2 : index
    %c0_53 = arith.constant 0 : index
    %c0_54 = arith.constant 0 : index
    %86 = vector.load %arg3[%c2, %c0_53, %c0_54] : memref<3x128x128xf32, #tpu.memory_space<vmem>>, vector<1x128x128xf32>
    %87 = vector.shape_cast %86 : vector<1x128x128xf32> to vector<128x128xf32>
    %c0_55 = arith.constant 0 : index
    %c0_56 = arith.constant 0 : index
    %88 = vector.load %arg7[%c0_55, %c0_56] : memref<128x256xf32, #tpu.memory_space<vmem>>, vector<128x256xf32>
    %cst_57 = arith.constant dense<0.000000e+00> : vector<128x256xf32>
    %89 = tpu.matmul %87, %88, %cst_57 {dimension_numbers = #tpu.dot_dimension_numbers<[1], [0], [0], [1], [0, 0, 1, 1], [], []>} : vector<128x128xf32>, vector<128x256xf32>, vector<128x256xf32> -> vector<128x256xf32>
    %90 = vector.extract_strided_slice %89 {offsets = [0, 0], sizes = [128, 128], strides = [1, 1]} : vector<128x256xf32> to vector<128x128xf32>
    %91 = arith.addf %90, %2 : vector<128x128xf32>
    %cst_58 = arith.constant 5.000000e-01 : f32
    %92 = vector.broadcast %cst_58 : f32 to vector<128x128xf32>
    %93 = arith.mulf %92, %91 : vector<128x128xf32>
    %94 = math.tanh %93 : vector<128x128xf32>
    %cst_59 = arith.constant 1.000000e+00 : f32
    %95 = vector.broadcast %cst_59 : f32 to vector<128x128xf32>
    %96 = arith.addf %94, %95 : vector<128x128xf32>
    %cst_60 = arith.constant 5.000000e-01 : f32
    %97 = vector.broadcast %cst_60 : f32 to vector<128x128xf32>
    %98 = arith.mulf %97, %96 : vector<128x128xf32>
    %99 = vector.extract_strided_slice %89 {offsets = [0, 128], sizes = [128, 128], strides = [1, 1]} : vector<128x256xf32> to vector<128x128xf32>
    %100 = arith.addf %99, %5 : vector<128x128xf32>
    %cst_61 = arith.constant 5.000000e-01 : f32
    %101 = vector.broadcast %cst_61 : f32 to vector<128x128xf32>
    %102 = arith.mulf %101, %100 : vector<128x128xf32>
    %103 = math.tanh %102 : vector<128x128xf32>
    %cst_62 = arith.constant 1.000000e+00 : f32
    %104 = vector.broadcast %cst_62 : f32 to vector<128x128xf32>
    %105 = arith.addf %103, %104 : vector<128x128xf32>
    %cst_63 = arith.constant 5.000000e-01 : f32
    %106 = vector.broadcast %cst_63 : f32 to vector<128x128xf32>
    %107 = arith.mulf %106, %105 : vector<128x128xf32>
    %c0_64 = arith.constant 0 : index
    %c0_65 = arith.constant 0 : index
    %108 = vector.load %arg8[%c0_64, %c0_65] : memref<1x128xf32, #tpu.memory_space<vmem>>, vector<1x128xf32>
    %109 = arith.subf %98, %107 : vector<128x128xf32>
    %cst_66 = arith.constant dense<0.000000e+00> : vector<1x128xf32>
    %110 = tpu.matmul %108, %109, %cst_66 {dimension_numbers = #tpu.dot_dimension_numbers<[1], [1], [0], [0], [0, 0, 1, 0], [], []>} : vector<1x128xf32>, vector<128x128xf32>, vector<1x128xf32> -> vector<1x128xf32>
    %c0_67 = arith.constant 0 : index
    %c0_68 = arith.constant 0 : index
    %111 = vector.load %arg9[%c0_67, %c0_68] : memref<1x1xf32, #tpu.memory_space<vmem>>, vector<1x1xf32>
    %112 = vector.broadcast %111 : vector<1x1xf32> to vector<1x128xf32>
    %113 = arith.addf %110, %112 : vector<1x128xf32>
    %c2_69 = arith.constant 2 : index
    %c0_70 = arith.constant 0 : index
    %114 = vector.load %arg4[%c2_69, %c0_70] : memref<3x128xf32, #tpu.memory_space<vmem>>, vector<1x128xf32>
    %cst_71 = arith.constant 5.000000e-01 : f32
    %115 = vector.broadcast %cst_71 : f32 to vector<1x128xf32>
    %116 = arith.mulf %115, %113 : vector<1x128xf32>
    %117 = math.tanh %116 : vector<1x128xf32>
    %cst_72 = arith.constant 1.000000e+00 : f32
    %118 = vector.broadcast %cst_72 : f32 to vector<1x128xf32>
    %119 = arith.addf %117, %118 : vector<1x128xf32>
    %cst_73 = arith.constant 5.000000e-01 : f32
    %120 = vector.broadcast %cst_73 : f32 to vector<1x128xf32>
    %121 = arith.mulf %120, %119 : vector<1x128xf32>
    %122 = arith.mulf %121, %114 : vector<1x128xf32>
    %123 = arith.addf %84, %122 : vector<1x128xf32>
    %124 = arith.addf %85, %114 : vector<1x128xf32>
    %cst_74 = arith.constant 1.000000e+00 : f32
    %125 = vector.broadcast %cst_74 : f32 to vector<1x128xf32>
    %126 = arith.maximumf %124, %125 : vector<1x128xf32>
    %127 = arith.divf %123, %126 : vector<1x128xf32>
    %c0_75 = arith.constant 0 : index
    %c0_76 = arith.constant 0 : index
    %128 = vector.load %arg10[%c0_75, %c0_76] : memref<1x128xf32, #tpu.memory_space<vmem>>, vector<1x128xf32>
    tpu.vector_store %arg10[%c0_75, %c0_76], %127 {strides = array<i32>} : memref<1x128xf32, #tpu.memory_space<vmem>>, vector<1x128xf32>,
    return
  }
  func.func @transform_0(%arg0: i32) -> (i32, i32) {
    %c0_i32 = arith.constant 0 : i32
    %c0_i32_0 = arith.constant 0 : i32
    return %arg0, %c0_i32 : i32, i32
  }
  func.func @transform_1(%arg0: i32) -> (i32, i32) {
    %c0_i32 = arith.constant 0 : i32
    %c0_i32_0 = arith.constant 0 : i32
    return %arg0, %c0_i32 : i32, i32
  }
  func.func @transform_2(%arg0: i32) -> (i32, i32, i32) {
    %c0_i32 = arith.constant 0 : i32
    %c0_i32_0 = arith.constant 0 : i32
    %c0_i32_1 = arith.constant 0 : i32
    return %c0_i32, %arg0, %c0_i32_0 : i32, i32, i32
  }
  func.func @transform_3(%arg0: i32) -> (i32, i32) {
    %c0_i32 = arith.constant 0 : i32
    %c0_i32_0 = arith.constant 0 : i32
    return %c0_i32, %arg0 : i32, i32
  }
  func.func @transform_4(%arg0: i32) -> (i32, i32) {
    %c0_i32 = arith.constant 0 : i32
    %c0_i32_0 = arith.constant 0 : i32
    %c0_i32_1 = arith.constant 0 : i32
    return %c0_i32, %c0_i32_0 : i32, i32
  }
  func.func @transform_5(%arg0: i32) -> (i32, i32) {
    %c0_i32 = arith.constant 0 : i32
    %c0_i32_0 = arith.constant 0 : i32
    %c0_i32_1 = arith.constant 0 : i32
    return %c0_i32, %c0_i32_0 : i32, i32
  }
  func.func @transform_6(%arg0: i32) -> (i32, i32) {
    %c0_i32 = arith.constant 0 : i32
    %c0_i32_0 = arith.constant 0 : i32
    %c0_i32_1 = arith.constant 0 : i32
    return %c0_i32, %c0_i32_0 : i32, i32
  }
  func.func @transform_7(%arg0: i32) -> (i32, i32) {
    %c0_i32 = arith.constant 0 : i32
    %c0_i32_0 = arith.constant 0 : i32
    %c0_i32_1 = arith.constant 0 : i32
    return %c0_i32, %c0_i32_0 : i32, i32
  }
  func.func @transform_8(%arg0: i32) -> (i32, i32) {
    %c0_i32 = arith.constant 0 : i32
    %c0_i32_0 = arith.constant 0 : i32
    %c0_i32_1 = arith.constant 0 : i32
    return %c0_i32, %c0_i32_0 : i32, i32
  }
  func.func @transform_9(%arg0: i32) -> (i32, i32) {
    %c0_i32 = arith.constant 0 : i32
    %c0_i32_0 = arith.constant 0 : i32
    return %arg0, %c0_i32 : i32, i32
  }
}

</mosaic_0001>

<bundles_post_ra>
// kernel: forward.7
= control target key start
LH: loop header
LB: loop body
LE: loop exit
PB: predicated region body
PF: predicated region fallthrough
CT: control target
= control target key end

     0   :  { %vm72_vm0 = vcmask 1041408   ;;  %vm416_vm1 = vcmask 1042432   ;;  %v106_v52 = vlaneseq  ;;  %vm140_vm2 = vcmask 1041409   ;;  %s1254_s1 = inlined_call_operand.vmem [shape: f32[8,2,128], index: 1, kind: input, shape index: {}]   ;;  %s1255_s6 = inlined_call_operand.vmem [shape: f32[1,128], index: 6, kind: input, shape index: {}]   ;;  %s1256_s3 = inlined_call_operand.vmem [shape: f32[8,3,128], index: 3, kind: input, shape index: {}]   ;;  %s1257_s8 = inlined_call_operand.vmem [shape: f32[1,128], index: 8, kind: input, shape index: {}]   ;;  %s1258_s2 = inlined_call_operand.vmem [shape: f32[8,2], index: 2, kind: input, shape index: {}]   ;;  %s1259_s4 = inlined_call_operand.vmem [shape: f32[8,3], index: 4, kind: input, shape index: {}]   ;;  %s1260_s5 = inlined_call_operand.vmem [shape: f32[128,128], index: 5, kind: input, shape index: {}]   ;;  %s1261_s7 = inlined_call_operand.vmem [shape: f32[128,128], index: 7, kind: input, shape index: {}]   ;;  %s1262_s0 = inlined_call_operand.vmem [shape: f32[8,128], index: 0, kind: input, shape index: {}]   ;;  %s1263_s9 = inlined_call_operand.vmem [shape: f32[8,128], index: 9, kind: output, shape index: {}]  }
   0x1   :  { %v890_v0 = vld [vmem:[%s1254_s1 + $0x4] sm:$0x3]  ;;  %v719_v1 = vld [vmem:[%s1255_s6] ss:$0 sm:$0xff]  ;;  %v905_v5 = vld [vmem:[%s1254_s1 + $0x6] sm:$0x3] }
   0x2   :  { %v898_v2 = vld [vmem:[%s1254_s1] sm:$0x3]  ;;  %v66_v3 = vmul.f32 %v719_v1, %v890_v0  ;;  %v910_v6 = vld [vmem:[%s1254_s1 + $0x2] sm:$0x3]  ;;  %v67_v7 = vmul.f32 %v719_v1, %v905_v5  ;;  %v917_v9 = vld [vmem:[%s1256_s3 + $0x4] sm:$0x7] }
   0x3   :  { %v64_v4 = vmul.f32 %v719_v1, %v898_v2  ;;  %v65_v8 = vmul.f32 %v719_v1, %v910_v6  ;;  %v720_v10 = vld [vmem:[%s1257_s8] ss:$0 sm:$0xff]  ;;  %v936_v18 = vld [vmem:[%s1256_s3 + $0x8] sm:$0x7]  ;;  %v950_v24 = vld [vmem:[%s1256_s3 + $0xc] sm:$0x7] }
   0x4   :  { %v925_v11 = vld [vmem:[%s1256_s3] sm:$0x7]  ;;  %v79_v12 = vsel %vm72_vm0, %v66_v3, 0.0  ;;  %v82_v14 = vsel %vm72_vm0, %v67_v7, 0.0  ;;  %v409_v16 = vmul.f32 %v720_v10, %v917_v9  ;;  %v941_v19 = vld [vmem:[%s1254_s1 + $0x8] sm:$0x3]  ;;  %v410_v22 = vmul.f32 %v720_v10, %v936_v18 }
   0x5   :  { %v73_v13 = vsel %vm72_vm0, %v64_v4, 0.0  ;;  %80 = vadd.xlane.f32.xlu1 %v79_v12  ;;  %v76_v15 = vsel %vm72_vm0, %v65_v8, 0.0  ;;  %v408_v17 = vmul.f32 %v720_v10, %v925_v11  ;;  %v68_v23 = vmul.f32 %v719_v1, %v941_v19  ;;  %v955_v25 = vld [vmem:[%s1254_s1 + $0xa] sm:$0x3]  ;;  %v964_v30 = vld [vmem:[%s1256_s3 + $0x10] sm:$0x7] }
   0x6   :  { %74 = vadd.xlane.f32.xlu0 %v73_v13  ;;  %v420_v20 = vsel %vm416_vm1, %v409_v16, 0.0  ;;  %v423_v26 = vsel %vm416_vm1, %v410_v22, 0.0  ;;  %v411_v28 = vmul.f32 %v720_v10, %v950_v24  ;;  %v69_v29 = vmul.f32 %v719_v1, %v955_v25  ;;  %v969_v31 = vld [vmem:[%s1254_s1 + $0xc] sm:$0x3]  ;;  %v978_v36 = vld [vmem:[%s1256_s3 + $0x14] sm:$0x7] }
   0x7   :  { %v417_v21 = vsel %vm416_vm1, %v408_v17, 0.0  ;;  %v85_v27 = vsel %vm72_vm0, %v68_v23, 0.0  ;;  %v412_v34 = vmul.f32 %v720_v10, %v964_v30  ;;  %v70_v35 = vmul.f32 %v719_v1, %v969_v31  ;;  %v983_v37 = vld [vmem:[%s1254_s1 + $0xe] sm:$0x3]  ;;  %v992_v42 = vld [vmem:[%s1256_s3 + $0x18] sm:$0x7] }
   0x8   :  { %v426_v32 = vsel %vm416_vm1, %v411_v28, 0.0  ;;  %v88_v33 = vsel %vm72_vm0, %v69_v29, 0.0  ;;  %v413_v40 = vmul.f32 %v720_v10, %v978_v36  ;;  %v71_v41 = vmul.f32 %v719_v1, %v983_v37  ;;  %v997_v43 = vld [vmem:[%s1256_s3 + $0x1c] sm:$0x7] }
   0x9   :  { %83 = vadd.xlane.f32.xlu1 %v82_v14  ;;  %v429_v38 = vsel %vm416_vm1, %v412_v34, 0.0  ;;  %v91_v39 = vsel %vm72_vm0, %v70_v35, 0.0  ;;  %v414_v46 = vmul.f32 %v720_v10, %v992_v42  ;;  %v415_v47 = vmul.f32 %v720_v10, %v997_v43 }
   0xa   :  { %77 = vadd.xlane.f32.xlu0 %v76_v15  ;;  %v432_v44 = vsel %vm416_vm1, %v413_v40, 0.0  ;;  %v94_v45 = vsel %vm72_vm0, %v71_v41, 0.0  ;;  %v107_v55 = vand.u32 127, %v106_v52  ;;  %v1005_v56 = vshrl.u32 %v106_v52, 7 }
   0xb   :  { %v435_v48 = vsel %vm416_vm1, %v414_v46, 0.0  ;;  %v438_v49 = vsel %vm416_vm1, %v415_v47, 0.0  ;;  %vm142_vm3 = vcmask 1042434   ;;  %vm144_vm4 = vcmask 1043459  }
   0xc   :  { %v110_v59 = vsub.s32 %v107_v55, %v1005_v56  ;;  %vm146_vm5 = vcmask 1044484   ;;  %vm148_vm6 = vcmask 1045509   ;;  %vm150_vm7 = vcmask 1046534  }
   0xd   :  { %421 = vadd.xlane.f32.xlu1 %v420_v20  ;;  %vm152_vm8 = vcmask 1047559   ;;  %vm156_vm10 = vcmask 15360   ;;  %vm491_vm12 = vcmask 23552   ;;  %vm836_vm13 = vmmov 0  }
   0xe   :  { %418 = vadd.xlane.f32.xlu0 %v417_v21  ;;  %v40_v21 = vld [vmem:[%s1258_s2] sm:$0xff] }
   0xf   :  { %vm97_vm9 = vcmp.gt.f32.partialorder %v40_v21, 0.0 }
  0x11   :  { %424 = vadd.xlane.f32.xlu1 %v423_v26 }
  0x12   :  { %86 = vadd.xlane.f32.xlu0 %v85_v27 }
  0x15   :  { %427 = vadd.xlane.f32.xlu1 %v426_v32 }
  0x16   :  { %89 = vadd.xlane.f32.xlu0 %v88_v33 }
  0x19   :  { %430 = vadd.xlane.f32.xlu1 %v429_v38 }
  0x1a   :  { %92 = vadd.xlane.f32.xlu0 %v91_v39 }
  0x1d   :  { %433 = vadd.xlane.f32.xlu1 %v432_v44  ;;  %v384_v44 = vld [vmem:[%s1259_s4] sm:$0xff] }
  0x1e   :  { %95 = vadd.xlane.f32.xlu0 %v94_v45  ;;  %vm441_vm11 = vcmp.gt.f32.partialorder %v384_v44, 0.0 }
  0x21   :  { %439 = vadd.xlane.f32.xlu1 %v438_v49 }
  0x22   :  { %436 = vadd.xlane.f32.xlu0 %v435_v48 }
  0x8e   :  { %v81_v50 = vpop.xlane.xlu1 %80 }
  0x8f   :  { %v75_v51 = vpop.xlane.xlu0 %74  ;;  %v119_v1 = vrot.slane %v81_v50, %v110_v59 }
  0x90   :  { %v111_v63 = vrot.slane %v75_v51, %v110_v59 }
  0x92   :  { %v84_v53 = vpop.xlane.xlu1 %83 }
  0x93   :  { %v78_v54 = vpop.xlane.xlu0 %77  ;;  %v123_v8 = vrot.slane %v84_v53, %v110_v59 }
  0x94   :  { %v115_v62 = vrot.slane %v78_v54, %v110_v59 }
  0x96   :  { %v422_v57 = vpop.xlane.xlu1 %421  ;;  %v141_v7 = vsel %vm140_vm2, %v115_v62, %v111_v63 }
  0x97   :  { %v419_v58 = vpop.xlane.xlu0 %418  ;;  %v143_v10 = vsel %vm142_vm3, %v119_v1, %v141_v7  ;;  %v457_v16 = vrot.slane %v422_v57, %v110_v59 }
  0x98   :  { %v453_v17 = vrot.slane %v419_v58, %v110_v59  ;;  %v145_v23 = vsel %vm144_vm4, %v123_v8, %v143_v10 }
  0x9a   :  { %v425_v60 = vpop.xlane.xlu1 %424  ;;  %v482_v35 = vsel %vm140_vm2, %v457_v16, %v453_v17  ;;  %v835_v17 = vmov 0.0  }
  0x9b   :  { %v87_v61 = vpop.xlane.xlu0 %86  ;;  %v461_v22 = vrot.slane %v425_v60, %v110_v59  ;;  %755 = vmatprep.subr.mxu0 %v835_v17  ;;  %790 = vmatprep.subr.mxu1 %v835_v17 }
  0x9c   :  { %v127_v12 = vrot.slane %v87_v61, %v110_v59  ;;  %787 = vmatprep.mubr.msk.f32.mxu0 %vm836_vm13, %v835_v17  ;;  %822 = vmatprep.mubr.msk.f32.mxu1 %vm836_vm13, %v835_v17 }
  0x9d   :  { %v483_v40 = vsel %vm142_vm3, %v461_v22, %v482_v35  ;;  %v172_v22 = vsub.s32 0, %v1005_v56  ;;  %v54_v35 = vld [vmem:[%s1260_s5 + $0x60] sm:$0xff] }
  0x9e   :  { %v428_v3 = vpop.xlane.xlu1 %427  ;;  %v147_v26 = vsel %vm146_vm5, %v127_v12, %v145_v23 }
  0x9f   :  { %v90_v4 = vpop.xlane.xlu0 %89  ;;  %v465_v27 = vrot.slane %v428_v3, %v110_v59 }
  0xa0   :  { %v131_v15 = vrot.slane %v90_v4, %v110_v59 }
  0xa1   :  { %v484_v45 = vsel %vm144_vm4, %v465_v27, %v483_v40  ;;  %v193_v40 = vsub.s32 3, %v1005_v56 }
  0xa2   :  { %v431_v13 = vpop.xlane.xlu1 %430  ;;  %v149_v32 = vsel %vm148_vm6, %v131_v15, %v147_v26  ;;  %v56_v26 = vld [vmem:[%s1260_s5 + $0x70] sm:$0xff] }
  0xa3   :  { %v93_v14 = vpop.xlane.xlu0 %92  ;;  %v469_v33 = vrot.slane %v431_v13, %v110_v59 }
  0xa4   :  { %v135_v20 = vrot.slane %v93_v14, %v110_v59 }
  0xa5   :  { %v485_v49 = vsel %vm146_vm5, %v469_v33, %v484_v45  ;;  %v55_v33 = vld [vmem:[%s1260_s5 + $0x68] sm:$0xff]  ;;  %v200_v45 = vsub.s32 4, %v1005_v56 }
  0xa6   :  { %v434_v28 = vpop.xlane.xlu1 %433  ;;  %v151_v39 = vsel %vm150_vm7, %v135_v20, %v149_v32  ;;  %v57_v20 = vld [vmem:[%s1260_s5 + $0x78] sm:$0xff]  ;;  %v186_v32 = vsub.s32 2, %v1005_v56 }
  0xa7   :  { %v96_v29 = vpop.xlane.xlu0 %95  ;;  %v473_v38 = vrot.slane %v434_v28, %v110_v59  ;;  %756 = vmatpush3.msra.mxu0 %v57_v20  ;;  %v394_v20 = vld [vmem:[%s1261_s7 + $0x40] sm:$0xff] }
  0xa8   :  { %v139_v34 = vrot.slane %v96_v29, %v110_v59  ;;  %757 = vmatprep.subr.mxu0 %v835_v17 }
  0xa9   :  { %v486_v53 = vsel %vm148_vm6, %v473_v38, %v485_v49  ;;  %758 = vmatpush3.msra.mxu0 %v56_v26  ;;  %v51_v49 = vld [vmem:[%s1260_s5 + $0x48] sm:$0xff] }
  0xaa   :  { %v153_v41 = vsel %vm152_vm8, %v139_v34, %v151_v39  ;;  %v440_v47 = vpop.xlane.xlu1 %439  ;;  %759 = vmatprep.subr.mxu0 %v835_v17  ;;  %v43_v26 = vld [vmem:[%s1260_s5 + $0x8] sm:$0xff] }
  0xab   :  { %v437_v46 = vpop.xlane.xlu0 %436  ;;  %v155_v48 = vsel %vm97_vm9, %v153_v41, -1e+30  ;;  %v481_v51 = vrot.slane %v440_v47, %v110_v59  ;;  %760 = vmatpush3.msra.mxu0 %v55_v33  ;;  %v53_v41 = vld [vmem:[%s1260_s5 + $0x58] sm:$0xff] }
  0xac   :  { %v477_v50 = vrot.slane %v437_v46, %v110_v59  ;;  %v157_v52 = vsel %vm156_vm10, %v155_v48, -inf  ;;  %761 = vmatprep.subr.mxu0 %v835_v17  ;;  %v52_v46 = vld [vmem:[%s1260_s5 + $0x50] sm:$0xff]  ;;  %v401_v47 = vld [vmem:[%s1261_s7 + $0x78] sm:$0xff] }
  0xad   :  { %158 = vmax.xlane.f32.xlu0 %v157_v52  ;;  %762 = vmatpush3.msra.mxu0 %v54_v35  ;;  %v400_v52 = vld [vmem:[%s1261_s7 + $0x70] sm:$0xff]  ;;  %v389_v33 = vld [vmem:[%s1261_s7 + $0x18] sm:$0xff]  ;;  %v387_v35 = vld [vmem:[%s1261_s7 + $0x8] sm:$0xff] }
  0xae   :  { %v487_v54 = vsel %vm150_vm7, %v477_v50, %v486_v53  ;;  %763 = vmatprep.subr.mxu0 %v835_v17  ;;  %791 = vmatpush3.msra.mxu1 %v401_v47  ;;  %v50_v53 = vld [vmem:[%s1260_s5 + $0x40] sm:$0xff] }
  0xaf   :  { %v488_v55 = vsel %vm152_vm8, %v481_v51, %v487_v54  ;;  %764 = vmatpush3.msra.mxu0 %v53_v41  ;;  %v207_v51 = vsub.s32 5, %v1005_v56  ;;  %792 = vmatprep.subr.mxu1 %v835_v17 }
  0xb0   :  { %v490_v57 = vsel %vm441_vm11, %v488_v55, -1e+30  ;;  %765 = vmatprep.subr.mxu0 %v835_v17  ;;  %793 = vmatpush3.msra.mxu1 %v400_v52  ;;  %v399_v55 = vld [vmem:[%s1261_s7 + $0x68] sm:$0xff] }
  0xb1   :  { %v492_v58 = vsel %vm491_vm12, %v490_v57, -inf  ;;  %766 = vmatpush3.msra.mxu0 %v52_v46  ;;  %794 = vmatprep.subr.mxu1 %v835_v17 }
  0xb2   :  { %493 = vmax.xlane.f32.xlu1 %v492_v58  ;;  %767 = vmatprep.subr.mxu0 %v835_v17  ;;  %v214_v58 = vsub.s32 6, %v1005_v56 }
  0xb3   :  { %768 = vmatpush3.msra.mxu0 %v51_v49  ;;  %795 = vmatpush3.msra.mxu1 %v399_v55 }
  0xb4   :  { %769 = vmatprep.subr.mxu0 %v835_v17  ;;  %796 = vmatprep.subr.mxu1 %v835_v17 }
  0xb5   :  { %770 = vmatpush3.msra.mxu0 %v50_v53 }
  0xb6   :  { %771 = vmatprep.subr.mxu0 %v835_v17 }
 0x136   :  { %v159_v60 = vpop.xlane.xlu0 %158 }
 0x137   :  { %v160_v61 = vsub.f32 %v155_v48, %v159_v60  ;;  %v49_v60 = vld [vmem:[%s1260_s5 + $0x38] sm:$0xff] }
 0x138   :  { %772 = vmatpush3.msra.mxu0 %v49_v60 }
 0x139   :  { %v161_v62 = vmul.f32 1.442695, %v160_v61  ;;  %v398_v61 = vld [vmem:[%s1261_s7 + $0x60] sm:$0xff]  ;;  %773 = vmatprep.subr.mxu0 %v835_v17 }
 0x13a   :  { %797 = vmatpush3.msra.mxu1 %v398_v61 }
 0x13b   :  { %827 = vpow2.f32 %v161_v62  ;;  %v494_v59 = vpop.xlane.xlu1 %493  ;;  %v48_v62 = vld [vmem:[%s1260_s5 + $0x30] sm:$0xff]  ;;  %798 = vmatprep.subr.mxu1 %v835_v17 }
 0x13c   :  { %v495_v63 = vsub.f32 %v490_v57, %v494_v59  ;;  %774 = vmatpush3.msra.mxu0 %v48_v62 }
 0x13d   :  { %775 = vmatprep.subr.mxu0 %v835_v17 }
 0x13e   :  { %v496_v1 = vmul.f32 1.442695, %v495_v63 }
 0x140   :  { %829 = vpow2.f32 %v496_v1  ;;  %v221_v1 = vsub.s32 7, %v1005_v56 }
 0x148   :  { %v828_v3 = vpop.eup %827 }
 0x149   :  { %v163_v4 = vmul.f32 %v828_v3, %v40_v21  ;;  %v179_v21 = vsub.s32 1, %v1005_v56  ;;  %v397_v3 = vld [vmem:[%s1261_s7 + $0x58] sm:$0xff]  ;;  %v392_v56 = vld [vmem:[%s1261_s7 + $0x30] sm:$0xff] }
 0x14a   :  { %799 = vmatpush3.msra.mxu1 %v397_v3 }
 0x14b   :  { %v164_v7 = vsel %vm156_vm10, %v163_v4, 0.0  ;;  %800 = vmatprep.subr.mxu1 %v835_v17 }
 0x14c   :  { %165 = vadd.xlane.f32.xlu0 %v164_v7 }
 0x14d   :  { %v830_v8 = vpop.eup %829 }
 0x14e   :  { %v498_v10 = vmul.f32 %v830_v8, %v384_v44  ;;  %v396_v8 = vld [vmem:[%s1261_s7 + $0x50] sm:$0xff] }
 0x14f   :  { %801 = vmatpush3.msra.mxu1 %v396_v8 }
 0x150   :  { %v499_v12 = vsel %vm491_vm12, %v498_v10, 0.0  ;;  %802 = vmatprep.subr.mxu1 %v835_v17 }
 0x151   :  { %500 = vadd.xlane.f32.xlu1 %v499_v12  ;;  %v46_v12 = vld [vmem:[%s1260_s5 + $0x20] sm:$0xff] }
 0x1d5   :  { %v166_v13 = vpop.xlane.xlu0 %165 }
 0x1d6   :  { %v167_v14 = vadd.f32 1e-20, %v166_v13  ;;  %v395_v13 = vld [vmem:[%s1261_s7 + $0x48] sm:$0xff] }
 0x1d7   :  { %803 = vmatpush3.msra.mxu1 %v395_v13 }
 0x1d8   :  { %831 = vrcp.f32 %v167_v14  ;;  %v45_v14 = vld [vmem:[%s1260_s5 + $0x18] sm:$0xff]  ;;  %804 = vmatprep.subr.mxu1 %v835_v17 }
 0x1d9   :  { %805 = vmatpush3.msra.mxu1 %v394_v20 }
 0x1da   :  { %v501_v15 = vpop.xlane.xlu1 %500  ;;  %806 = vmatprep.subr.mxu1 %v835_v17 }
 0x1db   :  { %v502_v16 = vadd.f32 1e-20, %v501_v15 }
 0x1dd   :  { %833 = vrcp.f32 %v502_v16 }
 0x1e5   :  { %v832_v23 = vpop.eup %831 }
 0x1e6   :  { %v1043_v27 = vmul.f32 %v832_v23, %v163_v4  ;;  %v47_v4 = vld [vmem:[%s1260_s5 + $0x28] sm:$0xff]  ;;  %v393_v23 = vld [vmem:[%s1261_s7 + $0x38] sm:$0xff] }
 0x1e7   :  { %776 = vmatpush3.msra.mxu0 %v47_v4  ;;  %807 = vmatpush3.msra.mxu1 %v393_v23 }
 0x1e8   :  { %v180_v28 = vrot.slane %v1043_v27, %v179_v21  ;;  %v173_v29 = vrot.slane %v1043_v27, %v172_v22  ;;  %v187_v39 = vrot.slane %v1043_v27, %v186_v32  ;;  %v194_v48 = vrot.slane %v1043_v27, %v193_v40  ;;  %777 = vmatprep.subr.mxu0 %v835_v17 }
 0x1e9   :  { %v201_v50 = vrot.slane %v1043_v27, %v200_v45  ;;  %v208_v57 = vrot.slane %v1043_v27, %v207_v51  ;;  %v215_v63 = vrot.slane %v1043_v27, %v214_v58  ;;  %778 = vmatpush3.msra.mxu0 %v46_v12  ;;  %808 = vmatprep.subr.mxu1 %v835_v17 }
 0x1ea   :  { %v834_v34 = vpop.eup %833  ;;  %182 = vbcast.lane.b32.xlu1 %v180_v28, 256  ;;  %175 = vbcast.lane.b32.xlu0 %v173_v29, 256  ;;  %v391_v29 = vld [vmem:[%s1261_s7 + $0x28] sm:$0xff] }
 0x1eb   :  { %v1055_v38 = vmul.f32 %v834_v34, %v498_v10  ;;  %v222_v10 = vrot.slane %v1043_v27, %v221_v1  ;;  %779 = vmatprep.subr.mxu0 %v835_v17  ;;  %v42_v27 = vld [vmem:[%s1260_s5] sm:$0xff]  ;;  %809 = vmatpush3.msra.mxu1 %v392_v56  ;;  %v388_v34 = vld [vmem:[%s1261_s7 + $0x10] sm:$0xff] }
 0x1ec   :  { %780 = vmatpush3.msra.mxu0 %v45_v14  ;;  %810 = vmatprep.subr.mxu1 %v835_v17 }
 0x1ed   :  { %v508_v44 = vrot.slane %v1055_v38, %v172_v22  ;;  %v515_v54 = vrot.slane %v1055_v38, %v179_v21  ;;  %v522_v59 = vrot.slane %v1055_v38, %v186_v32  ;;  %v529_v7 = vrot.slane %v1055_v38, %v193_v40  ;;  %v44_v21 = vld [vmem:[%s1260_s5 + $0x10] sm:$0xff]  ;;  %781 = vmatprep.subr.mxu0 %v835_v17  ;;  %v390_v32 = vld [vmem:[%s1261_s7 + $0x20] sm:$0xff] }
 0x1ee   :  { %189 = vbcast.lane.b32.xlu1 %v187_v39, 256  ;;  %v536_v15 = vrot.slane %v1055_v38, %v200_v45  ;;  %v550_v16 = vrot.slane %v1055_v38, %v214_v58  ;;  %v543_v22 = vrot.slane %v1055_v38, %v207_v51  ;;  %782 = vmatpush3.msra.mxu0 %v44_v21 }
 0x1ef   :  { %510 = vbcast.lane.b32.xlu0 %v508_v44, 256  ;;  %783 = vmatprep.subr.mxu0 %v835_v17  ;;  %v557_v28 = vrot.slane %v1055_v38, %v221_v1  ;;  %v386_v38 = vld [vmem:[%s1261_s7] sm:$0xff] }
 0x1f0   :  { %784 = vmatpush3.msra.mxu0 %v43_v26  ;;  %811 = vmatpush3.msra.mxu1 %v391_v29 }
 0x1f1   :  { %785 = vmatprep.subr.mxu0 %v835_v17  ;;  %812 = vmatprep.subr.mxu1 %v835_v17 }
 0x1f2   :  { %196 = vbcast.lane.b32.xlu1 %v194_v48, 256  ;;  %786 = vmatpush3.msra.mxu0 %v42_v27 }
 0x1f3   :  { %203 = vbcast.lane.b32.xlu0 %v201_v50, 256  ;;  %813 = vmatpush3.msra.mxu1 %v390_v32 }
 0x1f4   :  { %814 = vmatprep.subr.mxu1 %v835_v17 }
 0x1f5   :  { %815 = vmatpush3.msra.mxu1 %v389_v33 }
 0x1f6   :  { %517 = vbcast.lane.b32.xlu1 %v515_v54, 256  ;;  %816 = vmatprep.subr.mxu1 %v835_v17 }
 0x1f7   :  { %210 = vbcast.lane.b32.xlu0 %v208_v57, 256  ;;  %817 = vmatpush3.msra.mxu1 %v388_v34 }
 0x1f8   :  { %818 = vmatprep.subr.mxu1 %v835_v17 }
 0x1f9   :  { %819 = vmatpush3.msra.mxu1 %v387_v35 }
 0x1fa   :  { %524 = vbcast.lane.b32.xlu1 %v522_v59, 256  ;;  %820 = vmatprep.subr.mxu1 %v835_v17 }
 0x1fb   :  { %217 = vbcast.lane.b32.xlu0 %v215_v63, 256  ;;  %821 = vmatpush3.msra.mxu1 %v386_v38 }
 0x1fe   :  { %531 = vbcast.lane.b32.xlu1 %v529_v7, 256 }
 0x1ff   :  { %224 = vbcast.lane.b32.xlu0 %v222_v10, 256 }
 0x202   :  { %538 = vbcast.lane.b32.xlu1 %v536_v15, 256 }
 0x203   :  { %552 = vbcast.lane.b32.xlu0 %v550_v16, 256 }
 0x206   :  { %545 = vbcast.lane.b32.xlu1 %v543_v22, 256 }
 0x20a   :  { %559 = vbcast.lane.b32.xlu1 %v557_v28, 256 }
 0x25c   :  { %v183_v39 = vpop.permute.xlu1 %182  ;;  %v176_v40 = vpop.permute.xlu0 %175 }
 0x25d   :  { %v227_v41 = vmul.f32 %v183_v39, %v910_v6  ;;  %v226_v44 = vmul.f32 %v176_v40, %v898_v2 }
 0x25f   :  { %v241_v45 = vsel %vm72_vm0, %v227_v41, 0.0  ;;  %v234_v46 = vsel %vm72_vm0, %v226_v44, 0.0 }
 0x260   :  { %v242_v47 = vrot.slane %v241_v45, 4  ;;  %v235_v48 = vrot.slane %v234_v46, 4  ;;  %v190_v49 = vpop.permute.xlu1 %189 }
 0x261   :  { %v228_v50 = vmul.f32 %v190_v49, %v890_v0  ;;  %v511_v51 = vpop.permute.xlu0 %510 }
 0x262   :  { %v243_v52 = vadd.f32 %v242_v47, %v241_v45  ;;  %v236_v53 = vadd.f32 %v235_v48, %v234_v46  ;;  %v561_v17 = vmul.f32 %v511_v51, %v925_v11 }
 0x263   :  { %v248_v54 = vsel %vm72_vm0, %v228_v50, 0.0 }
 0x264   :  { %v244_v55 = vrot.slane %v243_v52, 2  ;;  %v237_v6 = vrot.slane %v236_v53, 2  ;;  %v249_v57 = vrot.slane %v248_v54, 4  ;;  %v569_v2 = vsel %vm416_vm1, %v561_v17, 0.0  ;;  %v197_v58 = vpop.permute.xlu1 %196 }
 0x265   :  { %v570_v60 = vrot.slane %v569_v2, 4  ;;  %v229_v61 = vmul.f32 %v197_v58, %v905_v5  ;;  %v204_v62 = vpop.permute.xlu0 %203 }
 0x266   :  { %v245_v59 = vadd.f32 %v244_v55, %v243_v52  ;;  %v238_v63 = vadd.f32 %v237_v6, %v236_v53  ;;  %v250_v0 = vadd.f32 %v249_v57, %v248_v54  ;;  %v230_v1 = vmul.f32 %v204_v62, %v941_v19 }
 0x267   :  { %v255_v3 = vsel %vm72_vm0, %v229_v61, 0.0  ;;  %v571_v7 = vadd.f32 %v570_v60, %v569_v2 }
 0x268   :  { %v246_v11 = vrot.slane %v245_v59, 1  ;;  %v251_v4 = vrot.slane %v250_v0, 2  ;;  %v256_v8 = vrot.slane %v255_v3, 4  ;;  %v518_v10 = vpop.permute.xlu1 %517  ;;  %v239_v12 = vrot.slane %v238_v63, 1 }
 0x269   :  { %v262_v13 = vsel %vm72_vm0, %v230_v1, 0.0  ;;  %v562_v14 = vmul.f32 %v518_v10, %v917_v9  ;;  %v211_v15 = vpop.permute.xlu0 %210  ;;  %v572_v23 = vrot.slane %v571_v7, 2 }
 0x26a   :  { %v252_v5 = vadd.f32 %v251_v4, %v250_v0  ;;  %v257_v16 = vadd.f32 %v256_v8, %v255_v3  ;;  %v263_v20 = vrot.slane %v262_v13, 4  ;;  %v231_v19 = vmul.f32 %v211_v15, %v955_v25 }
 0x26b   :  { %v576_v21 = vsel %vm416_vm1, %v562_v14, 0.0  ;;  %v247_v22 = vadd.f32 %v246_v11, %v245_v59  ;;  %v240_v28 = vadd.f32 %v239_v12, %v238_v63  ;;  %v1217_v41 = vadd.f32 %v572_v23, %v571_v7 }
 0x26c   :  { %v258_v26 = vrot.slane %v257_v16, 2  ;;  %v577_v56 = vrot.slane %v576_v21, 4  ;;  %v525_v27 = vpop.permute.xlu1 %524  ;;  %v264_v29 = vadd.f32 %v263_v20, %v262_v13  ;;  %v269_v32 = vsel %vm72_vm0, %v231_v19, 0.0 }
 0x26d   :  { %v563_v33 = vmul.f32 %v525_v27, %v936_v18  ;;  %v218_v9 = vpop.permute.xlu0 %217  ;;  %v253_v34 = vrot.slane %v252_v5, 1  ;;  %v270_v38 = vrot.slane %v269_v32, 4  ;;  %v298_v47 = vsel %vm140_vm2, %v247_v22, %v240_v28 }
 0x26e   :  { %v578_v35 = vadd.f32 %v577_v56, %v576_v21  ;;  %v265_v39 = vrot.slane %v264_v29, 2  ;;  %v232_v25 = vmul.f32 %v218_v9, %v969_v31  ;;  %v259_v44 = vadd.f32 %v258_v26, %v257_v16 }
 0x26f   :  { %v583_v40 = vsel %vm416_vm1, %v563_v33, 0.0  ;;  %v271_v45 = vadd.f32 %v270_v38, %v269_v32  ;;  %v254_v51 = vadd.f32 %v253_v34, %v252_v5  ;;  %v574_v62 = vrot.slane %v1217_v41, 1 }
 0x270   :  { %v532_v46 = vpop.permute.xlu1 %531  ;;  %v584_v48 = vrot.slane %v583_v40, 4  ;;  %v276_v49 = vsel %vm72_vm0, %v232_v25, 0.0  ;;  %v579_v52 = vrot.slane %v578_v35, 2  ;;  %v266_v54 = vadd.f32 %v265_v39, %v264_v29 }
 0x271   :  { %v564_v18 = vmul.f32 %v532_v46, %v950_v24  ;;  %v225_v50 = vpop.permute.xlu0 %224  ;;  %v272_v53 = vrot.slane %v271_v45, 2  ;;  %v277_v17 = vrot.slane %v276_v49, 4  ;;  %v260_v57 = vrot.slane %v259_v44, 1 }
 0x272   :  { %v585_v55 = vadd.f32 %v584_v48, %v583_v40  ;;  %v233_v6 = vmul.f32 %v225_v50, %v983_v37  ;;  %v299_v1 = vsel %vm142_vm3, %v254_v51, %v298_v47  ;;  %v580_v3 = vadd.f32 %v579_v52, %v578_v35 }
 0x273   :  { %v590_v31 = vsel %vm416_vm1, %v564_v18, 0.0  ;;  %v273_v2 = vadd.f32 %v272_v53, %v271_v45  ;;  %v278_v58 = vadd.f32 %v277_v17, %v276_v49  ;;  %v267_v7 = vrot.slane %v266_v54, 1 }
 0x274   :  { %v591_v60 = vrot.slane %v590_v31, 4  ;;  %v539_v61 = vpop.permute.xlu1 %538  ;;  %v586_v59 = vrot.slane %v585_v55, 2  ;;  %v283_v24 = vsel %vm72_vm0, %v233_v6, 0.0  ;;  %v261_v12 = vadd.f32 %v260_v57, %v259_v44 }
 0x275   :  { %v565_v63 = vmul.f32 %v539_v61, %v964_v30  ;;  %v553_v0 = vpop.permute.xlu0 %552  ;;  %v279_v11 = vrot.slane %v278_v58, 2  ;;  %v284_v37 = vrot.slane %v283_v24, 4  ;;  %v274_v13 = vrot.slane %v273_v2, 1 }
 0x276   :  { %v592_v4 = vadd.f32 %v591_v60, %v590_v31  ;;  %v567_v10 = vmul.f32 %v553_v0, %v992_v42  ;;  %v587_v16 = vadd.f32 %v586_v59, %v585_v55  ;;  %v268_v56 = vadd.f32 %v267_v7, %v266_v54 }
 0x277   :  { %v597_v8 = vsel %vm416_vm1, %v565_v63, 0.0  ;;  %v280_v14 = vadd.f32 %v279_v11, %v278_v58  ;;  %v285_v20 = vadd.f32 %v284_v37, %v283_v24  ;;  %v581_v27 = vrot.slane %v580_v3, 1 }
 0x278   :  { %v593_v15 = vrot.slane %v592_v4, 2  ;;  %v546_v5 = vpop.permute.xlu1 %545  ;;  %v598_v30 = vrot.slane %v597_v8, 4  ;;  %v611_v21 = vsel %vm416_vm1, %v567_v10, 0.0  ;;  %v275_v42 = vadd.f32 %v274_v13, %v273_v2 }
 0x279   :  { %v281_v19 = vrot.slane %v280_v14, 1  ;;  %v612_v23 = vrot.slane %v611_v21, 4  ;;  %v566_v26 = vmul.f32 %v546_v5, %v978_v36  ;;  %v286_v28 = vrot.slane %v285_v20, 2 }
 0x27a   :  { %v594_v22 = vadd.f32 %v593_v15, %v592_v4  ;;  %v599_v29 = vadd.f32 %v598_v30, %v597_v8  ;;  %v300_v34 = vsel %vm144_vm4, %v261_v12, %v299_v1  ;;  %v588_v35 = vrot.slane %v587_v16, 1  ;;  %v711_v15 = vld [vmem:[%s1262_s0] sm:$0xff] }
 0x27b   :  { %v613_v32 = vadd.f32 %v612_v23, %v611_v21  ;;  %v604_v33 = vsel %vm416_vm1, %v566_v26, 0.0  ;;  %v287_v38 = vadd.f32 %v286_v28, %v285_v20  ;;  %v282_v25 = vadd.f32 %v281_v19, %v280_v14 }
 0x27c   :  { %v560_v9 = vpop.permute.xlu1 %559  ;;  %v600_v39 = vrot.slane %v599_v29, 2  ;;  %v605_v40 = vrot.slane %v604_v33, 4  ;;  %v595_v44 = vrot.slane %v594_v22, 1  ;;  %v301_v49 = vsel %vm146_vm5, %v268_v56, %v300_v34 }
 0x27d   :  { %v614_v45 = vrot.slane %v613_v32, 2  ;;  %v568_v36 = vmul.f32 %v560_v9, %v997_v43  ;;  %v288_v46 = vrot.slane %v287_v38, 1  ;;  %v582_v18 = vadd.f32 %v581_v27, %v580_v3 }
 0x27e   :  { %v601_v47 = vadd.f32 %v600_v39, %v599_v29  ;;  %v606_v48 = vadd.f32 %v605_v40, %v604_v33  ;;  %v302_v51 = vsel %vm148_vm6, %v275_v42, %v301_v49  ;;  %v575_v55 = vadd.f32 %v574_v62, %v1217_v41 }
 0x27f   :  { %v618_v50 = vsel %vm416_vm1, %v568_v36, 0.0  ;;  %v289_v54 = vadd.f32 %v288_v46, %v287_v38  ;;  %v589_v31 = vadd.f32 %v588_v35, %v587_v16  ;;  %v615_v6 = vadd.f32 %v614_v45, %v613_v32 }
 0x280   :  { %v602_v52 = vrot.slane %v601_v47, 1  ;;  %v607_v53 = vrot.slane %v606_v48, 2  ;;  %v619_v17 = vrot.slane %v618_v50, 4  ;;  %v303_v43 = vsel %vm150_vm7, %v282_v25, %v302_v51 }
 0x281   :  { %v596_v57 = vadd.f32 %v595_v44, %v594_v22  ;;  %v304_v60 = vsel %vm152_vm8, %v289_v54, %v303_v43  ;;  %v633_v59 = vsel %vm140_vm2, %v582_v18, %v575_v55  ;;  %v616_v1 = vrot.slane %v615_v6, 1 }
 0x282   :  { %v608_v2 = vadd.f32 %v607_v53, %v606_v48  ;;  %v620_v58 = vadd.f32 %v619_v17, %v618_v50  ;;  %v603_v61 = vadd.f32 %v602_v52, %v601_v47  ;;  %788 = vmatmul.mubr.f32.vlgmr.msra.gmra.mxu0 %v304_v60  ;;  %v634_v0 = vsel %vm142_vm3, %v589_v31, %v633_v59 }
 0x283   :  { %v635_v62 = vsel %vm144_vm4, %v596_v57, %v634_v0  ;;  %v617_v37 = vadd.f32 %v616_v1, %v615_v6 }
 0x284   :  { %v609_v24 = vrot.slane %v608_v2, 1  ;;  %v621_v63 = vrot.slane %v620_v58, 2  ;;  %v636_v11 = vsel %vm146_vm5, %v603_v61, %v635_v62 }
 0x286   :  { %v610_v3 = vadd.f32 %v609_v24, %v608_v2  ;;  %v622_v41 = vadd.f32 %v621_v63, %v620_v58 }
 0x288   :  { %v623_v4 = vrot.slane %v622_v41, 1  ;;  %v637_v7 = vsel %vm148_vm6, %v610_v3, %v636_v11 }
 0x289   :  { %v638_v10 = vsel %vm150_vm7, %v617_v37, %v637_v7 }
 0x28a   :  { %v624_v8 = vadd.f32 %v623_v4, %v622_v41 }
 0x28c   :  { %v639_v12 = vsel %vm152_vm8, %v624_v8, %v638_v10 }
 0x28d   :  { %823 = vmatmul.mubr.f32.vlgmr.msra.gmra.mxu1 %v639_v12 }
 0x342   :  { %v372_v13 = vpop.f32.mrf.mxu0 }
 0x343   :  { %v712_v5 = vadd.f32 %v711_v15, %v372_v13 }
 0x344   :  { %v789_v14 = vpop.f32.mrf.mxu0 }
 0x34d   :  { %v707_v16 = vpop.f32.mrf.mxu1 }
 0x34e   :  { %v713_v20 = vadd.f32 %v712_v5, %v707_v16 }
 0x34f   :  { %v824_v30 = vpop.f32.mrf.mxu1 }
 0x350   :  { %714 = vst [vmem:[%s1263_s9] sm:$0xff] %v713_v20 }

// kernel: forward.9
= control target key start
LH: loop header
LB: loop body
LE: loop exit
PB: predicated region body
PF: predicated region fallthrough
CT: control target
= control target key end

     0   :  { %vm60_vm0 = vcmask 1042432   ;;  %v94_v25 = vlaneseq  ;;  %vm128_vm1 = vcmask 1041409   ;;  %vm130_vm2 = vcmask 1042434   ;;  %s636_s1 = inlined_call_operand.vmem [shape: f32[8,3,128], index: 1, kind: input, shape index: {}]   ;;  %s637_s4 = inlined_call_operand.vmem [shape: f32[1,128], index: 4, kind: input, shape index: {}]   ;;  %s638_s2 = inlined_call_operand.vmem [shape: f32[8,3], index: 2, kind: input, shape index: {}]   ;;  %s639_s3 = inlined_call_operand.vmem [shape: f32[128,128], index: 3, kind: input, shape index: {}]   ;;  %s640_s0 = inlined_call_operand.vmem [shape: f32[8,128], index: 0, kind: input, shape index: {}]   ;;  %s641_s5 = inlined_call_operand.vmem [shape: f32[8,128], index: 5, kind: output, shape index: {}]  }
   0x1   :  { %v465_v0 = vld [vmem:[%s636_s1] sm:$0x7]  ;;  %v473_v2 = vld [vmem:[%s636_s1 + $0x8] sm:$0x7]  ;;  %v480_v5 = vld [vmem:[%s636_s1 + $0x4] sm:$0x7] }
   0x2   :  { %v371_v1 = vld [vmem:[%s637_s4] ss:$0 sm:$0xff]  ;;  %v485_v6 = vld [vmem:[%s636_s1 + $0xc] sm:$0x7]  ;;  %v492_v9 = vld [vmem:[%s636_s1 + $0x10] sm:$0x7] }
   0x3   :  { %v52_v3 = vmul.f32 %v371_v1, %v465_v0  ;;  %v54_v4 = vmul.f32 %v371_v1, %v473_v2  ;;  %v53_v7 = vmul.f32 %v371_v1, %v480_v5  ;;  %v55_v8 = vmul.f32 %v371_v1, %v485_v6  ;;  %v497_v10 = vld [vmem:[%s636_s1 + $0x14] sm:$0x7]  ;;  %v508_v17 = vld [vmem:[%s636_s1 + $0x18] sm:$0x7]  ;;  %v513_v18 = vld [vmem:[%s636_s1 + $0x1c] sm:$0x7] }
   0x4   :  { %v56_v15 = vmul.f32 %v371_v1, %v492_v9  ;;  %v57_v16 = vmul.f32 %v371_v1, %v497_v10  ;;  %v58_v21 = vmul.f32 %v371_v1, %v508_v17  ;;  %v59_v22 = vmul.f32 %v371_v1, %v513_v18  ;;  %v28_v45 = vld [vmem:[%s638_s2] sm:$0xff]  ;;  %v45_v1 = vld [vmem:[%s639_s3 + $0x78] sm:$0xff] }
   0x5   :  { %v61_v11 = vsel %vm60_vm0, %v52_v3, 0.0  ;;  %v67_v12 = vsel %vm60_vm0, %v54_v4, 0.0  ;;  %v64_v13 = vsel %vm60_vm0, %v53_v7, 0.0  ;;  %v70_v14 = vsel %vm60_vm0, %v55_v8, 0.0  ;;  %v44_v3 = vld [vmem:[%s639_s3 + $0x70] sm:$0xff]  ;;  %v43_v4 = vld [vmem:[%s639_s3 + $0x68] sm:$0xff] }
   0x6   :  { %62 = vadd.xlane.f32.xlu0 %v61_v11  ;;  %68 = vadd.xlane.f32.xlu1 %v67_v12  ;;  %v73_v19 = vsel %vm60_vm0, %v56_v15, 0.0  ;;  %v76_v20 = vsel %vm60_vm0, %v57_v16, 0.0  ;;  %v79_v23 = vsel %vm60_vm0, %v58_v21, 0.0  ;;  %v82_v24 = vsel %vm60_vm0, %v59_v22, 0.0  ;;  %v42_v11 = vld [vmem:[%s639_s3 + $0x60] sm:$0xff]  ;;  %v40_v21 = vld [vmem:[%s639_s3 + $0x50] sm:$0xff] }
   0x7   :  { %v95_v26 = vand.u32 127, %v94_v25  ;;  %v521_v27 = vshrl.u32 %v94_v25, 7  ;;  %vm132_vm3 = vcmask 1043459   ;;  %vm134_vm4 = vcmask 1044484   ;;  %v39_v22 = vld [vmem:[%s639_s3 + $0x48] sm:$0xff] }
   0x8   :  { %vm136_vm5 = vcmask 1045509   ;;  %vm138_vm6 = vcmask 1046534   ;;  %vm140_vm7 = vcmask 1047559   ;;  %vm85_vm8 = vcmp.gt.f32.partialorder %v28_v45, 0.0 }
   0x9   :  { %v98_v30 = vsub.s32 %v95_v26, %v521_v27  ;;  %vm144_vm9 = vcmask 23552   ;;  %v430_v63 = vmov 0.0   ;;  %v167_v7 = vsub.s32 1, %v521_v27 }
   0xa   :  { %65 = vadd.xlane.f32.xlu0 %v64_v13  ;;  %71 = vadd.xlane.f32.xlu1 %v70_v14  ;;  %v160_v8 = vsub.s32 0, %v521_v27  ;;  %v41_v14 = vld [vmem:[%s639_s3 + $0x58] sm:$0xff]  ;;  %v181_v25 = vsub.s32 3, %v521_v27  ;;  %v202_v26 = vsub.s32 6, %v521_v27  ;;  %vm431_vm10 = vmmov 0  }
   0xb   :  { %389 = vmatprep.subr.mxu0 %v430_v63  ;;  %421 = vmatprep.mubr.msk.f32.mxu0 %vm431_vm10, %v430_v63 }
   0xc   :  { %390 = vmatpush3.msra.mxu0 %v45_v1 }
   0xd   :  { %391 = vmatprep.subr.mxu0 %v430_v63 }
   0xe   :  { %74 = vadd.xlane.f32.xlu0 %v73_v19  ;;  %77 = vadd.xlane.f32.xlu1 %v76_v20  ;;  %v174_v19 = vsub.s32 2, %v521_v27  ;;  %v188_v20 = vsub.s32 4, %v521_v27 }
   0xf   :  { %392 = vmatpush3.msra.mxu0 %v44_v3 }
  0x10   :  { %393 = vmatprep.subr.mxu0 %v430_v63 }
  0x11   :  { %394 = vmatpush3.msra.mxu0 %v43_v4 }
  0x12   :  { %80 = vadd.xlane.f32.xlu0 %v79_v23  ;;  %83 = vadd.xlane.f32.xlu1 %v82_v24 }
  0x13   :  { %395 = vmatprep.subr.mxu0 %v430_v63 }
  0x14   :  { %396 = vmatpush3.msra.mxu0 %v42_v11 }
  0x15   :  { %397 = vmatprep.subr.mxu0 %v430_v63 }
  0x16   :  { %398 = vmatpush3.msra.mxu0 %v41_v14 }
  0x17   :  { %399 = vmatprep.subr.mxu0 %v430_v63 }
  0x18   :  { %400 = vmatpush3.msra.mxu0 %v40_v21 }
  0x19   :  { %401 = vmatprep.subr.mxu0 %v430_v63 }
  0x1a   :  { %402 = vmatpush3.msra.mxu0 %v39_v22 }
  0x1b   :  { %403 = vmatprep.subr.mxu0 %v430_v63 }
  0x8f   :  { %v63_v28 = vpop.xlane.xlu0 %62  ;;  %v69_v29 = vpop.xlane.xlu1 %68 }
  0x90   :  { %v99_v33 = vrot.slane %v63_v28, %v98_v30  ;;  %v107_v36 = vrot.slane %v69_v29, %v98_v30  ;;  %v38_v28 = vld [vmem:[%s639_s3 + $0x40] sm:$0xff]  ;;  %v37_v29 = vld [vmem:[%s639_s3 + $0x38] sm:$0xff] }
  0x91   :  { %404 = vmatpush3.msra.mxu0 %v38_v28 }
  0x92   :  { %405 = vmatprep.subr.mxu0 %v430_v63 }
  0x93   :  { %v66_v31 = vpop.xlane.xlu0 %65  ;;  %v72_v32 = vpop.xlane.xlu1 %71  ;;  %406 = vmatpush3.msra.mxu0 %v37_v29 }
  0x94   :  { %v103_v34 = vrot.slane %v66_v31, %v98_v30  ;;  %v111_v35 = vrot.slane %v72_v32, %v98_v30  ;;  %v195_v32 = vsub.s32 5, %v521_v27  ;;  %407 = vmatprep.subr.mxu0 %v430_v63 }
  0x96   :  { %v129_v37 = vsel %vm128_vm1, %v103_v34, %v99_v33  ;;  %v36_v33 = vld [vmem:[%s639_s3 + $0x30] sm:$0xff]  ;;  %v35_v34 = vld [vmem:[%s639_s3 + $0x28] sm:$0xff] }
  0x97   :  { %v131_v38 = vsel %vm130_vm2, %v107_v36, %v129_v37  ;;  %v75_v39 = vpop.xlane.xlu0 %74  ;;  %v78_v40 = vpop.xlane.xlu1 %77  ;;  %v209_v36 = vsub.s32 7, %v521_v27  ;;  %408 = vmatpush3.msra.mxu0 %v36_v33  ;;  %v34_v37 = vld [vmem:[%s639_s3 + $0x20] sm:$0xff]  ;;  %v32_v27 = vld [vmem:[%s639_s3 + $0x10] sm:$0xff] }
  0x98   :  { %v133_v41 = vsel %vm132_vm3, %v111_v35, %v131_v38  ;;  %v115_v42 = vrot.slane %v75_v39, %v98_v30  ;;  %v119_v43 = vrot.slane %v78_v40, %v98_v30  ;;  %409 = vmatprep.subr.mxu0 %v430_v63  ;;  %v33_v38 = vld [vmem:[%s639_s3 + $0x18] sm:$0xff]  ;;  %v31_v40 = vld [vmem:[%s639_s3 + $0x8] sm:$0xff] }
  0x99   :  { %410 = vmatpush3.msra.mxu0 %v35_v34 }
  0x9a   :  { %v135_v44 = vsel %vm134_vm4, %v115_v42, %v133_v41  ;;  %411 = vmatprep.subr.mxu0 %v430_v63  ;;  %v30_v41 = vld [vmem:[%s639_s3] sm:$0xff] }
  0x9b   :  { %v81_v46 = vpop.xlane.xlu0 %80  ;;  %v84_v47 = vpop.xlane.xlu1 %83  ;;  %v137_v50 = vsel %vm136_vm5, %v119_v43, %v135_v44  ;;  %412 = vmatpush3.msra.mxu0 %v34_v37 }
  0x9c   :  { %v123_v48 = vrot.slane %v81_v46, %v98_v30  ;;  %v127_v49 = vrot.slane %v84_v47, %v98_v30  ;;  %413 = vmatprep.subr.mxu0 %v430_v63 }
  0x9d   :  { %414 = vmatpush3.msra.mxu0 %v33_v38 }
  0x9e   :  { %v139_v51 = vsel %vm138_vm6, %v123_v48, %v137_v50  ;;  %415 = vmatprep.subr.mxu0 %v430_v63 }
  0x9f   :  { %v141_v52 = vsel %vm140_vm7, %v127_v49, %v139_v51  ;;  %416 = vmatpush3.msra.mxu0 %v32_v27 }
  0xa0   :  { %v143_v53 = vsel %vm85_vm8, %v141_v52, -1e+30  ;;  %417 = vmatprep.subr.mxu0 %v430_v63 }
  0xa1   :  { %v145_v54 = vsel %vm144_vm9, %v143_v53, -inf  ;;  %418 = vmatpush3.msra.mxu0 %v31_v40 }
  0xa2   :  { %146 = vmax.xlane.f32.xlu0 %v145_v54  ;;  %419 = vmatprep.subr.mxu0 %v430_v63 }
  0xa3   :  { %420 = vmatpush3.msra.mxu0 %v30_v41 }
 0x12b   :  { %v147_v55 = vpop.xlane.xlu0 %146 }
 0x12c   :  { %v148_v56 = vsub.f32 %v143_v53, %v147_v55 }
 0x12e   :  { %v149_v57 = vmul.f32 1.442695, %v148_v56 }
 0x130   :  { %426 = vpow2.f32 %v149_v57 }
 0x13d   :  { %v427_v58 = vpop.eup %426 }
 0x13e   :  { %v151_v59 = vmul.f32 %v427_v58, %v28_v45 }
 0x140   :  { %v152_v60 = vsel %vm144_vm9, %v151_v59, 0.0 }
 0x141   :  { %153 = vadd.xlane.f32.xlu1 %v152_v60 }
 0x1ca   :  { %v154_v61 = vpop.xlane.xlu1 %153 }
 0x1cb   :  { %v155_v62 = vadd.f32 1e-20, %v154_v61 }
 0x1cd   :  { %428 = vrcp.f32 %v155_v62 }
 0x1da   :  { %v429_v12 = vpop.eup %428 }
 0x1db   :  { %v157_v13 = vmul.f32 %v429_v12, %v151_v59 }
 0x1dd   :  { %v168_v15 = vrot.slane %v157_v13, %v167_v7  ;;  %v161_v16 = vrot.slane %v157_v13, %v160_v8  ;;  %v175_v23 = vrot.slane %v157_v13, %v174_v19  ;;  %v189_v24 = vrot.slane %v157_v13, %v188_v20 }
 0x1de   :  { %v182_v30 = vrot.slane %v157_v13, %v181_v25  ;;  %v203_v31 = vrot.slane %v157_v13, %v202_v26  ;;  %v196_v35 = vrot.slane %v157_v13, %v195_v32  ;;  %v210_v39 = vrot.slane %v157_v13, %v209_v36 }
 0x1df   :  { %170 = vbcast.lane.b32.xlu1 %v168_v15, 256  ;;  %163 = vbcast.lane.b32.xlu0 %v161_v16, 256 }
 0x1e3   :  { %177 = vbcast.lane.b32.xlu1 %v175_v23, 256  ;;  %191 = vbcast.lane.b32.xlu0 %v189_v24, 256 }
 0x1e7   :  { %184 = vbcast.lane.b32.xlu1 %v182_v30, 256  ;;  %205 = vbcast.lane.b32.xlu0 %v203_v31, 256 }
 0x1eb   :  { %198 = vbcast.lane.b32.xlu1 %v196_v35, 256 }
 0x1ef   :  { %212 = vbcast.lane.b32.xlu1 %v210_v39, 256 }
 0x251   :  { %v171_v42 = vpop.permute.xlu1 %170  ;;  %v164_v43 = vpop.permute.xlu0 %163 }
 0x252   :  { %v215_v44 = vmul.f32 %v171_v42, %v480_v5  ;;  %v214_v45 = vmul.f32 %v164_v43, %v465_v0 }
 0x254   :  { %v229_v46 = vsel %vm60_vm0, %v215_v44, 0.0  ;;  %v222_v47 = vsel %vm60_vm0, %v214_v45, 0.0 }
 0x255   :  { %v230_v48 = vrot.slane %v229_v46, 4  ;;  %v223_v49 = vrot.slane %v222_v47, 4  ;;  %v178_v50 = vpop.permute.xlu1 %177  ;;  %v192_v51 = vpop.permute.xlu0 %191 }
 0x256   :  { %v216_v52 = vmul.f32 %v178_v50, %v473_v2  ;;  %v218_v53 = vmul.f32 %v192_v51, %v492_v9 }
 0x257   :  { %v231_v54 = vadd.f32 %v230_v48, %v229_v46  ;;  %v224_v55 = vadd.f32 %v223_v49, %v222_v47 }
 0x258   :  { %v236_v56 = vsel %vm60_vm0, %v216_v52, 0.0  ;;  %v250_v5 = vsel %vm60_vm0, %v218_v53, 0.0 }
 0x259   :  { %v232_v57 = vrot.slane %v231_v54, 2  ;;  %v225_v0 = vrot.slane %v224_v55, 2  ;;  %v237_v58 = vrot.slane %v236_v56, 4  ;;  %v251_v59 = vrot.slane %v250_v5, 4  ;;  %v185_v60 = vpop.permute.xlu1 %184  ;;  %v206_v61 = vpop.permute.xlu0 %205 }
 0x25a   :  { %v217_v62 = vmul.f32 %v185_v60, %v485_v6  ;;  %v220_v63 = vmul.f32 %v206_v61, %v508_v17 }
 0x25b   :  { %v233_v1 = vadd.f32 %v232_v57, %v231_v54  ;;  %v238_v2 = vadd.f32 %v237_v58, %v236_v56  ;;  %v252_v3 = vadd.f32 %v251_v59, %v250_v5  ;;  %v226_v9 = vadd.f32 %v225_v0, %v224_v55  ;;  %v364_v5 = vld [vmem:[%s640_s0] sm:$0xff] }
 0x25c   :  { %v243_v4 = vsel %vm60_vm0, %v217_v62, 0.0  ;;  %v264_v7 = vsel %vm60_vm0, %v220_v63, 0.0 }
 0x25d   :  { %v239_v8 = vrot.slane %v238_v2, 2  ;;  %v199_v11 = vpop.permute.xlu1 %198  ;;  %v253_v12 = vrot.slane %v252_v3, 2  ;;  %v244_v13 = vrot.slane %v243_v4, 4  ;;  %v265_v14 = vrot.slane %v264_v7, 4 }
 0x25e   :  { %v219_v15 = vmul.f32 %v199_v11, %v497_v10  ;;  %v234_v16 = vrot.slane %v233_v1, 1  ;;  %v227_v6 = vrot.slane %v226_v9, 1 }
 0x25f   :  { %v240_v19 = vadd.f32 %v239_v8, %v238_v2  ;;  %v245_v20 = vadd.f32 %v244_v13, %v243_v4  ;;  %v266_v17 = vadd.f32 %v265_v14, %v264_v7  ;;  %v254_v25 = vadd.f32 %v253_v12, %v252_v3 }
 0x260   :  { %v257_v21 = vsel %vm60_vm0, %v219_v15, 0.0  ;;  %v235_v31 = vadd.f32 %v234_v16, %v233_v1  ;;  %v228_v32 = vadd.f32 %v227_v6, %v226_v9 }
 0x261   :  { %v241_v22 = vrot.slane %v240_v19, 1  ;;  %v258_v23 = vrot.slane %v257_v21, 4  ;;  %v213_v24 = vpop.permute.xlu1 %212  ;;  %v246_v26 = vrot.slane %v245_v20, 2  ;;  %v267_v28 = vrot.slane %v266_v17, 2 }
 0x262   :  { %v221_v29 = vmul.f32 %v213_v24, %v513_v18  ;;  %v255_v37 = vrot.slane %v254_v25, 1  ;;  %v286_v41 = vsel %vm128_vm1, %v235_v31, %v228_v32 }
 0x263   :  { %v259_v30 = vadd.f32 %v258_v23, %v257_v21  ;;  %v247_v33 = vadd.f32 %v246_v26, %v245_v20  ;;  %v242_v34 = vadd.f32 %v241_v22, %v240_v19  ;;  %v268_v39 = vadd.f32 %v267_v28, %v266_v17 }
 0x264   :  { %v271_v10 = vsel %vm60_vm0, %v221_v29, 0.0  ;;  %v256_v45 = vadd.f32 %v255_v37, %v254_v25 }
 0x265   :  { %v260_v35 = vrot.slane %v259_v30, 2  ;;  %v272_v36 = vrot.slane %v271_v10, 4  ;;  %v248_v38 = vrot.slane %v247_v33, 1  ;;  %v287_v43 = vsel %vm130_vm2, %v242_v34, %v286_v41 }
 0x266   :  { %v269_v46 = vrot.slane %v268_v39, 1 }
 0x267   :  { %v261_v27 = vadd.f32 %v260_v35, %v259_v30  ;;  %v273_v40 = vadd.f32 %v272_v36, %v271_v10  ;;  %v249_v42 = vadd.f32 %v248_v38, %v247_v33 }
 0x268   :  { %v270_v53 = vadd.f32 %v269_v46, %v268_v39 }
 0x269   :  { %v262_v18 = vrot.slane %v261_v27, 1  ;;  %v274_v44 = vrot.slane %v273_v40, 2  ;;  %v288_v47 = vsel %vm132_vm3, %v249_v42, %v287_v43 }
 0x26a   :  { %v289_v50 = vsel %vm134_vm4, %v256_v45, %v288_v47 }
 0x26b   :  { %v263_v48 = vadd.f32 %v262_v18, %v261_v27  ;;  %v275_v49 = vadd.f32 %v274_v44, %v273_v40 }
 0x26d   :  { %v276_v51 = vrot.slane %v275_v49, 1  ;;  %v290_v52 = vsel %vm136_vm5, %v263_v48, %v289_v50 }
 0x26e   :  { %v291_v55 = vsel %vm138_vm6, %v270_v53, %v290_v52 }
 0x26f   :  { %v277_v54 = vadd.f32 %v276_v51, %v275_v49 }
 0x271   :  { %v292_v56 = vsel %vm140_vm7, %v277_v54, %v291_v55 }
 0x272   :  { %422 = vmatmul.mubr.f32.vlgmr.msra.gmra.mxu0 %v292_v56 }
 0x332   :  { %v360_v57 = vpop.f32.mrf.mxu0 }
 0x333   :  { %v365_v0 = vadd.f32 %v364_v5, %v360_v57 }
 0x334   :  { %v423_v58 = vpop.f32.mrf.mxu0 }
 0x335   :  { %366 = vst [vmem:[%s641_s5] sm:$0xff] %v365_v0 }

// kernel: forward.8
= control target key start
LH: loop header
LB: loop body
LE: loop exit
PB: predicated region body
PF: predicated region fallthrough
CT: control target
= control target key end

     0   :  { %vm72_vm0 = vcmask 1042432   ;;  %v106_v52 = vlaneseq  ;;  %vm140_vm1 = vcmask 1041409   ;;  %vm142_vm2 = vcmask 1042434   ;;  %s1252_s1 = inlined_call_operand.vmem [shape: f32[8,3,128], index: 1, kind: input, shape index: {}]   ;;  %s1253_s6 = inlined_call_operand.vmem [shape: f32[1,128], index: 6, kind: input, shape index: {}]   ;;  %s1254_s3 = inlined_call_operand.vmem [shape: f32[8,3,128], index: 3, kind: input, shape index: {}]   ;;  %s1255_s8 = inlined_call_operand.vmem [shape: f32[1,128], index: 8, kind: input, shape index: {}]   ;;  %s1256_s2 = inlined_call_operand.vmem [shape: f32[8,3], index: 2, kind: input, shape index: {}]   ;;  %s1257_s4 = inlined_call_operand.vmem [shape: f32[8,3], index: 4, kind: input, shape index: {}]   ;;  %s1258_s5 = inlined_call_operand.vmem [shape: f32[128,128], index: 5, kind: input, shape index: {}]   ;;  %s1259_s7 = inlined_call_operand.vmem [shape: f32[128,128], index: 7, kind: input, shape index: {}]   ;;  %s1260_s0 = inlined_call_operand.vmem [shape: f32[8,128], index: 0, kind: input, shape index: {}]   ;;  %s1261_s9 = inlined_call_operand.vmem [shape: f32[8,128], index: 9, kind: output, shape index: {}]  }
   0x1   :  { %v888_v0 = vld [vmem:[%s1252_s1 + $0x8] sm:$0x7]  ;;  %v717_v1 = vld [vmem:[%s1253_s6] ss:$0 sm:$0xff]  ;;  %v903_v5 = vld [vmem:[%s1252_s1 + $0xc] sm:$0x7] }
   0x2   :  { %v896_v2 = vld [vmem:[%s1252_s1] sm:$0x7]  ;;  %v66_v3 = vmul.f32 %v717_v1, %v888_v0  ;;  %v908_v6 = vld [vmem:[%s1252_s1 + $0x4] sm:$0x7]  ;;  %v67_v7 = vmul.f32 %v717_v1, %v903_v5  ;;  %v934_v18 = vld [vmem:[%s1254_s3 + $0x8] sm:$0x7] }
   0x3   :  { %v64_v4 = vmul.f32 %v717_v1, %v896_v2  ;;  %v65_v8 = vmul.f32 %v717_v1, %v908_v6  ;;  %v915_v9 = vld [vmem:[%s1254_s3 + $0x4] sm:$0x7]  ;;  %v718_v10 = vld [vmem:[%s1255_s8] ss:$0 sm:$0xff]  ;;  %v939_v19 = vld [vmem:[%s1252_s1 + $0x10] sm:$0x7] }
   0x4   :  { %v923_v11 = vld [vmem:[%s1254_s3] sm:$0x7]  ;;  %v79_v12 = vsel %vm72_vm0, %v66_v3, 0.0  ;;  %v82_v14 = vsel %vm72_vm0, %v67_v7, 0.0  ;;  %v409_v16 = vmul.f32 %v718_v10, %v915_v9  ;;  %v410_v22 = vmul.f32 %v718_v10, %v934_v18  ;;  %v948_v24 = vld [vmem:[%s1254_s3 + $0xc] sm:$0x7] }
   0x5   :  { %v73_v13 = vsel %vm72_vm0, %v64_v4, 0.0  ;;  %80 = vadd.xlane.f32.xlu1 %v79_v12  ;;  %v76_v15 = vsel %vm72_vm0, %v65_v8, 0.0  ;;  %v408_v17 = vmul.f32 %v718_v10, %v923_v11  ;;  %v68_v23 = vmul.f32 %v717_v1, %v939_v19  ;;  %v953_v25 = vld [vmem:[%s1252_s1 + $0x14] sm:$0x7]  ;;  %v962_v30 = vld [vmem:[%s1254_s3 + $0x10] sm:$0x7] }
   0x6   :  { %74 = vadd.xlane.f32.xlu0 %v73_v13  ;;  %v419_v20 = vsel %vm72_vm0, %v409_v16, 0.0  ;;  %v422_v26 = vsel %vm72_vm0, %v410_v22, 0.0  ;;  %v411_v28 = vmul.f32 %v718_v10, %v948_v24  ;;  %v69_v29 = vmul.f32 %v717_v1, %v953_v25  ;;  %v967_v31 = vld [vmem:[%s1252_s1 + $0x18] sm:$0x7]  ;;  %v976_v36 = vld [vmem:[%s1254_s3 + $0x14] sm:$0x7] }
   0x7   :  { %v416_v21 = vsel %vm72_vm0, %v408_v17, 0.0  ;;  %v85_v27 = vsel %vm72_vm0, %v68_v23, 0.0  ;;  %v412_v34 = vmul.f32 %v718_v10, %v962_v30  ;;  %v70_v35 = vmul.f32 %v717_v1, %v967_v31  ;;  %v981_v37 = vld [vmem:[%s1252_s1 + $0x1c] sm:$0x7]  ;;  %v990_v42 = vld [vmem:[%s1254_s3 + $0x18] sm:$0x7] }
   0x8   :  { %v425_v32 = vsel %vm72_vm0, %v411_v28, 0.0  ;;  %v88_v33 = vsel %vm72_vm0, %v69_v29, 0.0  ;;  %v413_v40 = vmul.f32 %v718_v10, %v976_v36  ;;  %v71_v41 = vmul.f32 %v717_v1, %v981_v37  ;;  %v995_v43 = vld [vmem:[%s1254_s3 + $0x1c] sm:$0x7] }
   0x9   :  { %83 = vadd.xlane.f32.xlu1 %v82_v14  ;;  %v428_v38 = vsel %vm72_vm0, %v412_v34, 0.0  ;;  %v91_v39 = vsel %vm72_vm0, %v70_v35, 0.0  ;;  %v414_v46 = vmul.f32 %v718_v10, %v990_v42  ;;  %v415_v47 = vmul.f32 %v718_v10, %v995_v43 }
   0xa   :  { %77 = vadd.xlane.f32.xlu0 %v76_v15  ;;  %v431_v44 = vsel %vm72_vm0, %v413_v40, 0.0  ;;  %v94_v45 = vsel %vm72_vm0, %v71_v41, 0.0  ;;  %v107_v55 = vand.u32 127, %v106_v52  ;;  %v1003_v56 = vshrl.u32 %v106_v52, 7 }
   0xb   :  { %v434_v48 = vsel %vm72_vm0, %v414_v46, 0.0  ;;  %v437_v49 = vsel %vm72_vm0, %v415_v47, 0.0  ;;  %vm144_vm3 = vcmask 1043459   ;;  %vm146_vm4 = vcmask 1044484  }
   0xc   :  { %v110_v59 = vsub.s32 %v107_v55, %v1003_v56  ;;  %vm148_vm5 = vcmask 1045509   ;;  %vm150_vm6 = vcmask 1046534   ;;  %vm152_vm7 = vcmask 1047559  }
   0xd   :  { %420 = vadd.xlane.f32.xlu1 %v419_v20  ;;  %vm156_vm9 = vcmask 23552   ;;  %vm834_vm11 = vmmov 0  }
   0xe   :  { %417 = vadd.xlane.f32.xlu0 %v416_v21  ;;  %v40_v21 = vld [vmem:[%s1256_s2] sm:$0xff] }
   0xf   :  { %vm97_vm8 = vcmp.gt.f32.partialorder %v40_v21, 0.0 }
  0x11   :  { %423 = vadd.xlane.f32.xlu1 %v422_v26 }
  0x12   :  { %86 = vadd.xlane.f32.xlu0 %v85_v27 }
  0x15   :  { %426 = vadd.xlane.f32.xlu1 %v425_v32 }
  0x16   :  { %89 = vadd.xlane.f32.xlu0 %v88_v33 }
  0x19   :  { %429 = vadd.xlane.f32.xlu1 %v428_v38 }
  0x1a   :  { %92 = vadd.xlane.f32.xlu0 %v91_v39 }
  0x1d   :  { %432 = vadd.xlane.f32.xlu1 %v431_v44  ;;  %v384_v44 = vld [vmem:[%s1257_s4] sm:$0xff] }
  0x1e   :  { %95 = vadd.xlane.f32.xlu0 %v94_v45  ;;  %vm440_vm10 = vcmp.gt.f32.partialorder %v384_v44, 0.0 }
  0x21   :  { %438 = vadd.xlane.f32.xlu1 %v437_v49 }
  0x22   :  { %435 = vadd.xlane.f32.xlu0 %v434_v48 }
  0x8e   :  { %v81_v50 = vpop.xlane.xlu1 %80 }
  0x8f   :  { %v75_v51 = vpop.xlane.xlu0 %74  ;;  %v119_v1 = vrot.slane %v81_v50, %v110_v59 }
  0x90   :  { %v111_v63 = vrot.slane %v75_v51, %v110_v59 }
  0x92   :  { %v84_v53 = vpop.xlane.xlu1 %83 }
  0x93   :  { %v78_v54 = vpop.xlane.xlu0 %77  ;;  %v123_v8 = vrot.slane %v84_v53, %v110_v59 }
  0x94   :  { %v115_v62 = vrot.slane %v78_v54, %v110_v59 }
  0x96   :  { %v421_v57 = vpop.xlane.xlu1 %420  ;;  %v141_v7 = vsel %vm140_vm1, %v115_v62, %v111_v63 }
  0x97   :  { %v418_v58 = vpop.xlane.xlu0 %417  ;;  %v143_v10 = vsel %vm142_vm2, %v119_v1, %v141_v7  ;;  %v456_v16 = vrot.slane %v421_v57, %v110_v59 }
  0x98   :  { %v452_v17 = vrot.slane %v418_v58, %v110_v59  ;;  %v145_v23 = vsel %vm144_vm3, %v123_v8, %v143_v10 }
  0x9a   :  { %v424_v60 = vpop.xlane.xlu1 %423  ;;  %v481_v35 = vsel %vm140_vm1, %v456_v16, %v452_v17  ;;  %v833_v17 = vmov 0.0  }
  0x9b   :  { %v87_v61 = vpop.xlane.xlu0 %86  ;;  %v460_v22 = vrot.slane %v424_v60, %v110_v59  ;;  %753 = vmatprep.subr.mxu0 %v833_v17  ;;  %788 = vmatprep.subr.mxu1 %v833_v17 }
  0x9c   :  { %v127_v12 = vrot.slane %v87_v61, %v110_v59  ;;  %785 = vmatprep.mubr.msk.f32.mxu0 %vm834_vm11, %v833_v17  ;;  %820 = vmatprep.mubr.msk.f32.mxu1 %vm834_vm11, %v833_v17 }
  0x9d   :  { %v482_v40 = vsel %vm142_vm2, %v460_v22, %v481_v35  ;;  %v172_v22 = vsub.s32 0, %v1003_v56  ;;  %v54_v35 = vld [vmem:[%s1258_s5 + $0x60] sm:$0xff] }
  0x9e   :  { %v427_v3 = vpop.xlane.xlu1 %426  ;;  %v147_v26 = vsel %vm146_vm4, %v127_v12, %v145_v23 }
  0x9f   :  { %v90_v4 = vpop.xlane.xlu0 %89  ;;  %v464_v27 = vrot.slane %v427_v3, %v110_v59 }
  0xa0   :  { %v131_v15 = vrot.slane %v90_v4, %v110_v59 }
  0xa1   :  { %v483_v45 = vsel %vm144_vm3, %v464_v27, %v482_v40  ;;  %v193_v40 = vsub.s32 3, %v1003_v56 }
  0xa2   :  { %v430_v13 = vpop.xlane.xlu1 %429  ;;  %v149_v32 = vsel %vm148_vm5, %v131_v15, %v147_v26  ;;  %v56_v26 = vld [vmem:[%s1258_s5 + $0x70] sm:$0xff] }
  0xa3   :  { %v93_v14 = vpop.xlane.xlu0 %92  ;;  %v468_v33 = vrot.slane %v430_v13, %v110_v59 }
  0xa4   :  { %v135_v20 = vrot.slane %v93_v14, %v110_v59 }
  0xa5   :  { %v484_v49 = vsel %vm146_vm4, %v468_v33, %v483_v45  ;;  %v55_v33 = vld [vmem:[%s1258_s5 + $0x68] sm:$0xff]  ;;  %v200_v45 = vsub.s32 4, %v1003_v56 }
  0xa6   :  { %v433_v28 = vpop.xlane.xlu1 %432  ;;  %v151_v39 = vsel %vm150_vm6, %v135_v20, %v149_v32  ;;  %v57_v20 = vld [vmem:[%s1258_s5 + $0x78] sm:$0xff]  ;;  %v186_v32 = vsub.s32 2, %v1003_v56 }
  0xa7   :  { %v96_v29 = vpop.xlane.xlu0 %95  ;;  %v472_v38 = vrot.slane %v433_v28, %v110_v59  ;;  %754 = vmatpush3.msra.mxu0 %v57_v20  ;;  %v394_v20 = vld [vmem:[%s1259_s7 + $0x40] sm:$0xff] }
  0xa8   :  { %v139_v34 = vrot.slane %v96_v29, %v110_v59  ;;  %755 = vmatprep.subr.mxu0 %v833_v17 }
  0xa9   :  { %v485_v53 = vsel %vm148_vm5, %v472_v38, %v484_v49  ;;  %756 = vmatpush3.msra.mxu0 %v56_v26  ;;  %v51_v49 = vld [vmem:[%s1258_s5 + $0x48] sm:$0xff] }
  0xaa   :  { %v153_v41 = vsel %vm152_vm7, %v139_v34, %v151_v39  ;;  %v439_v47 = vpop.xlane.xlu1 %438  ;;  %757 = vmatprep.subr.mxu0 %v833_v17  ;;  %v43_v26 = vld [vmem:[%s1258_s5 + $0x8] sm:$0xff] }
  0xab   :  { %v436_v46 = vpop.xlane.xlu0 %435  ;;  %v155_v48 = vsel %vm97_vm8, %v153_v41, -1e+30  ;;  %v480_v51 = vrot.slane %v439_v47, %v110_v59  ;;  %758 = vmatpush3.msra.mxu0 %v55_v33  ;;  %v53_v41 = vld [vmem:[%s1258_s5 + $0x58] sm:$0xff] }
  0xac   :  { %v476_v50 = vrot.slane %v436_v46, %v110_v59  ;;  %v157_v52 = vsel %vm156_vm9, %v155_v48, -inf  ;;  %759 = vmatprep.subr.mxu0 %v833_v17  ;;  %v52_v46 = vld [vmem:[%s1258_s5 + $0x50] sm:$0xff]  ;;  %v401_v47 = vld [vmem:[%s1259_s7 + $0x78] sm:$0xff] }
  0xad   :  { %158 = vmax.xlane.f32.xlu0 %v157_v52  ;;  %760 = vmatpush3.msra.mxu0 %v54_v35  ;;  %v400_v52 = vld [vmem:[%s1259_s7 + $0x70] sm:$0xff]  ;;  %v389_v33 = vld [vmem:[%s1259_s7 + $0x18] sm:$0xff]  ;;  %v387_v35 = vld [vmem:[%s1259_s7 + $0x8] sm:$0xff] }
  0xae   :  { %v486_v54 = vsel %vm150_vm6, %v476_v50, %v485_v53  ;;  %761 = vmatprep.subr.mxu0 %v833_v17  ;;  %789 = vmatpush3.msra.mxu1 %v401_v47  ;;  %v50_v53 = vld [vmem:[%s1258_s5 + $0x40] sm:$0xff] }
  0xaf   :  { %v487_v55 = vsel %vm152_vm7, %v480_v51, %v486_v54  ;;  %762 = vmatpush3.msra.mxu0 %v53_v41  ;;  %v207_v51 = vsub.s32 5, %v1003_v56  ;;  %790 = vmatprep.subr.mxu1 %v833_v17 }
  0xb0   :  { %v489_v57 = vsel %vm440_vm10, %v487_v55, -1e+30  ;;  %763 = vmatprep.subr.mxu0 %v833_v17  ;;  %791 = vmatpush3.msra.mxu1 %v400_v52  ;;  %v399_v55 = vld [vmem:[%s1259_s7 + $0x68] sm:$0xff] }
  0xb1   :  { %v490_v58 = vsel %vm156_vm9, %v489_v57, -inf  ;;  %764 = vmatpush3.msra.mxu0 %v52_v46  ;;  %792 = vmatprep.subr.mxu1 %v833_v17 }
  0xb2   :  { %491 = vmax.xlane.f32.xlu1 %v490_v58  ;;  %765 = vmatprep.subr.mxu0 %v833_v17  ;;  %v214_v58 = vsub.s32 6, %v1003_v56 }
  0xb3   :  { %766 = vmatpush3.msra.mxu0 %v51_v49  ;;  %793 = vmatpush3.msra.mxu1 %v399_v55 }
  0xb4   :  { %767 = vmatprep.subr.mxu0 %v833_v17  ;;  %794 = vmatprep.subr.mxu1 %v833_v17 }
  0xb5   :  { %768 = vmatpush3.msra.mxu0 %v50_v53 }
  0xb6   :  { %769 = vmatprep.subr.mxu0 %v833_v17 }
 0x136   :  { %v159_v60 = vpop.xlane.xlu0 %158 }
 0x137   :  { %v160_v61 = vsub.f32 %v155_v48, %v159_v60  ;;  %v49_v60 = vld [vmem:[%s1258_s5 + $0x38] sm:$0xff] }
 0x138   :  { %770 = vmatpush3.msra.mxu0 %v49_v60 }
 0x139   :  { %v161_v62 = vmul.f32 1.442695, %v160_v61  ;;  %v398_v61 = vld [vmem:[%s1259_s7 + $0x60] sm:$0xff]  ;;  %771 = vmatprep.subr.mxu0 %v833_v17 }
 0x13a   :  { %795 = vmatpush3.msra.mxu1 %v398_v61 }
 0x13b   :  { %825 = vpow2.f32 %v161_v62  ;;  %v492_v63 = vpop.xlane.xlu1 %491  ;;  %v48_v62 = vld [vmem:[%s1258_s5 + $0x30] sm:$0xff]  ;;  %796 = vmatprep.subr.mxu1 %v833_v17 }
 0x13c   :  { %v493_v59 = vsub.f32 %v489_v57, %v492_v63  ;;  %772 = vmatpush3.msra.mxu0 %v48_v62 }
 0x13d   :  { %773 = vmatprep.subr.mxu0 %v833_v17 }
 0x13e   :  { %v494_v1 = vmul.f32 1.442695, %v493_v59 }
 0x140   :  { %827 = vpow2.f32 %v494_v1  ;;  %v221_v1 = vsub.s32 7, %v1003_v56 }
 0x148   :  { %v826_v3 = vpop.eup %825 }
 0x149   :  { %v163_v4 = vmul.f32 %v826_v3, %v40_v21  ;;  %v179_v21 = vsub.s32 1, %v1003_v56  ;;  %v397_v3 = vld [vmem:[%s1259_s7 + $0x58] sm:$0xff]  ;;  %v392_v56 = vld [vmem:[%s1259_s7 + $0x30] sm:$0xff] }
 0x14a   :  { %797 = vmatpush3.msra.mxu1 %v397_v3 }
 0x14b   :  { %v164_v7 = vsel %vm156_vm9, %v163_v4, 0.0  ;;  %798 = vmatprep.subr.mxu1 %v833_v17 }
 0x14c   :  { %165 = vadd.xlane.f32.xlu0 %v164_v7 }
 0x14d   :  { %v828_v8 = vpop.eup %827 }
 0x14e   :  { %v496_v10 = vmul.f32 %v828_v8, %v384_v44  ;;  %v396_v8 = vld [vmem:[%s1259_s7 + $0x50] sm:$0xff] }
 0x14f   :  { %799 = vmatpush3.msra.mxu1 %v396_v8 }
 0x150   :  { %v497_v12 = vsel %vm156_vm9, %v496_v10, 0.0  ;;  %800 = vmatprep.subr.mxu1 %v833_v17 }
 0x151   :  { %498 = vadd.xlane.f32.xlu1 %v497_v12  ;;  %v46_v12 = vld [vmem:[%s1258_s5 + $0x20] sm:$0xff] }
 0x1d5   :  { %v166_v13 = vpop.xlane.xlu0 %165 }
 0x1d6   :  { %v167_v14 = vadd.f32 1e-20, %v166_v13  ;;  %v395_v13 = vld [vmem:[%s1259_s7 + $0x48] sm:$0xff] }
 0x1d7   :  { %801 = vmatpush3.msra.mxu1 %v395_v13 }
 0x1d8   :  { %829 = vrcp.f32 %v167_v14  ;;  %v45_v14 = vld [vmem:[%s1258_s5 + $0x18] sm:$0xff]  ;;  %802 = vmatprep.subr.mxu1 %v833_v17 }
 0x1d9   :  { %803 = vmatpush3.msra.mxu1 %v394_v20 }
 0x1da   :  { %v499_v15 = vpop.xlane.xlu1 %498  ;;  %804 = vmatprep.subr.mxu1 %v833_v17 }
 0x1db   :  { %v500_v16 = vadd.f32 1e-20, %v499_v15 }
 0x1dd   :  { %831 = vrcp.f32 %v500_v16 }
 0x1e5   :  { %v830_v23 = vpop.eup %829 }
 0x1e6   :  { %v1041_v27 = vmul.f32 %v830_v23, %v163_v4  ;;  %v47_v4 = vld [vmem:[%s1258_s5 + $0x28] sm:$0xff]  ;;  %v393_v23 = vld [vmem:[%s1259_s7 + $0x38] sm:$0xff] }
 0x1e7   :  { %774 = vmatpush3.msra.mxu0 %v47_v4  ;;  %805 = vmatpush3.msra.mxu1 %v393_v23 }
 0x1e8   :  { %v180_v28 = vrot.slane %v1041_v27, %v179_v21  ;;  %v173_v29 = vrot.slane %v1041_v27, %v172_v22  ;;  %v187_v39 = vrot.slane %v1041_v27, %v186_v32  ;;  %v194_v48 = vrot.slane %v1041_v27, %v193_v40  ;;  %775 = vmatprep.subr.mxu0 %v833_v17 }
 0x1e9   :  { %v201_v50 = vrot.slane %v1041_v27, %v200_v45  ;;  %v208_v57 = vrot.slane %v1041_v27, %v207_v51  ;;  %v215_v59 = vrot.slane %v1041_v27, %v214_v58  ;;  %776 = vmatpush3.msra.mxu0 %v46_v12  ;;  %806 = vmatprep.subr.mxu1 %v833_v17 }
 0x1ea   :  { %v832_v34 = vpop.eup %831  ;;  %182 = vbcast.lane.b32.xlu1 %v180_v28, 256  ;;  %175 = vbcast.lane.b32.xlu0 %v173_v29, 256  ;;  %v391_v29 = vld [vmem:[%s1259_s7 + $0x28] sm:$0xff] }
 0x1eb   :  { %v1053_v38 = vmul.f32 %v832_v34, %v496_v10  ;;  %v222_v10 = vrot.slane %v1041_v27, %v221_v1  ;;  %777 = vmatprep.subr.mxu0 %v833_v17  ;;  %v42_v27 = vld [vmem:[%s1258_s5] sm:$0xff]  ;;  %807 = vmatpush3.msra.mxu1 %v392_v56  ;;  %v388_v34 = vld [vmem:[%s1259_s7 + $0x10] sm:$0xff] }
 0x1ec   :  { %778 = vmatpush3.msra.mxu0 %v45_v14  ;;  %808 = vmatprep.subr.mxu1 %v833_v17 }
 0x1ed   :  { %v506_v44 = vrot.slane %v1053_v38, %v172_v22  ;;  %v513_v54 = vrot.slane %v1053_v38, %v179_v21  ;;  %v520_v63 = vrot.slane %v1053_v38, %v186_v32  ;;  %v527_v7 = vrot.slane %v1053_v38, %v193_v40  ;;  %v44_v21 = vld [vmem:[%s1258_s5 + $0x10] sm:$0xff]  ;;  %779 = vmatprep.subr.mxu0 %v833_v17  ;;  %v390_v32 = vld [vmem:[%s1259_s7 + $0x20] sm:$0xff] }
 0x1ee   :  { %189 = vbcast.lane.b32.xlu1 %v187_v39, 256  ;;  %v534_v15 = vrot.slane %v1053_v38, %v200_v45  ;;  %v548_v16 = vrot.slane %v1053_v38, %v214_v58  ;;  %v541_v22 = vrot.slane %v1053_v38, %v207_v51  ;;  %780 = vmatpush3.msra.mxu0 %v44_v21 }
 0x1ef   :  { %508 = vbcast.lane.b32.xlu0 %v506_v44, 256  ;;  %781 = vmatprep.subr.mxu0 %v833_v17  ;;  %v555_v28 = vrot.slane %v1053_v38, %v221_v1  ;;  %v386_v38 = vld [vmem:[%s1259_s7] sm:$0xff] }
 0x1f0   :  { %782 = vmatpush3.msra.mxu0 %v43_v26  ;;  %809 = vmatpush3.msra.mxu1 %v391_v29 }
 0x1f1   :  { %783 = vmatprep.subr.mxu0 %v833_v17  ;;  %810 = vmatprep.subr.mxu1 %v833_v17 }
 0x1f2   :  { %196 = vbcast.lane.b32.xlu1 %v194_v48, 256  ;;  %784 = vmatpush3.msra.mxu0 %v42_v27 }
 0x1f3   :  { %203 = vbcast.lane.b32.xlu0 %v201_v50, 256  ;;  %811 = vmatpush3.msra.mxu1 %v390_v32 }
 0x1f4   :  { %812 = vmatprep.subr.mxu1 %v833_v17 }
 0x1f5   :  { %813 = vmatpush3.msra.mxu1 %v389_v33 }
 0x1f6   :  { %515 = vbcast.lane.b32.xlu1 %v513_v54, 256  ;;  %814 = vmatprep.subr.mxu1 %v833_v17 }
 0x1f7   :  { %210 = vbcast.lane.b32.xlu0 %v208_v57, 256  ;;  %815 = vmatpush3.msra.mxu1 %v388_v34 }
 0x1f8   :  { %816 = vmatprep.subr.mxu1 %v833_v17 }
 0x1f9   :  { %817 = vmatpush3.msra.mxu1 %v387_v35 }
 0x1fa   :  { %522 = vbcast.lane.b32.xlu1 %v520_v63, 256  ;;  %818 = vmatprep.subr.mxu1 %v833_v17 }
 0x1fb   :  { %217 = vbcast.lane.b32.xlu0 %v215_v59, 256  ;;  %819 = vmatpush3.msra.mxu1 %v386_v38 }
 0x1fe   :  { %529 = vbcast.lane.b32.xlu1 %v527_v7, 256 }
 0x1ff   :  { %224 = vbcast.lane.b32.xlu0 %v222_v10, 256 }
 0x202   :  { %536 = vbcast.lane.b32.xlu1 %v534_v15, 256 }
 0x203   :  { %550 = vbcast.lane.b32.xlu0 %v548_v16, 256 }
 0x206   :  { %543 = vbcast.lane.b32.xlu1 %v541_v22, 256 }
 0x20a   :  { %557 = vbcast.lane.b32.xlu1 %v555_v28, 256 }
 0x25c   :  { %v183_v39 = vpop.permute.xlu1 %182  ;;  %v176_v40 = vpop.permute.xlu0 %175 }
 0x25d   :  { %v227_v41 = vmul.f32 %v183_v39, %v908_v6  ;;  %v226_v44 = vmul.f32 %v176_v40, %v896_v2 }
 0x25f   :  { %v241_v45 = vsel %vm72_vm0, %v227_v41, 0.0  ;;  %v234_v46 = vsel %vm72_vm0, %v226_v44, 0.0 }
 0x260   :  { %v242_v47 = vrot.slane %v241_v45, 4  ;;  %v235_v48 = vrot.slane %v234_v46, 4  ;;  %v190_v49 = vpop.permute.xlu1 %189 }
 0x261   :  { %v228_v50 = vmul.f32 %v190_v49, %v888_v0  ;;  %v509_v51 = vpop.permute.xlu0 %508 }
 0x262   :  { %v243_v52 = vadd.f32 %v242_v47, %v241_v45  ;;  %v236_v53 = vadd.f32 %v235_v48, %v234_v46  ;;  %v559_v17 = vmul.f32 %v509_v51, %v923_v11 }
 0x263   :  { %v248_v54 = vsel %vm72_vm0, %v228_v50, 0.0 }
 0x264   :  { %v244_v55 = vrot.slane %v243_v52, 2  ;;  %v237_v6 = vrot.slane %v236_v53, 2  ;;  %v249_v57 = vrot.slane %v248_v54, 4  ;;  %v567_v2 = vsel %vm72_vm0, %v559_v17, 0.0  ;;  %v197_v58 = vpop.permute.xlu1 %196 }
 0x265   :  { %v568_v60 = vrot.slane %v567_v2, 4  ;;  %v229_v61 = vmul.f32 %v197_v58, %v903_v5  ;;  %v204_v62 = vpop.permute.xlu0 %203 }
 0x266   :  { %v245_v63 = vadd.f32 %v244_v55, %v243_v52  ;;  %v238_v59 = vadd.f32 %v237_v6, %v236_v53  ;;  %v250_v0 = vadd.f32 %v249_v57, %v248_v54  ;;  %v230_v1 = vmul.f32 %v204_v62, %v939_v19 }
 0x267   :  { %v255_v3 = vsel %vm72_vm0, %v229_v61, 0.0  ;;  %v569_v7 = vadd.f32 %v568_v60, %v567_v2 }
 0x268   :  { %v246_v11 = vrot.slane %v245_v63, 1  ;;  %v251_v4 = vrot.slane %v250_v0, 2  ;;  %v256_v8 = vrot.slane %v255_v3, 4  ;;  %v516_v10 = vpop.permute.xlu1 %515  ;;  %v239_v12 = vrot.slane %v238_v59, 1 }
 0x269   :  { %v262_v13 = vsel %vm72_vm0, %v230_v1, 0.0  ;;  %v560_v14 = vmul.f32 %v516_v10, %v915_v9  ;;  %v211_v15 = vpop.permute.xlu0 %210  ;;  %v570_v23 = vrot.slane %v569_v7, 2 }
 0x26a   :  { %v252_v5 = vadd.f32 %v251_v4, %v250_v0  ;;  %v257_v16 = vadd.f32 %v256_v8, %v255_v3  ;;  %v263_v20 = vrot.slane %v262_v13, 4  ;;  %v231_v19 = vmul.f32 %v211_v15, %v953_v25 }
 0x26b   :  { %v574_v21 = vsel %vm72_vm0, %v560_v14, 0.0  ;;  %v247_v22 = vadd.f32 %v246_v11, %v245_v63  ;;  %v240_v28 = vadd.f32 %v239_v12, %v238_v59  ;;  %v1215_v41 = vadd.f32 %v570_v23, %v569_v7 }
 0x26c   :  { %v258_v26 = vrot.slane %v257_v16, 2  ;;  %v575_v56 = vrot.slane %v574_v21, 4  ;;  %v523_v27 = vpop.permute.xlu1 %522  ;;  %v264_v29 = vadd.f32 %v263_v20, %v262_v13  ;;  %v269_v32 = vsel %vm72_vm0, %v231_v19, 0.0 }
 0x26d   :  { %v561_v33 = vmul.f32 %v523_v27, %v934_v18  ;;  %v218_v9 = vpop.permute.xlu0 %217  ;;  %v253_v34 = vrot.slane %v252_v5, 1  ;;  %v270_v38 = vrot.slane %v269_v32, 4  ;;  %v298_v47 = vsel %vm140_vm1, %v247_v22, %v240_v28 }
 0x26e   :  { %v576_v35 = vadd.f32 %v575_v56, %v574_v21  ;;  %v265_v39 = vrot.slane %v264_v29, 2  ;;  %v232_v25 = vmul.f32 %v218_v9, %v967_v31  ;;  %v259_v44 = vadd.f32 %v258_v26, %v257_v16 }
 0x26f   :  { %v581_v40 = vsel %vm72_vm0, %v561_v33, 0.0  ;;  %v271_v45 = vadd.f32 %v270_v38, %v269_v32  ;;  %v254_v51 = vadd.f32 %v253_v34, %v252_v5  ;;  %v572_v62 = vrot.slane %v1215_v41, 1 }
 0x270   :  { %v530_v46 = vpop.permute.xlu1 %529  ;;  %v582_v48 = vrot.slane %v581_v40, 4  ;;  %v276_v49 = vsel %vm72_vm0, %v232_v25, 0.0  ;;  %v577_v52 = vrot.slane %v576_v35, 2  ;;  %v266_v54 = vadd.f32 %v265_v39, %v264_v29 }
 0x271   :  { %v562_v18 = vmul.f32 %v530_v46, %v948_v24  ;;  %v225_v50 = vpop.permute.xlu0 %224  ;;  %v272_v53 = vrot.slane %v271_v45, 2  ;;  %v277_v17 = vrot.slane %v276_v49, 4  ;;  %v260_v57 = vrot.slane %v259_v44, 1 }
 0x272   :  { %v583_v55 = vadd.f32 %v582_v48, %v581_v40  ;;  %v233_v6 = vmul.f32 %v225_v50, %v981_v37  ;;  %v299_v1 = vsel %vm142_vm2, %v254_v51, %v298_v47  ;;  %v578_v3 = vadd.f32 %v577_v52, %v576_v35 }
 0x273   :  { %v588_v31 = vsel %vm72_vm0, %v562_v18, 0.0  ;;  %v273_v2 = vadd.f32 %v272_v53, %v271_v45  ;;  %v278_v58 = vadd.f32 %v277_v17, %v276_v49  ;;  %v267_v7 = vrot.slane %v266_v54, 1 }
 0x274   :  { %v589_v60 = vrot.slane %v588_v31, 4  ;;  %v537_v61 = vpop.permute.xlu1 %536  ;;  %v584_v63 = vrot.slane %v583_v55, 2  ;;  %v283_v24 = vsel %vm72_vm0, %v233_v6, 0.0  ;;  %v261_v12 = vadd.f32 %v260_v57, %v259_v44 }
 0x275   :  { %v563_v59 = vmul.f32 %v537_v61, %v962_v30  ;;  %v551_v0 = vpop.permute.xlu0 %550  ;;  %v279_v11 = vrot.slane %v278_v58, 2  ;;  %v284_v37 = vrot.slane %v283_v24, 4  ;;  %v274_v13 = vrot.slane %v273_v2, 1 }
 0x276   :  { %v590_v4 = vadd.f32 %v589_v60, %v588_v31  ;;  %v565_v10 = vmul.f32 %v551_v0, %v990_v42  ;;  %v585_v16 = vadd.f32 %v584_v63, %v583_v55  ;;  %v268_v56 = vadd.f32 %v267_v7, %v266_v54 }
 0x277   :  { %v595_v8 = vsel %vm72_vm0, %v563_v59, 0.0  ;;  %v280_v14 = vadd.f32 %v279_v11, %v278_v58  ;;  %v285_v20 = vadd.f32 %v284_v37, %v283_v24  ;;  %v579_v27 = vrot.slane %v578_v3, 1 }
 0x278   :  { %v591_v15 = vrot.slane %v590_v4, 2  ;;  %v544_v5 = vpop.permute.xlu1 %543  ;;  %v596_v30 = vrot.slane %v595_v8, 4  ;;  %v609_v21 = vsel %vm72_vm0, %v565_v10, 0.0  ;;  %v275_v42 = vadd.f32 %v274_v13, %v273_v2 }
 0x279   :  { %v281_v19 = vrot.slane %v280_v14, 1  ;;  %v610_v23 = vrot.slane %v609_v21, 4  ;;  %v564_v26 = vmul.f32 %v544_v5, %v976_v36  ;;  %v286_v28 = vrot.slane %v285_v20, 2 }
 0x27a   :  { %v592_v22 = vadd.f32 %v591_v15, %v590_v4  ;;  %v597_v29 = vadd.f32 %v596_v30, %v595_v8  ;;  %v300_v34 = vsel %vm144_vm3, %v261_v12, %v299_v1  ;;  %v586_v35 = vrot.slane %v585_v16, 1  ;;  %v709_v15 = vld [vmem:[%s1260_s0] sm:$0xff] }
 0x27b   :  { %v611_v32 = vadd.f32 %v610_v23, %v609_v21  ;;  %v602_v33 = vsel %vm72_vm0, %v564_v26, 0.0  ;;  %v287_v38 = vadd.f32 %v286_v28, %v285_v20  ;;  %v282_v25 = vadd.f32 %v281_v19, %v280_v14 }
 0x27c   :  { %v558_v9 = vpop.permute.xlu1 %557  ;;  %v598_v39 = vrot.slane %v597_v29, 2  ;;  %v603_v40 = vrot.slane %v602_v33, 4  ;;  %v593_v44 = vrot.slane %v592_v22, 1  ;;  %v301_v49 = vsel %vm146_vm4, %v268_v56, %v300_v34 }
 0x27d   :  { %v612_v45 = vrot.slane %v611_v32, 2  ;;  %v566_v36 = vmul.f32 %v558_v9, %v995_v43  ;;  %v288_v46 = vrot.slane %v287_v38, 1  ;;  %v580_v18 = vadd.f32 %v579_v27, %v578_v3 }
 0x27e   :  { %v599_v47 = vadd.f32 %v598_v39, %v597_v29  ;;  %v604_v48 = vadd.f32 %v603_v40, %v602_v33  ;;  %v302_v51 = vsel %vm148_vm5, %v275_v42, %v301_v49  ;;  %v573_v55 = vadd.f32 %v572_v62, %v1215_v41 }
 0x27f   :  { %v616_v50 = vsel %vm72_vm0, %v566_v36, 0.0  ;;  %v289_v54 = vadd.f32 %v288_v46, %v287_v38  ;;  %v587_v31 = vadd.f32 %v586_v35, %v585_v16  ;;  %v613_v6 = vadd.f32 %v612_v45, %v611_v32 }
 0x280   :  { %v600_v52 = vrot.slane %v599_v47, 1  ;;  %v605_v53 = vrot.slane %v604_v48, 2  ;;  %v617_v17 = vrot.slane %v616_v50, 4  ;;  %v303_v43 = vsel %vm150_vm6, %v282_v25, %v302_v51 }
 0x281   :  { %v594_v57 = vadd.f32 %v593_v44, %v592_v22  ;;  %v304_v60 = vsel %vm152_vm7, %v289_v54, %v303_v43  ;;  %v631_v63 = vsel %vm140_vm1, %v580_v18, %v573_v55  ;;  %v614_v1 = vrot.slane %v613_v6, 1 }
 0x282   :  { %v606_v2 = vadd.f32 %v605_v53, %v604_v48  ;;  %v618_v58 = vadd.f32 %v617_v17, %v616_v50  ;;  %v601_v61 = vadd.f32 %v600_v52, %v599_v47  ;;  %786 = vmatmul.mubr.f32.vlgmr.msra.gmra.mxu0 %v304_v60  ;;  %v632_v0 = vsel %vm142_vm2, %v587_v31, %v631_v63 }
 0x283   :  { %v633_v62 = vsel %vm144_vm3, %v594_v57, %v632_v0  ;;  %v615_v37 = vadd.f32 %v614_v1, %v613_v6 }
 0x284   :  { %v607_v24 = vrot.slane %v606_v2, 1  ;;  %v619_v59 = vrot.slane %v618_v58, 2  ;;  %v634_v11 = vsel %vm146_vm4, %v601_v61, %v633_v62 }
 0x286   :  { %v608_v3 = vadd.f32 %v607_v24, %v606_v2  ;;  %v620_v41 = vadd.f32 %v619_v59, %v618_v58 }
 0x288   :  { %v621_v4 = vrot.slane %v620_v41, 1  ;;  %v635_v7 = vsel %vm148_vm5, %v608_v3, %v634_v11 }
 0x289   :  { %v636_v10 = vsel %vm150_vm6, %v615_v37, %v635_v7 }
 0x28a   :  { %v622_v8 = vadd.f32 %v621_v4, %v620_v41 }
 0x28c   :  { %v637_v12 = vsel %vm152_vm7, %v622_v8, %v636_v10 }
 0x28d   :  { %821 = vmatmul.mubr.f32.vlgmr.msra.gmra.mxu1 %v637_v12 }
 0x342   :  { %v372_v13 = vpop.f32.mrf.mxu0 }
 0x343   :  { %v710_v5 = vadd.f32 %v709_v15, %v372_v13 }
 0x344   :  { %v787_v14 = vpop.f32.mrf.mxu0 }
 0x34d   :  { %v705_v16 = vpop.f32.mrf.mxu1 }
 0x34e   :  { %v711_v20 = vadd.f32 %v710_v5, %v705_v16 }
 0x34f   :  { %v822_v30 = vpop.f32.mrf.mxu1 }
 0x350   :  { %712 = vst [vmem:[%s1261_s9] sm:$0xff] %v711_v20 }

// kernel: forward.13
= control target key start
LH: loop header
LB: loop body
LE: loop exit
PB: predicated region body
PF: predicated region fallthrough
CT: control target
= control target key end

     0   :  { %vm2303_vm0 = vmmov 0   ;;  %s3523_s4 = inlined_call_operand.vmem [shape: f32[128,128], index: 4, kind: input, shape index: {}]   ;;  %s3524_s0 = inlined_call_operand.vmem [shape: f32[128,128], index: 0, kind: input, shape index: {}]   ;;  %s3525_s5 = inlined_call_operand.vmem [shape: f32[128,128], index: 5, kind: input, shape index: {}]   ;;  %s3526_s6 = inlined_call_operand.vmem [shape: f32[128,256], index: 6, kind: input, shape index: {}]   ;;  %s3527_s1 = inlined_call_operand.vmem [shape: f32[128,128], index: 1, kind: input, shape index: {}]   ;;  %s3528_s2 = inlined_call_operand.vmem [shape: f32[3,128,128], index: 2, kind: input, shape index: {}]   ;;  %s3529_s8 = inlined_call_operand.<no memory space> [shape: f32[1,1], index: 8, kind: input, shape index: {}]   ;;  %s3530_s7 = inlined_call_operand.vmem [shape: f32[1,128], index: 7, kind: input, shape index: {}]   ;;  %s3531_s3 = inlined_call_operand.vmem [shape: f32[3,128], index: 3, kind: input, shape index: {}]   ;;  %s3532_s9 = inlined_call_operand.vmem [shape: f32[1,128], index: 9, kind: output, shape index: {}]  }
   0x1   :  { %v65_v0 = vld [vmem:[%s3523_s4 + $0x78] sm:$0xff]  ;;  %v64_v1 = vld [vmem:[%s3523_s4 + $0x70] sm:$0xff]  ;;  %v63_v2 = vld [vmem:[%s3523_s4 + $0x68] sm:$0xff] }
   0x2   :  { %1881 = vmatprep.subr.mxu0 %v65_v0  ;;  %v62_v3 = vld [vmem:[%s3523_s4 + $0x60] sm:$0xff]  ;;  %v61_v5 = vld [vmem:[%s3523_s4 + $0x58] sm:$0xff]  ;;  %v241_v7 = vld [vmem:[%s3525_s5 + $0x70] sm:$0xff] }
   0x3   :  { %1882 = vmatpush3.msra.mxu0 %v65_v0  ;;  %v34_v4 = vld [vmem:[%s3524_s0] sm:$0xff]  ;;  %v242_v6 = vld [vmem:[%s3525_s5 + $0x78] sm:$0xff]  ;;  %v60_v8 = vld [vmem:[%s3523_s4 + $0x50] sm:$0xff] }
   0x4   :  { %1883 = vmatprep.subr.mxu0 %v64_v1  ;;  %1913 = vmatprep.mubr.f32.mxu0 %v34_v4  ;;  %v240_v9 = vld [vmem:[%s3525_s5 + $0x68] sm:$0xff]  ;;  %v239_v11 = vld [vmem:[%s3525_s5 + $0x60] sm:$0xff]  ;;  %v238_v13 = vld [vmem:[%s3525_s5 + $0x58] sm:$0xff] }
   0x5   :  { %1884 = vmatpush3.msra.mxu0 %v64_v1  ;;  %1937 = vmatprep.subr.mxu1 %v242_v6  ;;  %v59_v10 = vld [vmem:[%s3523_s4 + $0x48] sm:$0xff]  ;;  %v58_v12 = vld [vmem:[%s3523_s4 + $0x40] sm:$0xff]  ;;  %v57_v14 = vld [vmem:[%s3523_s4 + $0x38] sm:$0xff] }
   0x6   :  { %1885 = vmatprep.subr.mxu0 %v63_v2  ;;  %1938 = vmatpush3.msra.mxu1 %v242_v6  ;;  %v237_v15 = vld [vmem:[%s3525_s5 + $0x50] sm:$0xff]  ;;  %v236_v17 = vld [vmem:[%s3525_s5 + $0x48] sm:$0xff]  ;;  %v235_v19 = vld [vmem:[%s3525_s5 + $0x40] sm:$0xff] }
   0x7   :  { %1886 = vmatpush3.msra.mxu0 %v63_v2  ;;  %1939 = vmatprep.subr.mxu1 %v241_v7  ;;  %v56_v16 = vld [vmem:[%s3523_s4 + $0x30] sm:$0xff]  ;;  %v55_v18 = vld [vmem:[%s3523_s4 + $0x28] sm:$0xff]  ;;  %v54_v20 = vld [vmem:[%s3523_s4 + $0x20] sm:$0xff] }
   0x8   :  { %1887 = vmatprep.subr.mxu0 %v62_v3  ;;  %1940 = vmatpush3.msra.mxu1 %v241_v7  ;;  %v234_v21 = vld [vmem:[%s3525_s5 + $0x38] sm:$0xff]  ;;  %v233_v23 = vld [vmem:[%s3525_s5 + $0x30] sm:$0xff]  ;;  %v232_v25 = vld [vmem:[%s3525_s5 + $0x28] sm:$0xff] }
   0x9   :  { %1888 = vmatpush3.msra.mxu0 %v62_v3  ;;  %1941 = vmatprep.subr.mxu1 %v240_v9  ;;  %v53_v22 = vld [vmem:[%s3523_s4 + $0x18] sm:$0xff]  ;;  %v52_v24 = vld [vmem:[%s3523_s4 + $0x10] sm:$0xff]  ;;  %v51_v26 = vld [vmem:[%s3523_s4 + $0x8] sm:$0xff] }
   0xa   :  { %1889 = vmatprep.subr.mxu0 %v61_v5  ;;  %1942 = vmatpush3.msra.mxu1 %v240_v9  ;;  %v231_v27 = vld [vmem:[%s3525_s5 + $0x20] sm:$0xff]  ;;  %v230_v29 = vld [vmem:[%s3525_s5 + $0x18] sm:$0xff]  ;;  %v35_v30 = vld [vmem:[%s3524_s0 + $0x8] sm:$0xff] }
   0xb   :  { %1890 = vmatpush3.msra.mxu0 %v61_v5  ;;  %1943 = vmatprep.subr.mxu1 %v239_v11  ;;  %v50_v28 = vld [vmem:[%s3523_s4] sm:$0xff]  ;;  %v2451_v31 = vld [vmem:[%s3526_s6 + $0xf8] sm:$0xff]  ;;  %v2456_v32 = vld [vmem:[%s3526_s6 + $0xf0] sm:$0xff] }
   0xc   :  { %1891 = vmatprep.subr.mxu0 %v60_v8  ;;  %1944 = vmatpush3.msra.mxu1 %v239_v11  ;;  %v36_v33 = vld [vmem:[%s3524_s0 + $0x10] sm:$0xff]  ;;  %v2464_v34 = vld [vmem:[%s3526_s6 + $0xe8] sm:$0xff]  ;;  %v2473_v36 = vld [vmem:[%s3526_s6 + $0xe0] sm:$0xff] }
   0xd   :  { %1892 = vmatpush3.msra.mxu0 %v60_v8  ;;  %1945 = vmatprep.subr.mxu1 %v238_v13  ;;  %v229_v35 = vld [vmem:[%s3525_s5 + $0x10] sm:$0xff]  ;;  %v37_v37 = vld [vmem:[%s3524_s0 + $0x18] sm:$0xff]  ;;  %v38_v40 = vld [vmem:[%s3524_s0 + $0x20] sm:$0xff] }
   0xe   :  { %1893 = vmatprep.subr.mxu0 %v59_v10  ;;  %1946 = vmatpush3.msra.mxu1 %v238_v13  ;;  %v2482_v38 = vld [vmem:[%s3526_s6 + $0xd8] sm:$0xff]  ;;  %v2488_v39 = vld [vmem:[%s3526_s6 + $0xd0] sm:$0xff]  ;;  %v2497_v41 = vld [vmem:[%s3526_s6 + $0xc8] sm:$0xff] }
   0xf   :  { %1894 = vmatpush3.msra.mxu0 %v59_v10  ;;  %1947 = vmatprep.subr.mxu1 %v237_v15  ;;  %v228_v42 = vld [vmem:[%s3525_s5 + $0x8] sm:$0xff]  ;;  %v2506_v43 = vld [vmem:[%s3526_s6 + $0xc0] sm:$0xff]  ;;  %v2515_v45 = vld [vmem:[%s3526_s6 + $0xb8] sm:$0xff] }
  0x10   :  { %1895 = vmatprep.subr.mxu0 %v58_v12  ;;  %1948 = vmatpush3.msra.mxu1 %v237_v15  ;;  %v39_v44 = vld [vmem:[%s3524_s0 + $0x28] sm:$0xff]  ;;  %v2521_v46 = vld [vmem:[%s3526_s6 + $0xb0] sm:$0xff]  ;;  %v227_v49 = vld [vmem:[%s3525_s5] sm:$0xff] }
  0x11   :  { %1896 = vmatpush3.msra.mxu0 %v58_v12  ;;  %1949 = vmatprep.subr.mxu1 %v236_v17  ;;  %v40_v47 = vld [vmem:[%s3524_s0 + $0x30] sm:$0xff]  ;;  %v2530_v48 = vld [vmem:[%s3526_s6 + $0xa8] sm:$0xff]  ;;  %v2539_v50 = vld [vmem:[%s3526_s6 + $0xa0] sm:$0xff] }
  0x12   :  { %1897 = vmatprep.subr.mxu0 %v57_v14  ;;  %1950 = vmatpush3.msra.mxu1 %v236_v17  ;;  %v41_v51 = vld [vmem:[%s3524_s0 + $0x38] sm:$0xff]  ;;  %v2554_v53 = vld [vmem:[%s3526_s6 + $0x90] sm:$0xff]  ;;  %v42_v54 = vld [vmem:[%s3524_s0 + $0x40] sm:$0xff] }
  0x13   :  { %1898 = vmatpush3.msra.mxu0 %v57_v14  ;;  %1951 = vmatprep.subr.mxu1 %v235_v19  ;;  %v2548_v52 = vld [vmem:[%s3526_s6 + $0x98] sm:$0xff]  ;;  %v2563_v55 = vld [vmem:[%s3526_s6 + $0x88] sm:$0xff]  ;;  %v211_v56 = vld [vmem:[%s3527_s1] sm:$0xff] }
  0x14   :  { %1899 = vmatprep.subr.mxu0 %v56_v16  ;;  %1952 = vmatpush3.msra.mxu1 %v235_v19  ;;  %v2572_v57 = vld [vmem:[%s3526_s6 + $0x80] sm:$0xff]  ;;  %v212_v58 = vld [vmem:[%s3527_s1 + $0x8] sm:$0xff]  ;;  %v2584_v60 = vld [vmem:[%s3526_s6 + $0x78] sm:$0xff] }
  0x15   :  { %1900 = vmatpush3.msra.mxu0 %v56_v16  ;;  %1953 = vmatprep.subr.mxu1 %v234_v21  ;;  %v43_v59 = vld [vmem:[%s3524_s0 + $0x48] sm:$0xff]  ;;  %v2590_v61 = vld [vmem:[%s3526_s6 + $0x70] sm:$0xff]  ;;  %v2608_v1 = vld [vmem:[%s3526_s6 + $0x60] sm:$0xff] }
  0x16   :  { %1901 = vmatprep.subr.mxu0 %v55_v18  ;;  %1954 = vmatpush3.msra.mxu1 %v234_v21  ;;  %v44_v62 = vld [vmem:[%s3524_s0 + $0x50] sm:$0xff]  ;;  %v2599_v63 = vld [vmem:[%s3526_s6 + $0x68] sm:$0xff]  ;;  %v214_v2 = vld [vmem:[%s3527_s1 + $0x18] sm:$0xff] }
  0x17   :  { %1902 = vmatpush3.msra.mxu0 %v55_v18  ;;  %1955 = vmatprep.subr.mxu1 %v233_v23  ;;  %v213_v0 = vld [vmem:[%s3527_s1 + $0x10] sm:$0xff]  ;;  %v45_v3 = vld [vmem:[%s3524_s0 + $0x58] sm:$0xff]  ;;  %v46_v6 = vld [vmem:[%s3524_s0 + $0x60] sm:$0xff] }
  0x18   :  { %1903 = vmatprep.subr.mxu0 %v54_v20  ;;  %1956 = vmatpush3.msra.mxu1 %v233_v23  ;;  %v2620_v4 = vld [vmem:[%s3526_s6 + $0x58] sm:$0xff]  ;;  %v2626_v5 = vld [vmem:[%s3526_s6 + $0x50] sm:$0xff]  ;;  %v2635_v7 = vld [vmem:[%s3526_s6 + $0x48] sm:$0xff] }
  0x19   :  { %1904 = vmatpush3.msra.mxu0 %v54_v20  ;;  %1957 = vmatprep.subr.mxu1 %v232_v25  ;;  %v215_v8 = vld [vmem:[%s3527_s1 + $0x20] sm:$0xff]  ;;  %v216_v10 = vld [vmem:[%s3527_s1 + $0x28] sm:$0xff]  ;;  %v2656_v12 = vld [vmem:[%s3526_s6 + $0x38] sm:$0xff] }
  0x1a   :  { %1905 = vmatprep.subr.mxu0 %v53_v22  ;;  %1958 = vmatpush3.msra.mxu1 %v232_v25  ;;  %v2644_v9 = vld [vmem:[%s3526_s6 + $0x40] sm:$0xff]  ;;  %v47_v11 = vld [vmem:[%s3524_s0 + $0x68] sm:$0xff]  ;;  %v2662_v13 = vld [vmem:[%s3526_s6 + $0x30] sm:$0xff] }
  0x1b   :  { %1906 = vmatpush3.msra.mxu0 %v53_v22  ;;  %1959 = vmatprep.subr.mxu1 %v231_v27  ;;  %v48_v14 = vld [vmem:[%s3524_s0 + $0x70] sm:$0xff]  ;;  %v2671_v15 = vld [vmem:[%s3526_s6 + $0x28] sm:$0xff]  ;;  %v2680_v17 = vld [vmem:[%s3526_s6 + $0x20] sm:$0xff] }
  0x1c   :  { %1907 = vmatprep.subr.mxu0 %v52_v24  ;;  %1960 = vmatpush3.msra.mxu1 %v231_v27  ;;  %v217_v16 = vld [vmem:[%s3527_s1 + $0x30] sm:$0xff]  ;;  %v218_v18 = vld [vmem:[%s3527_s1 + $0x38] sm:$0xff]  ;;  %v2704_v22 = vld [vmem:[%s3526_s6 + $0x8] sm:$0xff] }
  0x1d   :  { %1908 = vmatpush3.msra.mxu0 %v52_v24  ;;  %1961 = vmatprep.subr.mxu1 %v230_v29  ;;  %v49_v19 = vld [vmem:[%s3524_s0 + $0x78] sm:$0xff]  ;;  %v2698_v21 = vld [vmem:[%s3526_s6 + $0x10] sm:$0xff]  ;;  %v219_v23 = vld [vmem:[%s3527_s1 + $0x40] sm:$0xff] }
  0x1e   :  { %1909 = vmatprep.subr.mxu0 %v51_v26  ;;  %1962 = vmatpush3.msra.mxu1 %v230_v29  ;;  %v2692_v20 = vld [vmem:[%s3526_s6 + $0x18] sm:$0xff]  ;;  %v2713_v24 = vld [vmem:[%s3526_s6] sm:$0xff]  ;;  %v220_v25 = vld [vmem:[%s3527_s1 + $0x48] sm:$0xff] }
  0x1f   :  { %1910 = vmatpush3.msra.mxu0 %v51_v26  ;;  %1963 = vmatprep.subr.mxu1 %v229_v35  ;;  %v3533_v26 = vmov 0.0   ;;  %v388_v27 = vld [vmem:[%s3528_s2] sm:$0xff]  ;;  %v222_v29 = vld [vmem:[%s3527_s1 + $0x58] sm:$0xff] }
  0x20   :  { %1911 = vmatprep.subr.mxu0 %v50_v28  ;;  %1964 = vmatpush3.msra.mxu1 %v229_v35  ;;  %v224_v35 = vld [vmem:[%s3527_s1 + $0x68] sm:$0xff] }
  0x21   :  { %1912 = vmatpush3.msra.mxu0 %v50_v28  ;;  %1965 = vmatprep.subr.mxu1 %v228_v42  ;;  %v221_v28 = vld [vmem:[%s3527_s1 + $0x50] sm:$0xff] }
  0x22   :  { %1914 = vmatmul.mubr.f32.vlgmr.msra.gmra.mxu0 %v35_v30  ;;  %436 = vmatprep.subr.mxu0 %v2451_v31  ;;  %v389_v30 = vld [vmem:[%s3528_s2 + $0x8] sm:$0xff] }
  0x23   :  { %437 = vmatpush1.msra.mxu0 %v2456_v32  ;;  %1916 = vmatprep.mubr.f32.mxu0 %v36_v33  ;;  %v223_v33 = vld [vmem:[%s3527_s1 + $0x60] sm:$0xff] }
  0x24   :  { %438 = vmatprep.subr.mxu0 %v2464_v34  ;;  %1966 = vmatpush3.msra.mxu1 %v228_v42  ;;  %v226_v42 = vld [vmem:[%s3527_s1 + $0x78] sm:$0xff] }
  0x25   :  { %439 = vmatpush1.msra.mxu0 %v2473_v36  ;;  %1967 = vmatprep.subr.mxu1 %v227_v49 }
  0x26   :  { %1917 = vmatmul.mubr.f32.gmra.mxu0 %v37_v37  ;;  %440 = vmatprep.subr.mxu0 %v2482_v38  ;;  %v390_v37 = vld [vmem:[%s3528_s2 + $0x10] sm:$0xff] }
  0x27   :  { %441 = vmatpush1.msra.mxu0 %v2488_v39  ;;  %1919 = vmatprep.mubr.f32.mxu0 %v38_v40  ;;  %v225_v40 = vld [vmem:[%s3527_s1 + $0x70] sm:$0xff] }
  0x28   :  { %442 = vmatprep.subr.mxu0 %v2497_v41  ;;  %1968 = vmatpush3.msra.mxu1 %v227_v49  ;;  %v393_v49 = vld [vmem:[%s3528_s2 + $0x28] sm:$0xff] }
  0x29   :  { %443 = vmatpush1.msra.mxu0 %v2506_v43  ;;  %1969 = vmatprep.mubr.f32.mxu1 %v211_v56  ;;  %v396_v56 = vld [vmem:[%s3528_s2 + $0x40] sm:$0xff] }
  0x2a   :  { %1920 = vmatmul.mubr.f32.gmra.mxu0 %v39_v44  ;;  %444 = vmatprep.subr.mxu0 %v2515_v45  ;;  %v391_v44 = vld [vmem:[%s3528_s2 + $0x18] sm:$0xff] }
  0x2b   :  { %445 = vmatpush1.msra.mxu0 %v2521_v46  ;;  %1922 = vmatprep.mubr.f32.mxu0 %v40_v47  ;;  %v392_v47 = vld [vmem:[%s3528_s2 + $0x20] sm:$0xff] }
  0x2c   :  { %446 = vmatprep.subr.mxu0 %v2530_v48  ;;  %1970 = vmatmul.mubr.f32.vlgmr.msra.gmra.mxu1 %v212_v58  ;;  %v397_v58 = vld [vmem:[%s3528_s2 + $0x48] sm:$0xff] }
  0x2d   :  { %447 = vmatpush1.msra.mxu0 %v2539_v50  ;;  %1972 = vmatprep.mubr.f32.mxu1 %v213_v0  ;;  %v401_v0 = vld [vmem:[%s3528_s2 + $0x68] sm:$0xff] }
  0x2e   :  { %1923 = vmatmul.mubr.f32.gmra.mxu0 %v41_v51  ;;  %448 = vmatprep.subr.mxu0 %v2548_v52  ;;  %v394_v51 = vld [vmem:[%s3528_s2 + $0x30] sm:$0xff] }
  0x2f   :  { %449 = vmatpush1.msra.mxu0 %v2554_v53  ;;  %1925 = vmatprep.mubr.f32.mxu0 %v42_v54  ;;  %v395_v54 = vld [vmem:[%s3528_s2 + $0x38] sm:$0xff] }
  0x30   :  { %450 = vmatprep.subr.mxu0 %v2563_v55  ;;  %1973 = vmatmul.mubr.f32.gmra.mxu1 %v214_v2  ;;  %v402_v2 = vld [vmem:[%s3528_s2 + $0x70] sm:$0xff] }
  0x31   :  { %451 = vmatpush1.msra.mxu0 %v2572_v57  ;;  %1975 = vmatprep.mubr.f32.mxu1 %v215_v8  ;;  %v1735_v8 = vld [vmem:[%s3528_s2 + $0x88] sm:$0xff] }
  0x32   :  { %1926 = vmatmul.mubr.f32.gmra.mxu0 %v43_v59  ;;  %452 = vmatprep.subr.mxu0 %v2584_v60  ;;  %v398_v59 = vld [vmem:[%s3528_s2 + $0x50] sm:$0xff] }
  0x33   :  { %453 = vmatpush1.msra.mxu0 %v2590_v61  ;;  %1928 = vmatprep.mubr.f32.mxu0 %v44_v62  ;;  %v400_v62 = vld [vmem:[%s3528_s2 + $0x60] sm:$0xff] }
  0x34   :  { %454 = vmatprep.subr.mxu0 %v2599_v63  ;;  %1976 = vmatmul.mubr.f32.gmra.mxu1 %v216_v10  ;;  %v1736_v10 = vld [vmem:[%s3528_s2 + $0x90] sm:$0xff] }
  0x35   :  { %455 = vmatpush1.msra.mxu0 %v2608_v1  ;;  %1978 = vmatprep.mubr.f32.mxu1 %v217_v16 }
  0x36   :  { %1929 = vmatmul.mubr.f32.gmra.mxu0 %v45_v3  ;;  %456 = vmatprep.subr.mxu0 %v2620_v4  ;;  %v403_v3 = vld [vmem:[%s3528_s2 + $0x78] sm:$0xff] }
  0x37   :  { %457 = vmatpush1.msra.mxu0 %v2626_v5  ;;  %1931 = vmatprep.mubr.f32.mxu0 %v46_v6  ;;  %v1734_v6 = vld [vmem:[%s3528_s2 + $0x80] sm:$0xff] }
  0x38   :  { %458 = vmatprep.subr.mxu0 %v2635_v7  ;;  %1979 = vmatmul.mubr.f32.gmra.mxu1 %v218_v18 }
  0x39   :  { %459 = vmatpush1.msra.mxu0 %v2644_v9  ;;  %1981 = vmatprep.mubr.f32.mxu1 %v219_v23  ;;  %v1763_v23 = vld [vmem:[%s3528_s2 + $0x168] sm:$0xff] }
  0x3a   :  { %1932 = vmatmul.mubr.f32.gmra.mxu0 %v47_v11  ;;  %460 = vmatprep.subr.mxu0 %v2656_v12  ;;  %v1759_v11 = vld [vmem:[%s3528_s2 + $0x148] sm:$0xff] }
  0x3b   :  { %461 = vmatpush1.msra.mxu0 %v2662_v13  ;;  %1934 = vmatprep.mubr.f32.mxu0 %v48_v14  ;;  %v1760_v14 = vld [vmem:[%s3528_s2 + $0x150] sm:$0xff] }
  0x3c   :  { %462 = vmatprep.subr.mxu0 %v2671_v15  ;;  %1982 = vmatmul.mubr.f32.gmra.mxu1 %v220_v25 }
  0x3d   :  { %463 = vmatpush1.msra.mxu0 %v2680_v17  ;;  %1984 = vmatprep.mubr.f32.mxu1 %v221_v28 }
  0x3e   :  { %1935 = vmatmul.mubr.f32.gmra.mxu0 %v49_v19  ;;  %464 = vmatprep.subr.mxu0 %v2692_v20 }
  0x3f   :  { %465 = vmatpush1.msra.mxu0 %v2698_v21  ;;  %500 = vmatprep.mubr.f32.mxu0 %v3533_v26 }
  0x40   :  { %466 = vmatprep.subr.mxu0 %v2704_v22  ;;  %1985 = vmatmul.mubr.f32.gmra.mxu1 %v222_v29 }
  0x41   :  { %467 = vmatpush1.msra.mxu0 %v2713_v24  ;;  %1987 = vmatprep.mubr.f32.mxu1 %v223_v33 }
  0x42   :  { %501 = vmatmul.mubr.f32.vlgmr.msra.gmra.mxu0 %v388_v27  ;;  %879 = vmatprep.subr.mxu0 %v2451_v31  ;;  %v1764_v27 = vld [vmem:[%s3528_s2 + $0x170] sm:$0xff] }
  0x43   :  { %880 = vmatpush1.msra.mxu0 %v2456_v32  ;;  %506 = vmatprep.mubr.f32.mxu0 %v3533_v26 }
  0x44   :  { %881 = vmatprep.subr.mxu0 %v2464_v34  ;;  %1988 = vmatmul.mubr.f32.gmra.mxu1 %v224_v35 }
  0x45   :  { %882 = vmatpush1.msra.mxu0 %v2473_v36  ;;  %1990 = vmatprep.mubr.f32.mxu1 %v225_v40 }
  0x46   :  { %507 = vmatmul.mubr.f32.gmra.mxu0 %v389_v30  ;;  %883 = vmatprep.subr.mxu0 %v2482_v38  ;;  %v1765_v30 = vld [vmem:[%s3528_s2 + $0x178] sm:$0xff] }
  0x47   :  { %512 = vmatprep.mubr.f32.mxu0 %v3533_v26  ;;  %884 = vmatpush1.msra.mxu0 %v2488_v39 }
  0x48   :  { %885 = vmatprep.subr.mxu0 %v2497_v41  ;;  %1991 = vmatmul.mubr.f32.gmra.mxu1 %v226_v42 }
  0x49   :  { %886 = vmatpush1.msra.mxu0 %v2506_v43  ;;  %1993 = vmatprep.subr.mxu1 %v3533_v26 }
  0x4a   :  { %513 = vmatmul.mubr.f32.gmra.mxu0 %v390_v37  ;;  %887 = vmatprep.subr.mxu0 %v2515_v45 }
  0x4b   :  { %518 = vmatprep.mubr.f32.mxu0 %v3533_v26  ;;  %888 = vmatpush1.msra.mxu0 %v2521_v46 }
  0x4c   :  { %889 = vmatprep.subr.mxu0 %v2530_v48  ;;  %2025 = vmatprep.mubr.msk.f32.mxu1 %vm2303_vm0, %v3533_v26 }
  0x4d   :  { %890 = vmatpush1.msra.mxu0 %v2539_v50 }
  0x4e   :  { %519 = vmatmul.mubr.f32.gmra.mxu0 %v391_v44  ;;  %891 = vmatprep.subr.mxu0 %v2548_v52 }
  0x4f   :  { %524 = vmatprep.mubr.f32.mxu0 %v3533_v26  ;;  %892 = vmatpush1.msra.mxu0 %v2554_v53 }
  0x50   :  { %893 = vmatprep.subr.mxu0 %v2563_v55 }
  0x51   :  { %894 = vmatpush1.msra.mxu0 %v2572_v57 }
  0x52   :  { %525 = vmatmul.mubr.f32.gmra.mxu0 %v392_v47  ;;  %895 = vmatprep.subr.mxu0 %v2584_v60 }
  0x53   :  { %530 = vmatprep.mubr.f32.mxu0 %v3533_v26  ;;  %896 = vmatpush1.msra.mxu0 %v2590_v61 }
  0x54   :  { %897 = vmatprep.subr.mxu0 %v2599_v63 }
  0x55   :  { %898 = vmatpush1.msra.mxu0 %v2608_v1 }
  0x56   :  { %531 = vmatmul.mubr.f32.gmra.mxu0 %v393_v49  ;;  %899 = vmatprep.subr.mxu0 %v2620_v4 }
  0x57   :  { %536 = vmatprep.mubr.f32.mxu0 %v3533_v26  ;;  %900 = vmatpush1.msra.mxu0 %v2626_v5 }
  0x58   :  { %901 = vmatprep.subr.mxu0 %v2635_v7 }
  0x59   :  { %902 = vmatpush1.msra.mxu0 %v2644_v9 }
  0x5a   :  { %537 = vmatmul.mubr.f32.gmra.mxu0 %v394_v51  ;;  %903 = vmatprep.subr.mxu0 %v2656_v12 }
  0x5b   :  { %542 = vmatprep.mubr.f32.mxu0 %v3533_v26  ;;  %904 = vmatpush1.msra.mxu0 %v2662_v13 }
  0x5c   :  { %905 = vmatprep.subr.mxu0 %v2671_v15 }
  0x5d   :  { %906 = vmatpush1.msra.mxu0 %v2680_v17 }
  0x5e   :  { %543 = vmatmul.mubr.f32.gmra.mxu0 %v395_v54  ;;  %907 = vmatprep.subr.mxu0 %v2692_v20 }
  0x5f   :  { %548 = vmatprep.mubr.f32.mxu0 %v3533_v26  ;;  %908 = vmatpush1.msra.mxu0 %v2698_v21 }
  0x60   :  { %909 = vmatprep.subr.mxu0 %v2704_v22 }
  0x61   :  { %910 = vmatpush1.msra.mxu0 %v2713_v24 }
  0x62   :  { %549 = vmatmul.mubr.f32.gmra.mxu0 %v396_v56  ;;  %1311 = vmatprep.subr.mxu0 %v2451_v31  ;;  %v399_v31 = vld [vmem:[%s3528_s2 + $0x58] sm:$0xff] }
  0x63   :  { %554 = vmatprep.mubr.f32.mxu0 %v3533_v26 }
  0x66   :  { %555 = vmatmul.mubr.f32.gmra.mxu0 %v397_v58 }
  0x67   :  { %560 = vmatprep.mubr.f32.mxu0 %v3533_v26 }
  0x6a   :  { %561 = vmatmul.mubr.f32.gmra.mxu0 %v398_v59 }
  0x6b   :  { %566 = vmatprep.mubr.f32.mxu0 %v3533_v26 }
  0x6e   :  { %567 = vmatmul.mubr.f32.gmra.mxu0 %v399_v31 }
  0x6f   :  { %572 = vmatprep.mubr.f32.mxu0 %v3533_v26 }
  0x72   :  { %573 = vmatmul.mubr.f32.gmra.mxu0 %v400_v62 }
  0x73   :  { %578 = vmatprep.mubr.f32.mxu0 %v3533_v26 }
  0x76   :  { %579 = vmatmul.mubr.f32.gmra.mxu0 %v401_v0 }
  0x77   :  { %584 = vmatprep.mubr.f32.mxu0 %v3533_v26 }
  0x7a   :  { %585 = vmatmul.mubr.f32.gmra.mxu0 %v402_v2 }
  0x7b   :  { %590 = vmatprep.mubr.f32.mxu0 %v3533_v26 }
  0x7e   :  { %591 = vmatmul.mubr.f32.gmra.mxu0 %v403_v3 }
  0x7f   :  { %943 = vmatprep.mubr.f32.mxu0 %v3533_v26 }
  0x82   :  { %944 = vmatmul.mubr.f32.vlgmr.msra.gmra.mxu0 %v1734_v6 }
  0x83   :  { %1312 = vmatpush1.msra.mxu0 %v2456_v32  ;;  %949 = vmatprep.mubr.f32.mxu0 %v3533_v26  ;;  %v1737_v32 = vld [vmem:[%s3528_s2 + $0x98] sm:$0xff] }
  0x84   :  { %1313 = vmatprep.subr.mxu0 %v2464_v34  ;;  %v1738_v34 = vld [vmem:[%s3528_s2 + $0xa0] sm:$0xff] }
  0x85   :  { %1314 = vmatpush1.msra.mxu0 %v2473_v36  ;;  %v1739_v36 = vld [vmem:[%s3528_s2 + $0xa8] sm:$0xff] }
  0x86   :  { %950 = vmatmul.mubr.f32.gmra.mxu0 %v1735_v8  ;;  %1315 = vmatprep.subr.mxu0 %v2482_v38  ;;  %v1740_v38 = vld [vmem:[%s3528_s2 + $0xb0] sm:$0xff] }
  0x87   :  { %955 = vmatprep.mubr.f32.mxu0 %v3533_v26  ;;  %1316 = vmatpush1.msra.mxu0 %v2488_v39  ;;  %v1741_v39 = vld [vmem:[%s3528_s2 + $0xb8] sm:$0xff] }
  0x88   :  { %1317 = vmatprep.subr.mxu0 %v2497_v41  ;;  %v1742_v41 = vld [vmem:[%s3528_s2 + $0xc0] sm:$0xff] }
  0x89   :  { %1318 = vmatpush1.msra.mxu0 %v2506_v43  ;;  %v1743_v43 = vld [vmem:[%s3528_s2 + $0xc8] sm:$0xff] }
  0x8a   :  { %956 = vmatmul.mubr.f32.gmra.mxu0 %v1736_v10  ;;  %1319 = vmatprep.subr.mxu0 %v2515_v45  ;;  %v1744_v45 = vld [vmem:[%s3528_s2 + $0xd0] sm:$0xff] }
  0x8b   :  { %961 = vmatprep.mubr.f32.mxu0 %v3533_v26  ;;  %1320 = vmatpush1.msra.mxu0 %v2521_v46  ;;  %v1745_v46 = vld [vmem:[%s3528_s2 + $0xd8] sm:$0xff] }
  0x8c   :  { %1321 = vmatprep.subr.mxu0 %v2530_v48  ;;  %v1746_v48 = vld [vmem:[%s3528_s2 + $0xe0] sm:$0xff] }
  0x8d   :  { %1322 = vmatpush1.msra.mxu0 %v2539_v50  ;;  %v1747_v50 = vld [vmem:[%s3528_s2 + $0xe8] sm:$0xff] }
  0x8e   :  { %962 = vmatmul.mubr.f32.gmra.mxu0 %v1737_v32  ;;  %1323 = vmatprep.subr.mxu0 %v2548_v52  ;;  %v1748_v52 = vld [vmem:[%s3528_s2 + $0xf0] sm:$0xff] }
  0x8f   :  { %967 = vmatprep.mubr.f32.mxu0 %v3533_v26  ;;  %1324 = vmatpush1.msra.mxu0 %v2554_v53  ;;  %v1749_v53 = vld [vmem:[%s3528_s2 + $0xf8] sm:$0xff] }
  0x90   :  { %1325 = vmatprep.subr.mxu0 %v2563_v55  ;;  %v1750_v55 = vld [vmem:[%s3528_s2 + $0x100] sm:$0xff] }
  0x91   :  { %1326 = vmatpush1.msra.mxu0 %v2572_v57  ;;  %v1751_v57 = vld [vmem:[%s3528_s2 + $0x108] sm:$0xff] }
  0x92   :  { %968 = vmatmul.mubr.f32.gmra.mxu0 %v1738_v34  ;;  %1327 = vmatprep.subr.mxu0 %v2584_v60  ;;  %v1752_v60 = vld [vmem:[%s3528_s2 + $0x110] sm:$0xff] }
  0x93   :  { %973 = vmatprep.mubr.f32.mxu0 %v3533_v26  ;;  %1328 = vmatpush1.msra.mxu0 %v2590_v61  ;;  %v1753_v61 = vld [vmem:[%s3528_s2 + $0x118] sm:$0xff] }
  0x94   :  { %1329 = vmatprep.subr.mxu0 %v2599_v63  ;;  %v1754_v63 = vld [vmem:[%s3528_s2 + $0x120] sm:$0xff] }
  0x95   :  { %1330 = vmatpush1.msra.mxu0 %v2608_v1  ;;  %v1755_v1 = vld [vmem:[%s3528_s2 + $0x128] sm:$0xff] }
  0x96   :  { %974 = vmatmul.mubr.f32.gmra.mxu0 %v1739_v36  ;;  %1331 = vmatprep.subr.mxu0 %v2620_v4  ;;  %v1756_v4 = vld [vmem:[%s3528_s2 + $0x130] sm:$0xff] }
  0x97   :  { %979 = vmatprep.mubr.f32.mxu0 %v3533_v26  ;;  %1332 = vmatpush1.msra.mxu0 %v2626_v5  ;;  %v1757_v5 = vld [vmem:[%s3528_s2 + $0x138] sm:$0xff] }
  0x98   :  { %1333 = vmatprep.subr.mxu0 %v2635_v7  ;;  %v1758_v7 = vld [vmem:[%s3528_s2 + $0x140] sm:$0xff] }
  0x99   :  { %1334 = vmatpush1.msra.mxu0 %v2644_v9 }
  0x9a   :  { %980 = vmatmul.mubr.f32.gmra.mxu0 %v1740_v38  ;;  %1335 = vmatprep.subr.mxu0 %v2656_v12 }
  0x9b   :  { %985 = vmatprep.mubr.f32.mxu0 %v3533_v26  ;;  %1336 = vmatpush1.msra.mxu0 %v2662_v13 }
  0x9c   :  { %1337 = vmatprep.subr.mxu0 %v2671_v15 }
  0x9d   :  { %1338 = vmatpush1.msra.mxu0 %v2680_v17  ;;  %v1761_v17 = vld [vmem:[%s3528_s2 + $0x158] sm:$0xff] }
  0x9e   :  { %986 = vmatmul.mubr.f32.gmra.mxu0 %v1741_v39  ;;  %1339 = vmatprep.subr.mxu0 %v2692_v20  ;;  %v1762_v20 = vld [vmem:[%s3528_s2 + $0x160] sm:$0xff] }
  0x9f   :  { %991 = vmatprep.mubr.f32.mxu0 %v3533_v26  ;;  %1340 = vmatpush1.msra.mxu0 %v2698_v21 }
  0xa0   :  { %1341 = vmatprep.subr.mxu0 %v2704_v22 }
  0xa1   :  { %1342 = vmatpush1.msra.mxu0 %v2713_v24 }
  0xa2   :  { %992 = vmatmul.mubr.f32.gmra.mxu0 %v1742_v41 }
  0xa3   :  { %997 = vmatprep.mubr.f32.mxu0 %v3533_v26 }
  0xa6   :  { %998 = vmatmul.mubr.f32.gmra.mxu0 %v1743_v43 }
  0xa7   :  { %1003 = vmatprep.mubr.f32.mxu0 %v3533_v26 }
  0xaa   :  { %1004 = vmatmul.mubr.f32.gmra.mxu0 %v1744_v45 }
  0xab   :  { %1009 = vmatprep.mubr.f32.mxu0 %v3533_v26 }
  0xae   :  { %1010 = vmatmul.mubr.f32.gmra.mxu0 %v1745_v46 }
  0xaf   :  { %1015 = vmatprep.mubr.f32.mxu0 %v3533_v26 }
  0xb2   :  { %1016 = vmatmul.mubr.f32.gmra.mxu0 %v1746_v48 }
  0xb3   :  { %1021 = vmatprep.mubr.f32.mxu0 %v3533_v26 }
  0xb6   :  { %1022 = vmatmul.mubr.f32.gmra.mxu0 %v1747_v50 }
  0xb7   :  { %1027 = vmatprep.mubr.f32.mxu0 %v3533_v26 }
  0xba   :  { %1028 = vmatmul.mubr.f32.gmra.mxu0 %v1748_v52 }
  0xbb   :  { %1033 = vmatprep.mubr.f32.mxu0 %v3533_v26 }
  0xbe   :  { %1034 = vmatmul.mubr.f32.gmra.mxu0 %v1749_v53 }
  0xbf   :  { %1375 = vmatprep.mubr.f32.mxu0 %v3533_v26 }
  0xc2   :  { %1376 = vmatmul.mubr.f32.vlgmr.msra.gmra.mxu0 %v1750_v55 }
  0xc3   :  { %1381 = vmatprep.mubr.f32.mxu0 %v3533_v26 }
  0xc6   :  { %1382 = vmatmul.mubr.f32.gmra.mxu0 %v1751_v57 }
  0xc7   :  { %1387 = vmatprep.mubr.f32.mxu0 %v3533_v26 }
  0xca   :  { %1388 = vmatmul.mubr.f32.gmra.mxu0 %v1752_v60 }
  0xcb   :  { %1393 = vmatprep.mubr.f32.mxu0 %v3533_v26 }
  0xce   :  { %1394 = vmatmul.mubr.f32.gmra.mxu0 %v1753_v61 }
  0xcf   :  { %1399 = vmatprep.mubr.f32.mxu0 %v3533_v26 }
  0xd2   :  { %1400 = vmatmul.mubr.f32.gmra.mxu0 %v1754_v63 }
  0xd3   :  { %1405 = vmatprep.mubr.f32.mxu0 %v3533_v26 }
  0xd6   :  { %1406 = vmatmul.mubr.f32.gmra.mxu0 %v1755_v1 }
  0xd7   :  { %1411 = vmatprep.mubr.f32.mxu0 %v3533_v26 }
  0xda   :  { %1412 = vmatmul.mubr.f32.gmra.mxu0 %v1756_v4 }
  0xdb   :  { %1417 = vmatprep.mubr.f32.mxu0 %v3533_v26 }
  0xde   :  { %1418 = vmatmul.mubr.f32.gmra.mxu0 %v1757_v5 }
  0xdf   :  { %1423 = vmatprep.mubr.f32.mxu0 %v3533_v26 }
  0xe2   :  { %v2968_v9 = vpop.f32.mrf.mxu0  ;;  %1424 = vmatmul.mubr.f32.gmra.mxu0 %v1758_v7 }
  0xe3   :  { %1429 = vmatprep.mubr.f32.mxu0 %v3533_v26 }
  0xe4   :  { %v2974_v12 = vpop.f32.mrf.mxu0 }
  0xe6   :  { %v2976_v13 = vpop.f32.mrf.mxu0  ;;  %1430 = vmatmul.mubr.f32.gmra.mxu0 %v1759_v11 }
  0xe7   :  { %3561 = vst [vmem:[#allocation3_spill] sm:$0xff] %v2976_v13  ;;  %1435 = vmatprep.mubr.f32.mxu0 %v3533_v26 }
  0xe8   :  { %v2982_v15 = vpop.f32.mrf.mxu0 }
  0xea   :  { %v2984_v16 = vpop.f32.mrf.mxu0  ;;  %1436 = vmatmul.mubr.f32.gmra.mxu0 %v1760_v14 }
  0xeb   :  { %3562 = vst [vmem:[#allocation4_spill] sm:$0xff] %v2984_v16  ;;  %1441 = vmatprep.mubr.f32.mxu0 %v3533_v26 }
  0xec   :  { %v2990_v18 = vpop.f32.mrf.mxu0  ;;  %v3026_v37 = vpop.f32.mrf.mxu1 }
  0xed   :  { %3563 = vst [vmem:[#allocation5_spill] sm:$0xff] %v2990_v18 }
  0xee   :  { %v2992_v19 = vpop.f32.mrf.mxu0  ;;  %1442 = vmatmul.mubr.f32.gmra.mxu0 %v1761_v17  ;;  %v3030_v44 = vpop.f32.mrf.mxu1 }
  0xef   :  { %1447 = vmatprep.mubr.f32.mxu0 %v3533_v26 }
  0xf0   :  { %v2998_v21 = vpop.f32.mrf.mxu0  ;;  %v3034_v58 = vpop.f32.mrf.mxu1 }
  0xf1   :  { %3564 = vst [vmem:[#allocation6_spill] sm:$0xff] %v2998_v21  ;;  %3566 = vst [vmem:[#allocation8_spill] sm:$0xff] %v3034_v58 }
  0xf2   :  { %v3000_v22 = vpop.f32.mrf.mxu0  ;;  %1448 = vmatmul.mubr.f32.gmra.mxu0 %v1762_v20  ;;  %v3038_v6 = vpop.f32.mrf.mxu1 }
  0xf3   :  { %1453 = vmatprep.mubr.f32.mxu0 %v3533_v26  ;;  %3567 = vst [vmem:[#allocation9_spill] sm:$0xff] %v3038_v6 }
  0xf4   :  { %v3006_v24 = vpop.f32.mrf.mxu0  ;;  %v3042_v39 = vpop.f32.mrf.mxu1 }
  0xf5   :  { %3565 = vst [vmem:[#allocation7_spill] sm:$0xff] %v3006_v24  ;;  %3568 = vst [vmem:[#allocation10_spill] sm:$0xff] %v3042_v39 }
  0xf6   :  { %v3008_v25 = vpop.f32.mrf.mxu0  ;;  %1454 = vmatmul.mubr.f32.gmra.mxu0 %v1763_v23  ;;  %v3046_v52 = vpop.f32.mrf.mxu1 }
  0xf7   :  { %1459 = vmatprep.mubr.f32.mxu0 %v3533_v26  ;;  %3569 = vst [vmem:[#allocation11_spill] sm:$0xff] %v3046_v52 }
  0xf8   :  { %v3014_v28 = vpop.f32.mrf.mxu0  ;;  %v3050_v14 = vpop.f32.mrf.mxu1 }
  0xfa   :  { %v3016_v29 = vpop.f32.mrf.mxu0  ;;  %1460 = vmatmul.mubr.f32.gmra.mxu0 %v1764_v27 }
  0xfb   :  { %1465 = vmatprep.mubr.f32.mxu0 %v3533_v26 }
  0xfc   :  { %v3022_v33 = vpop.f32.mrf.mxu0 }
  0xfe   :  { %v3024_v35 = vpop.f32.mrf.mxu0  ;;  %1466 = vmatmul.mubr.f32.gmra.mxu0 %v1765_v30 }
 0x100   :  { %v3028_v40 = vpop.f32.mrf.mxu0 }
 0x102   :  { %v502_v42 = vpop.f32.mrf.mxu0 }
 0x103   :  { %v597_v47 = vadd.f32 %v502_v42, %v2974_v12 }
 0x104   :  { %v504_v49 = vpop.f32.mrf.mxu0 }
 0x105   :  { %v613_v51 = vmul.f32 0.5, %v597_v47  ;;  %v677_v54 = vadd.f32 %v504_v49, %v3030_v44 }
 0x106   :  { %v508_v56 = vpop.f32.mrf.mxu0 }
 0x107   :  { %2102 = vtanh.f32 %v613_v51  ;;  %v693_v59 = vmul.f32 0.5, %v677_v54  ;;  %v598_v31 = vadd.f32 %v2968_v9, %v508_v56 }
 0x108   :  { %v510_v62 = vpop.f32.mrf.mxu0 }
 0x109   :  { %2104 = vtanh.f32 %v693_v59  ;;  %v614_v0 = vmul.f32 0.5, %v598_v31  ;;  %v678_v2 = vadd.f32 %v3026_v37, %v510_v62  ;;  %v3061_v62 = vpop.f32.mrf.mxu1 }
 0x10a   :  { %v514_v3 = vpop.f32.mrf.mxu0 }
 0x10b   :  { %2106 = vtanh.f32 %v614_v0  ;;  %v694_v8 = vmul.f32 0.5, %v678_v2  ;;  %v599_v10 = vadd.f32 %v514_v3, %v2982_v15 }
 0x10c   :  { %v516_v32 = vpop.f32.mrf.mxu0 }
 0x10d   :  { %2108 = vtanh.f32 %v694_v8  ;;  %v615_v34 = vmul.f32 0.5, %v599_v10  ;;  %v679_v36 = vadd.f32 %v516_v32, %v3038_v6 }
 0x10e   :  { %v520_v38 = vpop.f32.mrf.mxu0 }
 0x10f   :  { %2110 = vtanh.f32 %v615_v34  ;;  %v695_v41 = vmul.f32 0.5, %v679_v36  ;;  %v600_v43 = vadd.f32 %v2976_v13, %v520_v38 }
 0x110   :  { %v522_v45 = vpop.f32.mrf.mxu0 }
 0x111   :  { %2112 = vtanh.f32 %v695_v41  ;;  %v616_v46 = vmul.f32 0.5, %v600_v43  ;;  %v680_v48 = vadd.f32 %v3034_v58, %v522_v45 }
 0x112   :  { %v526_v50 = vpop.f32.mrf.mxu0 }
 0x113   :  { %2114 = vtanh.f32 %v616_v46  ;;  %v696_v53 = vmul.f32 0.5, %v680_v48  ;;  %v601_v55 = vadd.f32 %v526_v50, %v2990_v18 }
 0x114   :  { %v2103_v57 = vpop.eup %2102  ;;  %v528_v60 = vpop.f32.mrf.mxu0 }
 0x115   :  { %2116 = vtanh.f32 %v696_v53  ;;  %v617_v61 = vmul.f32 0.5, %v601_v55  ;;  %v681_v63 = vadd.f32 %v528_v60, %v3046_v52  ;;  %v645_v4 = vadd.f32 1.0, %v2103_v57 }
 0x116   :  { %v2105_v1 = vpop.eup %2104  ;;  %v532_v5 = vpop.f32.mrf.mxu0 }
 0x117   :  { %v725_v7 = vadd.f32 1.0, %v2105_v1  ;;  %2118 = vtanh.f32 %v617_v61  ;;  %v697_v11 = vmul.f32 0.5, %v681_v63  ;;  %v602_v20 = vadd.f32 %v2984_v16, %v532_v5 }
 0x118   :  { %v2107_v17 = vpop.eup %2106  ;;  %v534_v23 = vpop.f32.mrf.mxu0  ;;  %v3058_v47 = vmul.f32 0.5, %v645_v4 }
 0x119   :  { %v3053_v27 = vmul.f32 0.5, %v725_v7  ;;  %2120 = vtanh.f32 %v697_v11  ;;  %v682_v30 = vadd.f32 %v3042_v39, %v534_v23  ;;  %v646_v49 = vadd.f32 1.0, %v2107_v17  ;;  %v3078_v17 = vpop.f32.mrf.mxu1 }
 0x11a   :  { %v2109_v42 = vpop.eup %2108  ;;  %3571 = vst [vmem:[#allocation13_spill] sm:$0xff] %v3058_v47  ;;  %v618_v51 = vmul.f32 0.5, %v602_v20  ;;  %v538_v54 = vpop.f32.mrf.mxu0 }
 0x11b   :  { %3570 = vst [vmem:[#allocation12_spill] sm:$0xff] %v3053_v27  ;;  %v726_v56 = vadd.f32 1.0, %v2109_v42  ;;  %v698_v59 = vmul.f32 0.5, %v682_v30  ;;  %v603_v31 = vadd.f32 %v538_v54, %v2998_v21  ;;  %v3067_v34 = vmul.f32 0.5, %v646_v49 }
 0x11c   :  { %v2111_v0 = vpop.eup %2110  ;;  %2122 = vtanh.f32 %v618_v51  ;;  %v540_v2 = vpop.f32.mrf.mxu0 }
 0x11d   :  { %v3065_v8 = vmul.f32 0.5, %v726_v56  ;;  %2124 = vtanh.f32 %v698_v59  ;;  %v619_v10 = vmul.f32 0.5, %v603_v31  ;;  %3573 = vst [vmem:[#allocation15_spill] sm:$0xff] %v3067_v34  ;;  %v647_v36 = vadd.f32 1.0, %v2111_v0  ;;  %v3086_v59 = vpop.f32.mrf.mxu1 }
 0x11e   :  { %v2113_v32 = vpop.eup %2112  ;;  %v683_v38 = vadd.f32 %v540_v2, %v3061_v62  ;;  %v544_v41 = vpop.f32.mrf.mxu0 }
 0x11f   :  { %3572 = vst [vmem:[#allocation14_spill] sm:$0xff] %v3065_v8  ;;  %v727_v43 = vadd.f32 1.0, %v2113_v32  ;;  %2126 = vtanh.f32 %v619_v10  ;;  %v604_v45 = vadd.f32 %v2992_v19, %v544_v41  ;;  %v3076_v63 = vmul.f32 0.5, %v647_v36  ;;  %v3096_v41 = vpop.f32.mrf.mxu1 }
 0x120   :  { %v2115_v46 = vpop.eup %2114  ;;  %v699_v48 = vmul.f32 0.5, %v683_v38  ;;  %v546_v50 = vpop.f32.mrf.mxu0 }
 0x121   :  { %v3073_v55 = vmul.f32 0.5, %v727_v43  ;;  %v620_v57 = vmul.f32 0.5, %v604_v45  ;;  %v684_v60 = vadd.f32 %v3050_v14, %v546_v50  ;;  %3575 = vst [vmem:[#allocation17_spill] sm:$0xff] %v3076_v63  ;;  %v648_v1 = vadd.f32 1.0, %v2115_v46 }
 0x122   :  { %v2117_v61 = vpop.eup %2116  ;;  %2128 = vtanh.f32 %v699_v48  ;;  %v550_v4 = vpop.f32.mrf.mxu0 }
 0x123   :  { %3574 = vst [vmem:[#allocation16_spill] sm:$0xff] %v3073_v55  ;;  %v728_v5 = vadd.f32 1.0, %v2117_v61  ;;  %2130 = vtanh.f32 %v620_v57  ;;  %v700_v7 = vmul.f32 0.5, %v684_v60  ;;  %v3084_v49 = vmul.f32 0.5, %v648_v1  ;;  %v3108_v1 = vpop.f32.mrf.mxu1 }
 0x124   :  { %v2119_v11 = vpop.eup %2118  ;;  %v552_v20 = vpop.f32.mrf.mxu0 }
 0x125   :  { %v3082_v30 = vmul.f32 0.5, %v728_v5  ;;  %2132 = vtanh.f32 %v700_v7  ;;  %3577 = vst [vmem:[#allocation19_spill] sm:$0xff] %v3084_v49  ;;  %v649_v51 = vadd.f32 1.0, %v2119_v11 }
 0x126   :  { %v2121_v42 = vpop.eup %2120  ;;  %v556_v54 = vpop.f32.mrf.mxu0 }
 0x127   :  { %3576 = vst [vmem:[#allocation18_spill] sm:$0xff] %v3082_v30  ;;  %v729_v56 = vadd.f32 1.0, %v2121_v42  ;;  %v3094_v36 = vmul.f32 0.5, %v649_v51  ;;  %v606_v47 = vadd.f32 %v3000_v22, %v556_v54 }
 0x128   :  { %v3088_v31 = vpop.f32.mrf.mxu0 }
 0x129   :  { %v2123_v2 = vpop.eup %2122  ;;  %v3092_v10 = vmul.f32 0.5, %v729_v56  ;;  %3579 = vst [vmem:[#allocation21_spill] sm:$0xff] %v3094_v36  ;;  %v622_v63 = vmul.f32 0.5, %v606_v47 }
 0x12a   :  { %v2125_v32 = vpop.eup %2124  ;;  %v650_v38 = vadd.f32 1.0, %v2123_v2  ;;  %v3098_v43 = vpop.f32.mrf.mxu0 }
 0x12b   :  { %3578 = vst [vmem:[#allocation20_spill] sm:$0xff] %v3092_v10  ;;  %v730_v45 = vadd.f32 1.0, %v2125_v32  ;;  %v3114_v2 = vpop.f32.mrf.mxu1 }
 0x12c   :  { %v2127_v46 = vpop.eup %2126  ;;  %v3100_v48 = vpop.f32.mrf.mxu0  ;;  %v3104_v57 = vmul.f32 0.5, %v650_v38 }
 0x12d   :  { %v3106_v60 = vmul.f32 0.5, %v730_v45  ;;  %v651_v61 = vadd.f32 1.0, %v2127_v46  ;;  %v3120_v23 = vpop.f32.mrf.mxu1 }
 0x12e   :  { %v3110_v5 = vpop.f32.mrf.mxu0 }
 0x12f   :  { %v2129_v7 = vpop.eup %2128  ;;  %v3116_v38 = vmul.f32 0.5, %v651_v61  ;;  %v3128_v27 = vpop.f32.mrf.mxu1  ;;  %v605_v61 = vadd.f32 %v550_v4, %v3006_v24 }
 0x130   :  { %v2131_v42 = vpop.eup %2130  ;;  %v731_v51 = vadd.f32 1.0, %v2129_v7  ;;  %v570_v56 = vpop.f32.mrf.mxu0 }
 0x131   :  { %v652_v32 = vadd.f32 1.0, %v2131_v42 }
 0x132   :  { %v2133_v3 = vpop.eup %2132  ;;  %v3118_v45 = vmul.f32 0.5, %v731_v51  ;;  %v574_v46 = vpop.f32.mrf.mxu0 }
 0x133   :  { %v732_v53 = vadd.f32 1.0, %v2133_v3  ;;  %v3124_v11 = vmul.f32 0.5, %v652_v32  ;;  %v685_v3 = vadd.f32 %v552_v20, %v3086_v59  ;;  %v3136_v32 = vpop.f32.mrf.mxu1 }
 0x134   :  { %v576_v0 = vpop.f32.mrf.mxu0 }
 0x135   :  { %v3126_v7 = vmul.f32 0.5, %v732_v53  ;;  %v621_v53 = vmul.f32 0.5, %v605_v61  ;;  %v701_v34 = vmul.f32 0.5, %v685_v3  ;;  %v689_v47 = vadd.f32 %v576_v0, %v3120_v23 }
 0x136   :  { %v580_v26 = vpop.f32.mrf.mxu0 }
 0x137   :  { %v610_v8 = vadd.f32 %v3016_v29, %v580_v26  ;;  %2134 = vtanh.f32 %v621_v53  ;;  %v688_v53 = vadd.f32 %v3096_v41, %v570_v56  ;;  %v686_v56 = vadd.f32 %v3078_v17, %v3088_v31 }
 0x138   :  { %v582_v51 = vpop.f32.mrf.mxu0  ;;  %2136 = vtanh.f32 %v701_v34 }
 0x139   :  { %v626_v4 = vmul.f32 0.5, %v610_v8  ;;  %v690_v20 = vadd.f32 %v3114_v2, %v582_v51  ;;  %2138 = vtanh.f32 %v622_v63 }
 0x13a   :  { %v586_v50 = vpop.f32.mrf.mxu0 }
 0x13b   :  { %v611_v49 = vadd.f32 %v586_v50, %v3028_v40  ;;  %2140 = vtanh.f32 %v626_v4  ;;  %v706_v3 = vmul.f32 0.5, %v690_v20  ;;  %v704_v4 = vmul.f32 0.5, %v688_v53 }
 0x13c   :  { %v588_v55 = vpop.f32.mrf.mxu0 }
 0x13d   :  { %v691_v30 = vadd.f32 %v588_v55, %v3136_v32  ;;  %v627_v55 = vmul.f32 0.5, %v611_v49 }
 0x13e   :  { %v592_v42 = vpop.f32.mrf.mxu0 }
 0x13f   :  { %v612_v54 = vadd.f32 %v3024_v35, %v592_v42  ;;  %v707_v26 = vmul.f32 0.5, %v691_v30  ;;  %v609_v30 = vadd.f32 %v574_v46, %v3022_v33 }
 0x140   :  { %v594_v10 = vpop.f32.mrf.mxu0 }
 0x141   :  { %v628_v36 = vmul.f32 0.5, %v612_v54  ;;  %v692_v61 = vadd.f32 %v3128_v27, %v594_v10  ;;  %v705_v10 = vmul.f32 0.5, %v689_v47  ;;  %v625_v54 = vmul.f32 0.5, %v609_v30 }
 0x142   :  { %v945_v8 = vpop.f32.mrf.mxu0 }
 0x143   :  { %2142 = vtanh.f32 %v628_v36  ;;  %v708_v50 = vmul.f32 0.5, %v692_v61  ;;  %v1040_v42 = vadd.f32 %v945_v8, %v2974_v12 }
 0x144   :  { %2144 = vtanh.f32 %v707_v26  ;;  %v947_v34 = vpop.f32.mrf.mxu0  ;;  %v608_v26 = vadd.f32 %v3008_v25, %v3110_v5  ;;  %v3157_v31 = vpop.eup %2134 }
 0x145   :  { %2146 = vtanh.f32 %v708_v50  ;;  %v1120_v63 = vadd.f32 %v947_v34, %v3030_v44  ;;  %v1056_v0 = vmul.f32 0.5, %v1040_v42  ;;  %v3159_v42 = vpop.eup %2136 }
 0x146   :  { %2148 = vtanh.f32 %v627_v55  ;;  %v951_v51 = vpop.f32.mrf.mxu0  ;;  %v687_v55 = vadd.f32 %v3100_v48, %v3108_v1  ;;  %v3162_v30 = vpop.eup %2138  ;;  %v607_v48 = vadd.f32 %v3098_v43, %v3014_v28 }
 0x147   :  { %2150 = vtanh.f32 %v706_v3  ;;  %v1136_v49 = vmul.f32 0.5, %v1120_v63  ;;  %v1041_v36 = vadd.f32 %v2968_v9, %v951_v51  ;;  %v702_v3 = vmul.f32 0.5, %v686_v56 }
 0x148   :  { %2152 = vtanh.f32 %v1056_v0  ;;  %v953_v20 = vpop.f32.mrf.mxu0  ;;  %v624_v63 = vmul.f32 0.5, %v608_v26  ;;  %v2141_v0 = vpop.eup %2140  ;;  %v703_v51 = vmul.f32 0.5, %v687_v55 }
 0x149   :  { %2154 = vtanh.f32 %v1136_v49  ;;  %v1057_v46 = vmul.f32 0.5, %v1041_v36  ;;  %v1121_v61 = vadd.f32 %v3026_v37, %v953_v20 }
 0x14a   :  { %2156 = vtanh.f32 %v705_v10  ;;  %v957_v47 = vpop.f32.mrf.mxu0 }
 0x14b   :  { %2158 = vtanh.f32 %v1057_v46  ;;  %v1042_v8 = vadd.f32 %v957_v47, %v2982_v15  ;;  %v1137_v50 = vmul.f32 0.5, %v1121_v61  ;;  %v623_v61 = vmul.f32 0.5, %v607_v48 }
 0x14c   :  { %2160 = vtanh.f32 %v704_v4  ;;  %v959_v53 = vpop.f32.mrf.mxu0 }
 0x14d   :  { %2162 = vtanh.f32 %v625_v54  ;;  %v1058_v5 = vmul.f32 0.5, %v1042_v8  ;;  %v1122_v34 = vadd.f32 %v959_v53, %v3038_v6 }
 0x14e   :  { %2164 = vtanh.f32 %v1137_v50  ;;  %v963_v10 = vpop.f32.mrf.mxu0 }
 0x14f   :  { %2166 = vtanh.f32 %v1058_v5  ;;  %v1138_v49 = vmul.f32 0.5, %v1122_v34  ;;  %v1043_v56 = vadd.f32 %v2976_v13, %v963_v10  ;;  %v14_v10 = vstv %s3529_s8 }
 0x150   :  { %v2143_v36 = vpop.eup %2142  ;;  %2168 = vtanh.f32 %v702_v3  ;;  %v965_v4 = vpop.f32.mrf.mxu0  ;;  %15 = vst [vmem:[#allocation2] sm:$0x1] %v14_v10  ;;  %v658_v13 = vadd.f32 1.0, %v2141_v0 }
 0x151   :  { %v2145_v20 = vpop.eup %2144  ;;  %2170 = vtanh.f32 %v1138_v49  ;;  %v1123_v54 = vadd.f32 %v3034_v58, %v965_v4  ;;  %v660_v43 = vadd.f32 1.0, %v2143_v36  ;;  %v1059_v26 = vmul.f32 0.5, %v1043_v56 }
 0x152   :  { %v2147_v46 = vpop.eup %2146  ;;  %2172 = vtanh.f32 %v624_v63  ;;  %v969_v47 = vpop.f32.mrf.mxu0  ;;  %v739_v5 = vadd.f32 1.0, %v2145_v20 }
 0x153   :  { %v2149_v8 = vpop.eup %2148  ;;  %2174 = vtanh.f32 %v703_v51  ;;  %v740_v55 = vadd.f32 1.0, %v2147_v46  ;;  %v1139_v50 = vmul.f32 0.5, %v1123_v54  ;;  %v1044_v53 = vadd.f32 %v969_v47, %v2990_v18 }
 0x154   :  { %v2151_v3 = vpop.eup %2150  ;;  %2176 = vtanh.f32 %v1059_v26  ;;  %v971_v34 = vpop.f32.mrf.mxu0  ;;  %v659_v56 = vadd.f32 1.0, %v2149_v8  ;;  %v676_v4 = vmul.f32 0.5, %v660_v43 }
 0x155   :  { %v2153_v49 = vpop.eup %2152  ;;  %v756_v48 = vmul.f32 0.5, %v740_v55  ;;  %2178 = vtanh.f32 %v1139_v50  ;;  %v1060_v63 = vmul.f32 0.5, %v1044_v53  ;;  %v1124_v36 = vadd.f32 %v971_v34, %v3046_v52 }
 0x156   :  { %v2155_v51 = vpop.eup %2154  ;;  %2180 = vtanh.f32 %v623_v61  ;;  %v1088_v54 = vadd.f32 1.0, %v2153_v49  ;;  %v975_v46 = vpop.f32.mrf.mxu0  ;;  %v738_v55 = vadd.f32 1.0, %v2151_v3  ;;  %v755_v50 = vmul.f32 0.5, %v739_v5 }
 0x157   :  { %v2157_v20 = vpop.eup %2156  ;;  %v1168_v26 = vadd.f32 1.0, %v2155_v51  ;;  %2182 = vtanh.f32 %v1060_v63  ;;  %v1140_v47 = vmul.f32 0.5, %v1124_v36  ;;  %v1045_v18 = vadd.f32 %v2984_v16, %v975_v46 }
 0x158   :  { %v2159_v58 = vpop.eup %2158  ;;  %v977_v53 = vpop.f32.mrf.mxu0  ;;  %v773_v6 = vsub.f32 %v676_v4, %v756_v48  ;;  %v3174_v10 = vmul.f32 0.5, %v1088_v54  ;;  %v675_v49 = vmul.f32 0.5, %v659_v56  ;;  %v737_v0 = vadd.f32 1.0, %v2157_v20 }
 0x159   :  { %v2161_v34 = vpop.eup %2160  ;;  %v3176_v61 = vmul.f32 0.5, %v1168_v26  ;;  %2184 = vtanh.f32 %v1140_v47  ;;  %v1061_v43 = vmul.f32 0.5, %v1045_v18  ;;  %v1089_v51 = vadd.f32 1.0, %v2159_v58 }
 0x15a   :  { %3580 = vst [vmem:[#allocation22_spill] sm:$0xff] %v3174_v10  ;;  %v2163_v8 = vpop.eup %2162  ;;  %v1125_v63 = vadd.f32 %v3042_v39, %v977_v53  ;;  %1994 = vmatpush3.xpose.msra.mxu1 %v773_v6  ;;  %v981_v36 = vpop.f32.mrf.mxu0  ;;  %v3582_v5 = vmov 0.0   ;;  %v2304_v4 = vmov 0   ;;  %v754_v54 = vmul.f32 0.5, %v738_v55  ;;  %v774_v6 = vld [vmem:[#allocation2] sm:$0x1] }
 0x15b   :  { %3581 = vst [vmem:[#allocation23_spill] sm:$0xff] %v3176_v61  ;;  %v2165_v46 = vpop.eup %2164  ;;  %2186 = vtanh.f32 %v1061_v43  ;;  %v1046_v3 = vadd.f32 %v981_v36, %v2998_v21  ;;  %1995 = vmatprep.subr.mxu1 %v3582_v5  ;;  %2101 = vset.pattern.permute.xlu0 %v2304_v4  ;;  %v772_v47 = vsub.f32 %v675_v49, %v755_v50  ;;  %v657_v39 = vadd.f32 1.0, %v2163_v8 }
 0x15c   :  { %v2167_v18 = vpop.eup %2166  ;;  %v1169_v56 = vadd.f32 1.0, %v2165_v46  ;;  %v1141_v58 = vmul.f32 0.5, %v1125_v63  ;;  %v983_v26 = vpop.f32.mrf.mxu0  ;;  %777 = vperm.xlu0 %2101, %v774_v6   ;;  %v674_v16 = vmul.f32 0.5, %v658_v13  ;;  %v3184_v52 = vmul.f32 0.5, %v1089_v51 }
 0x15d   :  { %v2169_v53 = vpop.eup %2168  ;;  %v1090_v20 = vadd.f32 1.0, %v2167_v18  ;;  %v1062_v43 = vmul.f32 0.5, %v1046_v3  ;;  %v1126_v36 = vadd.f32 %v983_v26, %v3061_v62  ;;  %v736_v46 = vadd.f32 1.0, %v2161_v34 }
 0x15e   :  { %v2171_v21 = vpop.eup %2170  ;;  %3583 = vst [vmem:[#allocation24_spill] sm:$0xff] %v3184_v52  ;;  %v3186_v48 = vmul.f32 0.5, %v1169_v56  ;;  %2188 = vtanh.f32 %v1141_v58  ;;  %1996 = vmatpush3.xpose.msra.mxu1 %v772_v47  ;;  %v987_v55 = vpop.f32.mrf.mxu0  ;;  %v753_v3 = vmul.f32 0.5, %v737_v0  ;;  %v771_v13 = vsub.f32 %v674_v16, %v754_v54 }
 0x15f   :  { %v2173_v63 = vpop.eup %2172  ;;  %v1170_v50 = vadd.f32 1.0, %v2171_v21  ;;  %2190 = vtanh.f32 %v1062_v43  ;;  %v1142_v49 = vmul.f32 0.5, %v1126_v36  ;;  %1997 = vmatprep.subr.mxu1 %v3582_v5  ;;  %v1047_v4 = vadd.f32 %v2992_v19, %v987_v55 }
 0x160   :  { %3584 = vst [vmem:[#allocation25_spill] sm:$0xff] %v3186_v48  ;;  %v2175_v8 = vpop.eup %2174  ;;  %v989_v18 = vpop.f32.mrf.mxu0  ;;  %v3192_v58 = vmul.f32 0.5, %v1090_v20  ;;  %v656_v47 = vadd.f32 1.0, %v2173_v63  ;;  %v673_v6 = vmul.f32 0.5, %v657_v39  ;;  %v752_v51 = vmul.f32 0.5, %v736_v46 }
 0x161   :  { %v2177_v56 = vpop.eup %2176  ;;  %v3194_v26 = vmul.f32 0.5, %v1170_v50  ;;  %2192 = vtanh.f32 %v1142_v49  ;;  %v1127_v21 = vadd.f32 %v3050_v14, %v989_v18  ;;  %v1063_v0 = vmul.f32 0.5, %v1047_v4 }
 0x162   :  { %v2179_v34 = vpop.eup %2178  ;;  %v1091_v43 = vadd.f32 1.0, %v2177_v56  ;;  %1998 = vmatpush3.xpose.msra.mxu1 %v771_v13  ;;  %v3197_v36 = vpop.f32.mrf.mxu0  ;;  %v735_v49 = vadd.f32 1.0, %v2175_v8  ;;  %v770_v39 = vsub.f32 %v673_v6, %v753_v3  ;;  %v672_v56 = vmul.f32 0.5, %v656_v47 }
 0x163   :  { %3585 = vst [vmem:[#allocation26_spill] sm:$0xff] %v3194_v26  ;;  %v2181_v16 = vpop.eup %2180  ;;  %v1171_v54 = vadd.f32 1.0, %v2179_v34  ;;  %v1143_v55 = vmul.f32 0.5, %v1127_v21  ;;  %1999 = vmatprep.subr.mxu1 %v3582_v5  ;;  %2194 = vtanh.f32 %v1063_v0  ;;  %v734_v8 = vadd.f32 1.0, %v2169_v53 }
 0x164   :  { %v2183_v50 = vpop.eup %2182  ;;  %v3202_v18 = vpop.f32.mrf.mxu0  ;;  %v655_v13 = vadd.f32 1.0, %v2181_v16  ;;  %v3206_v34 = vmul.f32 0.5, %v1091_v43  ;;  %v751_v0 = vmul.f32 0.5, %v735_v49  ;;  %v769_v3 = vsub.f32 %v672_v56, %v752_v51 }
 0x165   :  { %v3204_v63 = vmul.f32 0.5, %v1171_v54  ;;  %2196 = vtanh.f32 %v1143_v55  ;;  %v1092_v21 = vadd.f32 1.0, %v2183_v50  ;;  %v654_v47 = vadd.f32 1.0, %v3162_v30 }
 0x166   :  { %v2185_v4 = vpop.eup %2184  ;;  %2000 = vmatpush3.xpose.msra.mxu1 %v770_v39  ;;  %v3208_v61 = vpop.f32.mrf.mxu0  ;;  %v671_v43 = vmul.f32 0.5, %v655_v13  ;;  %v733_v53 = vadd.f32 1.0, %v3159_v42  ;;  %v750_v49 = vmul.f32 0.5, %v734_v8 }
 0x167   :  { %v1172_v20 = vadd.f32 1.0, %v2185_v4  ;;  %2001 = vmatprep.subr.mxu1 %v3582_v5  ;;  %v3218_v54 = vmul.f32 0.5, %v1092_v21 }
 0x168   :  { %v2187_v46 = vpop.eup %2186  ;;  %v3211_v10 = vpop.f32.mrf.mxu0  ;;  %v749_v8 = vmul.f32 0.5, %v733_v53 }
 0x169   :  { %v3215_v16 = vmul.f32 0.5, %v1172_v20  ;;  %v1093_v55 = vadd.f32 1.0, %v2187_v46  ;;  %v768_v20 = vsub.f32 %v671_v43, %v751_v0  ;;  %v653_v46 = vadd.f32 1.0, %v3157_v31 }
 0x16a   :  { %2002 = vmatpush3.xpose.msra.mxu1 %v769_v3  ;;  %v3220_v50 = vpop.f32.mrf.mxu0  ;;  %v670_v3 = vmul.f32 0.5, %v654_v47 }
 0x16b   :  { %v2189_v39 = vpop.eup %2188  ;;  %2003 = vmatprep.subr.mxu1 %v3582_v5  ;;  %v3229_v6 = vmul.f32 0.5, %v1093_v55  ;;  %v669_v55 = vmul.f32 0.5, %v653_v46 }
 0x16c   :  { %v2191_v51 = vpop.eup %2190  ;;  %v1173_v4 = vadd.f32 1.0, %v2189_v39  ;;  %v3224_v56 = vpop.f32.mrf.mxu0  ;;  %v767_v0 = vsub.f32 %v670_v3, %v750_v49 }
 0x16d   :  { %v1094_v13 = vadd.f32 1.0, %v2191_v51  ;;  %v766_v3 = vsub.f32 %v669_v55, %v749_v8  ;;  %v3586_v55 = vsub.f32 %v3124_v11, %v3126_v7 }
 0x16e   :  { %v2193_v21 = vpop.eup %2192  ;;  %v3231_v48 = vmul.f32 0.5, %v1173_v4  ;;  %2004 = vmatpush3.xpose.msra.mxu1 %v768_v20  ;;  %v1011_v42 = vpop.f32.mrf.mxu0 }
 0x16f   :  { %v1174_v52 = vadd.f32 1.0, %v2193_v21  ;;  %2005 = vmatprep.subr.mxu1 %v3582_v5  ;;  %v3238_v30 = vmul.f32 0.5, %v1094_v13  ;;  %v1048_v13 = vadd.f32 %v3197_v36, %v3006_v24  ;;  %v1051_v8 = vadd.f32 %v3008_v25, %v1011_v42 }
 0x170   :  { %v3234_v39 = vpop.f32.mrf.mxu0  ;;  %v2195_v51 = vpop.eup %2194  ;;  %v3587_v42 = vsub.f32 %v3116_v38, %v3118_v45  ;;  %v3588_v45 = vsub.f32 %v3104_v57, %v3106_v60  ;;  %v3589_v60 = vld [vmem:[#allocation21_spill] sm:$0xff] }
 0x171   :  { %v3240_v31 = vmul.f32 0.5, %v1174_v52  ;;  %v1095_v4 = vadd.f32 1.0, %v2195_v51  ;;  %v1067_v53 = vmul.f32 0.5, %v1051_v8 }
 0x172   :  { %v2197_v47 = vpop.eup %2196  ;;  %2006 = vmatpush3.xpose.msra.mxu1 %v767_v0  ;;  %v1017_v20 = vpop.f32.mrf.mxu0  ;;  %v1128_v0 = vadd.f32 %v3202_v18, %v3086_v59 }
 0x173   :  { %v1175_v21 = vadd.f32 1.0, %v2197_v47  ;;  %2007 = vmatprep.subr.mxu1 %v3582_v5  ;;  %v3245_v26 = vmul.f32 0.5, %v1095_v4 }
 0x174   :  { %v1019_v49 = vpop.f32.mrf.mxu0  ;;  %v1144_v36 = vmul.f32 0.5, %v1128_v0 }
 0x175   :  { %v3247_v43 = vmul.f32 0.5, %v1175_v21  ;;  %v1132_v47 = vadd.f32 %v1019_v49, %v3120_v23  ;;  %v1064_v21 = vmul.f32 0.5, %v1048_v13 }
 0x176   :  { %2008 = vmatpush3.xpose.msra.mxu1 %v766_v3  ;;  %v1023_v52 = vpop.f32.mrf.mxu0 }
 0x177   :  { %2009 = vmatprep.subr.mxu1 %v3582_v5  ;;  %v1148_v24 = vmul.f32 0.5, %v1132_v47  ;;  %2198 = vtanh.f32 %v1064_v21  ;;  %v1053_v8 = vadd.f32 %v3016_v29, %v1023_v52 }
 0x178   :  { %v1025_v51 = vpop.f32.mrf.mxu0  ;;  %2200 = vtanh.f32 %v1144_v36 }
 0x179   :  { %v1133_v7 = vadd.f32 %v3114_v2, %v1025_v51  ;;  %2202 = vtanh.f32 %v1067_v53  ;;  %v1049_v53 = vadd.f32 %v3000_v22, %v3208_v61  ;;  %v1069_v51 = vmul.f32 0.5, %v1053_v8 }
 0x17a   :  { %2010 = vmatpush3.xpose.msra.mxu1 %v3586_v55  ;;  %v1029_v4 = vpop.f32.mrf.mxu0  ;;  %2204 = vtanh.f32 %v1148_v24 }
 0x17b   :  { %2011 = vmatprep.subr.mxu1 %v3582_v5  ;;  %v1054_v18 = vadd.f32 %v1029_v4, %v3028_v40  ;;  %v1149_v52 = vmul.f32 0.5, %v1133_v7 }
 0x17c   :  { %v1031_v3 = vpop.f32.mrf.mxu0 }
 0x17d   :  { %v1134_v46 = vadd.f32 %v1031_v3, %v3136_v32  ;;  %v1070_v38 = vmul.f32 0.5, %v1054_v18  ;;  %v1052_v3 = vadd.f32 %v1017_v20, %v3022_v33  ;;  %v3590_v18 = vld [vmem:[#allocation20_spill] sm:$0xff] }
 0x17e   :  { %2012 = vmatpush3.xpose.msra.mxu1 %v3587_v42  ;;  %v1035_v49 = vpop.f32.mrf.mxu0  ;;  %v3591_v42 = vsub.f32 %v3589_v60, %v3590_v18  ;;  %v3597_v60 = vld [vmem:[#allocation16_spill] sm:$0xff] }
 0x17f   :  { %v1055_v11 = vadd.f32 %v3024_v35, %v1035_v49  ;;  %2013 = vmatprep.subr.mxu1 %v3582_v5  ;;  %v1150_v13 = vmul.f32 0.5, %v1134_v46  ;;  %v1131_v49 = vadd.f32 %v3096_v41, %v3234_v39  ;;  %v1068_v8 = vmul.f32 0.5, %v1052_v3  ;;  %v3593_v39 = vld [vmem:[#allocation18_spill] sm:$0xff] }
 0x180   :  { %v1037_v0 = vpop.f32.mrf.mxu0 }
 0x181   :  { %v1071_v47 = vmul.f32 0.5, %v1055_v11  ;;  %v1135_v55 = vadd.f32 %v3128_v27, %v1037_v0  ;;  %v1065_v11 = vmul.f32 0.5, %v1049_v53  ;;  %v1130_v0 = vadd.f32 %v3224_v56, %v3108_v1 }
 0x182   :  { %2014 = vmatpush3.xpose.msra.mxu1 %v3588_v45  ;;  %v1377_v4 = vpop.f32.mrf.mxu0  ;;  %v1050_v53 = vadd.f32 %v3220_v50, %v3014_v28 }
 0x183   :  { %2206 = vtanh.f32 %v1071_v47  ;;  %v1151_v21 = vmul.f32 0.5, %v1135_v55  ;;  %v1472_v36 = vadd.f32 %v1377_v4, %v2974_v12  ;;  %2015 = vmatprep.subr.mxu1 %v3582_v5  ;;  %v3592_v47 = vld [vmem:[#allocation19_spill] sm:$0xff] }
 0x184   :  { %2208 = vtanh.f32 %v1150_v13  ;;  %v1379_v46 = vpop.f32.mrf.mxu0  ;;  %v3594_v55 = vsub.f32 %v3592_v47, %v3593_v39  ;;  %v3295_v4 = vpop.eup %2198  ;;  %v3601_v39 = vld [vmem:[#allocation15_spill] sm:$0xff] }
 0x185   :  { %2210 = vtanh.f32 %v1151_v21  ;;  %v1488_v24 = vmul.f32 0.5, %v1472_v36  ;;  %v1552_v57 = vadd.f32 %v1379_v46, %v3030_v44  ;;  %v3300_v36 = vpop.eup %2200 }
 0x186   :  { %2212 = vtanh.f32 %v1070_v38  ;;  %2016 = vmatpush3.xpose.msra.mxu1 %v3591_v42  ;;  %v1383_v12 = vpop.f32.mrf.mxu0  ;;  %v1147_v38 = vmul.f32 0.5, %v1131_v49 }
 0x187   :  { %2214 = vtanh.f32 %v1488_v24  ;;  %v1473_v61 = vadd.f32 %v2968_v9, %v1383_v12  ;;  %2017 = vmatprep.subr.mxu1 %v3582_v5  ;;  %v1568_v7 = vmul.f32 0.5, %v1552_v57  ;;  %v1146_v24 = vmul.f32 0.5, %v1130_v0  ;;  %v3596_v57 = vld [vmem:[#allocation17_spill] sm:$0xff]  ;;  %v3599_v12 = vld [vmem:[#allocation3_spill] sm:$0xff] }
 0x188   :  { %2216 = vtanh.f32 %v1149_v52  ;;  %v1385_v20 = vpop.f32.mrf.mxu0  ;;  %v3595_v52 = vld [vmem:[#allocation9_spill] sm:$0xff]  ;;  %v3598_v18 = vsub.f32 %v3596_v57, %v3597_v60 }
 0x189   :  { %2218 = vtanh.f32 %v1069_v51  ;;  %v1489_v13 = vmul.f32 0.5, %v1473_v61  ;;  %v1553_v44 = vadd.f32 %v3026_v37, %v1385_v20  ;;  %v1129_v37 = vadd.f32 %v3078_v17, %v3211_v10  ;;  %v2203_v51 = vpop.eup %2202 }
 0x18a   :  { %2220 = vtanh.f32 %v1568_v7  ;;  %2018 = vmatpush3.xpose.msra.mxu1 %v3594_v55  ;;  %v1389_v9 = vpop.f32.mrf.mxu0  ;;  %v3308_v42 = vpop.eup %2204  ;;  %v1066_v20 = vmul.f32 0.5, %v1050_v53  ;;  %v3602_v55 = vld [vmem:[#allocation14_spill] sm:$0xff] }
 0x18b   :  { %2222 = vtanh.f32 %v1489_v13  ;;  %v1569_v45 = vmul.f32 0.5, %v1553_v44  ;;  %2019 = vmatprep.subr.mxu1 %v3582_v5  ;;  %v1474_v56 = vadd.f32 %v1389_v9, %v2982_v15  ;;  %v1145_v61 = vmul.f32 0.5, %v1129_v37  ;;  %v3604_v37 = vld [vmem:[#allocation5_spill] sm:$0xff] }
 0x18c   :  { %2224 = vtanh.f32 %v1065_v11  ;;  %v1391_v21 = vpop.f32.mrf.mxu0  ;;  %v3603_v9 = vsub.f32 %v3601_v39, %v3602_v55  ;;  %v3609_v39 = vld [vmem:[#allocation4_spill] sm:$0xff] }
 0x18d   :  { %2226 = vtanh.f32 %v1569_v45  ;;  %v1554_v46 = vadd.f32 %v1391_v21, %v3595_v52  ;;  %v1490_v3 = vmul.f32 0.5, %v1474_v56 }
 0x18e   :  { %2228 = vtanh.f32 %v1068_v8  ;;  %2020 = vmatpush3.xpose.msra.mxu1 %v3598_v18  ;;  %v1395_v10 = vpop.f32.mrf.mxu0  ;;  %v3600_v8 = vld [vmem:[#allocation8_spill] sm:$0xff]  ;;  %v3605_v18 = vld [vmem:[#allocation11_spill] sm:$0xff] }
 0x18f   :  { %2230 = vtanh.f32 %v1147_v38  ;;  %v1570_v15 = vmul.f32 0.5, %v1554_v46  ;;  %v1475_v49 = vadd.f32 %v3599_v12, %v1395_v10  ;;  %2021 = vmatprep.subr.mxu1 %v3582_v5 }
 0x190   :  { %v2207_v50 = vpop.eup %2206  ;;  %2232 = vtanh.f32 %v1490_v3  ;;  %v1397_v11 = vpop.f32.mrf.mxu0 }
 0x191   :  { %v2209_v7 = vpop.eup %2208  ;;  %2234 = vtanh.f32 %v1570_v15  ;;  %v1491_v13 = vmul.f32 0.5, %v1475_v49  ;;  %v1103_v0 = vadd.f32 1.0, %v2207_v50  ;;  %v1555_v47 = vadd.f32 %v3600_v8, %v1397_v11  ;;  %v3606_v11 = vld [vmem:[#allocation13_spill] sm:$0xff] }
 0x192   :  { %v2211_v44 = vpop.eup %2210  ;;  %2236 = vtanh.f32 %v1146_v24  ;;  %2022 = vmatpush3.xpose.msra.mxu1 %v3603_v9  ;;  %v1401_v38 = vpop.f32.mrf.mxu0  ;;  %v1182_v52 = vadd.f32 1.0, %v2209_v7 }
 0x193   :  { %v2213_v45 = vpop.eup %2212  ;;  %v1183_v56 = vadd.f32 1.0, %v2211_v44  ;;  %2238 = vtanh.f32 %v1491_v13  ;;  %v1476_v21 = vadd.f32 %v1401_v38, %v3604_v37  ;;  %2023 = vmatprep.subr.mxu1 %v3582_v5  ;;  %v1571_v46 = vmul.f32 0.5, %v1555_v47  ;;  %v3607_v13 = vld [vmem:[#allocation12_spill] sm:$0xff] }
 0x194   :  { %v2215_v53 = vpop.eup %2214  ;;  %2240 = vtanh.f32 %v1145_v61  ;;  %v1403_v24 = vpop.f32.mrf.mxu0  ;;  %v1102_v12 = vadd.f32 1.0, %v2213_v45  ;;  %v1119_v49 = vmul.f32 0.5, %v1103_v0  ;;  %v3608_v44 = vsub.f32 %v3606_v11, %v3607_v13  ;;  %v3325_v61 = vld [vmem:[%s3530_s7] sm:$0x1] }
 0x195   :  { %v2217_v3 = vpop.eup %2216  ;;  %2242 = vtanh.f32 %v1066_v20  ;;  %v1199_v57 = vmul.f32 0.5, %v1183_v56  ;;  %v1492_v60 = vmul.f32 0.5, %v1476_v21  ;;  %v1556_v10 = vadd.f32 %v1403_v24, %v3605_v18 }
 0x196   :  { %v2219_v15 = vpop.eup %2218  ;;  %v1520_v50 = vadd.f32 1.0, %v2215_v53  ;;  %2244 = vtanh.f32 %v1571_v46  ;;  %2024 = vmatpush3.xpose.msra.mxu1 %v3608_v44  ;;  %v1407_v8 = vpop.f32.mrf.mxu0  ;;  %v3327_v20 = vadd.f32 1.0, %v2203_v51  ;;  %v1181_v9 = vadd.f32 1.0, %v2217_v3  ;;  %v3610_v51 = vld [vmem:[#allocation10_spill] sm:$0xff] }
 0x197   :  { %v2221_v7 = vpop.eup %2220  ;;  %2246 = vtanh.f32 %v1492_v60  ;;  %v1572_v47 = vmul.f32 0.5, %v1556_v10  ;;  %v1477_v55 = vadd.f32 %v3609_v39, %v1407_v8  ;;  %2028 = vmatprep.subr.mxu1 %v3582_v5  ;;  %v1198_v38 = vmul.f32 0.5, %v1182_v52 }
 0x198   :  { %v2223_v0 = vpop.eup %2222  ;;  %v1600_v45 = vadd.f32 1.0, %v2221_v7  ;;  %v1409_v56 = vpop.f32.mrf.mxu0  ;;  %v1215_v37 = vsub.f32 %v1119_v49, %v1199_v57  ;;  %v1101_v18 = vadd.f32 1.0, %v2219_v15  ;;  %v1118_v10 = vmul.f32 0.5, %v1102_v12  ;;  %v3613_v12 = vld [vmem:[#allocation6_spill] sm:$0xff] }
 0x199   :  { %v3331_v21 = vpop.eup %2224  ;;  %v1521_v53 = vadd.f32 1.0, %v2223_v0  ;;  %2248 = vtanh.f32 %v1572_v47  ;;  %v1493_v46 = vmul.f32 0.5, %v1477_v55  ;;  %2026 = vmatmul.mubr.f32.vlgmr.msra.gmra.mxu1 %v3325_v61  ;;  %v1557_v24 = vadd.f32 %v3610_v51, %v1409_v56 }
 0x19a   :  { %v2227_v60 = vpop.eup %2226  ;;  %v3335_v11 = vmul.f32 0.5, %v1520_v50  ;;  %v3337_v13 = vmul.f32 0.5, %v1600_v45  ;;  %2029 = vmatpush3.xpose.msra.mxu1 %v1215_v37  ;;  %v1413_v52 = vpop.f32.mrf.mxu0  ;;  %2060 = vmatprep.mubr.msk.f32.mxu1 %vm2303_vm0, %v3582_v5  ;;  %v1180_v57 = vadd.f32 1.0, %v3308_v42  ;;  %v1197_v15 = vmul.f32 0.5, %v1181_v9 }
 0x19b   :  { %v2229_v3 = vpop.eup %2228  ;;  %v1601_v49 = vadd.f32 1.0, %v2227_v60  ;;  %2250 = vtanh.f32 %v1493_v46  ;;  %v1573_v44 = vmul.f32 0.5, %v1557_v24  ;;  %2030 = vmatprep.subr.mxu1 %v3582_v5  ;;  %v1478_v50 = vadd.f32 %v1413_v52, %v3613_v12 }
 0x19c   :  { %3611 = vst [vmem:[#allocation21_spill] sm:$0xff] %v3335_v11  ;;  %3612 = vst [vmem:[#allocation20_spill] sm:$0xff] %v3337_v13  ;;  %v2231_v8 = vpop.eup %2230  ;;  %v1415_v7 = vpop.f32.mrf.mxu0  ;;  %v1214_v47 = vsub.f32 %v1118_v10, %v1198_v38  ;;  %v3346_v0 = vmul.f32 0.5, %v1521_v53  ;;  %v1100_v37 = vadd.f32 1.0, %v2229_v3  ;;  %v1117_v46 = vmul.f32 0.5, %v1101_v18 }
 0x19d   :  { %v2233_v55 = vpop.eup %2232  ;;  %v3348_v45 = vmul.f32 0.5, %v1601_v49  ;;  %2252 = vtanh.f32 %v1573_v44  ;;  %v1558_v42 = vadd.f32 %v1415_v7, %v3061_v62  ;;  %v1494_v9 = vmul.f32 0.5, %v1478_v50 }
 0x19e   :  { %v2235_v56 = vpop.eup %2234  ;;  %v1522_v51 = vadd.f32 1.0, %v2233_v55  ;;  %2031 = vmatpush3.xpose.msra.mxu1 %v1214_v47  ;;  %v1419_v24 = vpop.f32.mrf.mxu0  ;;  %v1179_v44 = vadd.f32 1.0, %v2231_v8  ;;  %v1196_v62 = vmul.f32 0.5, %v1180_v57  ;;  %v1213_v18 = vsub.f32 %v1117_v46, %v1197_v15 }
 0x19f   :  { %v2237_v60 = vpop.eup %2236  ;;  %v1602_v38 = vadd.f32 1.0, %v2235_v56  ;;  %v1574_v10 = vmul.f32 0.5, %v1558_v42  ;;  %v1479_v52 = vadd.f32 %v2992_v19, %v1419_v24  ;;  %2032 = vmatprep.subr.mxu1 %v3582_v5  ;;  %2254 = vtanh.f32 %v1494_v9 }
 0x1a0   :  { %v2239_v49 = vpop.eup %2238  ;;  %v1421_v3 = vpop.f32.mrf.mxu0  ;;  %v3355_v50 = vmul.f32 0.5, %v1522_v51  ;;  %v1116_v19 = vmul.f32 0.5, %v1100_v37  ;;  %v1178_v57 = vadd.f32 1.0, %v2237_v60  ;;  %v1195_v51 = vmul.f32 0.5, %v1179_v44 }
 0x1a1   :  { %v2241_v12 = vpop.eup %2240  ;;  %v3357_v7 = vmul.f32 0.5, %v1602_v38  ;;  %2256 = vtanh.f32 %v1574_v10  ;;  %v1495_v47 = vmul.f32 0.5, %v1479_v52  ;;  %v1523_v42 = vadd.f32 1.0, %v2239_v49 }
 0x1a2   :  { %v2243_v55 = vpop.eup %2242  ;;  %v1559_v56 = vadd.f32 %v3050_v14, %v1421_v3  ;;  %2033 = vmatpush3.xpose.msra.mxu1 %v1213_v18  ;;  %v3360_v24 = vpop.f32.mrf.mxu0  ;;  %v1212_v37 = vsub.f32 %v1116_v19, %v1196_v62  ;;  %v1115_v14 = vmul.f32 0.5, %v3327_v20 }
 0x1a3   :  { %v2245_v8 = vpop.eup %2244  ;;  %2258 = vtanh.f32 %v1495_v47  ;;  %2034 = vmatprep.subr.mxu1 %v3582_v5  ;;  %v1098_v52 = vadd.f32 1.0, %v2243_v55  ;;  %v3368_v3 = vmul.f32 0.5, %v1523_v42 }
 0x1a4   :  { %v2247_v46 = vpop.eup %2246  ;;  %v1603_v9 = vadd.f32 1.0, %v2245_v8  ;;  %v1575_v38 = vmul.f32 0.5, %v1559_v56  ;;  %v3365_v10 = vpop.f32.mrf.mxu0  ;;  %v1177_v56 = vadd.f32 1.0, %v2241_v12  ;;  %v1194_v8 = vmul.f32 0.5, %v1178_v57 }
 0x1a5   :  { %v1524_v18 = vadd.f32 1.0, %v2247_v46  ;;  %v1211_v55 = vsub.f32 %v1115_v14, %v1195_v51  ;;  %v1097_v46 = vadd.f32 1.0, %v3331_v21  ;;  %v1176_v57 = vadd.f32 1.0, %v3300_v36 }
 0x1a6   :  { %v2249_v49 = vpop.eup %2248  ;;  %v3370_v60 = vmul.f32 0.5, %v1603_v9  ;;  %2260 = vtanh.f32 %v1575_v38  ;;  %2035 = vmatpush3.xpose.msra.mxu1 %v1212_v37  ;;  %v3372_v47 = vpop.f32.mrf.mxu0  ;;  %v1114_v9 = vmul.f32 0.5, %v1098_v52  ;;  %v1193_v51 = vmul.f32 0.5, %v1177_v56 }
 0x1a7   :  { %v1604_v39 = vadd.f32 1.0, %v2249_v49  ;;  %2036 = vmatprep.subr.mxu1 %v3582_v5  ;;  %v3382_v38 = vmul.f32 0.5, %v1524_v18 }
 0x1a8   :  { %v2251_v44 = vpop.eup %2250  ;;  %v3375_v62 = vpop.f32.mrf.mxu0 }
 0x1a9   :  { %v3379_v19 = vmul.f32 0.5, %v1604_v39  ;;  %v1525_v37 = vadd.f32 1.0, %v2251_v44  ;;  %v1210_v39 = vsub.f32 %v1114_v9, %v1194_v8  ;;  %v1096_v44 = vadd.f32 1.0, %v3295_v4 }
 0x1aa   :  { %v2253_v42 = vpop.eup %2252  ;;  %2037 = vmatpush3.xpose.msra.mxu1 %v1211_v55  ;;  %v3384_v49 = vpop.f32.mrf.mxu0  ;;  %v1113_v55 = vmul.f32 0.5, %v1097_v46  ;;  %v1192_v8 = vmul.f32 0.5, %v1176_v57 }
 0x1ab   :  { %v1605_v12 = vadd.f32 1.0, %v2253_v42  ;;  %2038 = vmatprep.subr.mxu1 %v3582_v5  ;;  %v3395_v15 = vmul.f32 0.5, %v1525_v37  ;;  %v1112_v4 = vmul.f32 0.5, %v1096_v44 }
 0x1ac   :  { %v3388_v14 = vpop.f32.mrf.mxu0  ;;  %v2255_v21 = vpop.eup %2254  ;;  %v1209_v13 = vsub.f32 %v1113_v55, %v1193_v51 }
 0x1ad   :  { %v3392_v52 = vmul.f32 0.5, %v1605_v12  ;;  %v1526_v42 = vadd.f32 1.0, %v2255_v21  ;;  %v1208_v51 = vsub.f32 %v1112_v4, %v1192_v8 }
 0x1ae   :  { %v2257_v18 = vpop.eup %2256  ;;  %2039 = vmatpush3.xpose.msra.mxu1 %v1210_v39  ;;  %v1443_v20 = vpop.f32.mrf.mxu0 }
 0x1af   :  { %v1606_v36 = vadd.f32 1.0, %v2257_v18  ;;  %2040 = vmatprep.subr.mxu1 %v3582_v5  ;;  %v3400_v53 = vmul.f32 0.5, %v1526_v42 }
 0x1b0   :  { %v2259_v56 = vpop.eup %2258  ;;  %v1445_v9 = vpop.f32.mrf.mxu0 }
 0x1b1   :  { %v3402_v11 = vmul.f32 0.5, %v1606_v36  ;;  %v1527_v46 = vadd.f32 1.0, %v2259_v56  ;;  %v3614_v36 = vsub.f32 %v3245_v26, %v3247_v43 }
 0x1b2   :  { %2041 = vmatpush3.xpose.msra.mxu1 %v1209_v13  ;;  %v1449_v37 = vpop.f32.mrf.mxu0 }
 0x1b3   :  { %v2261_v39 = vpop.eup %2260  ;;  %2042 = vmatprep.subr.mxu1 %v3582_v5  ;;  %v3407_v55 = vmul.f32 0.5, %v1527_v46 }
 0x1b4   :  { %v1607_v57 = vadd.f32 1.0, %v2261_v39  ;;  %v1451_v18 = vpop.f32.mrf.mxu0  ;;  %v3615_v39 = vsub.f32 %v3238_v30, %v3240_v31 }
 0x1b6   :  { %v3409_v12 = vmul.f32 0.5, %v1607_v57  ;;  %2043 = vmatpush3.xpose.msra.mxu1 %v1208_v51  ;;  %v1455_v42 = vpop.f32.mrf.mxu0 }
 0x1b7   :  { %2044 = vmatprep.subr.mxu1 %v3582_v5 }
 0x1b8   :  { %v1457_v44 = vpop.f32.mrf.mxu0 }
 0x1b9   :  { %v1565_v26 = vadd.f32 %v3114_v2, %v1457_v44  ;;  %v1484_v2 = vadd.f32 %v1449_v37, %v3022_v33  ;;  %v1562_v33 = vadd.f32 %v3388_v14, %v3108_v1 }
 0x1ba   :  { %2045 = vmatpush3.xpose.msra.mxu1 %v3614_v36  ;;  %v1461_v56 = vpop.f32.mrf.mxu0 }
 0x1bb   :  { %2046 = vmatprep.subr.mxu1 %v3582_v5  ;;  %v1486_v4 = vadd.f32 %v1461_v56, %v3028_v40  ;;  %v1485_v40 = vadd.f32 %v3016_v29, %v1455_v42  ;;  %v1581_v31 = vmul.f32 0.5, %v1565_v26  ;;  %v3617_v29 = vsub.f32 %v3218_v54, %v3215_v16  ;;  %v3622_v42 = vld [vmem:[#allocation25_spill] sm:$0xff] }
 0x1bc   :  { %v1463_v8 = vpop.f32.mrf.mxu0 }
 0x1bd   :  { %v1566_v46 = vadd.f32 %v1463_v8, %v3136_v32  ;;  %v1502_v56 = vmul.f32 0.5, %v1486_v4  ;;  %v3616_v32 = vsub.f32 %v3229_v6, %v3231_v48  ;;  %v1501_v44 = vmul.f32 0.5, %v1485_v40 }
 0x1be   :  { %2047 = vmatpush3.xpose.msra.mxu1 %v3615_v39  ;;  %v1467_v57 = vpop.f32.mrf.mxu0  ;;  %v1483_v6 = vadd.f32 %v3008_v25, %v1443_v20  ;;  %v3619_v25 = vld [vmem:[#allocation26_spill] sm:$0xff] }
 0x1bf   :  { %v1487_v51 = vadd.f32 %v3024_v35, %v1467_v57  ;;  %2048 = vmatprep.subr.mxu1 %v3582_v5  ;;  %v1582_v43 = vmul.f32 0.5, %v1566_v46  ;;  %v1564_v35 = vadd.f32 %v1451_v18, %v3120_v23  ;;  %v1500_v23 = vmul.f32 0.5, %v1484_v2  ;;  %v3621_v18 = vld [vmem:[#allocation24_spill] sm:$0xff] }
 0x1c0   :  { %v1469_v36 = vpop.f32.mrf.mxu0  ;;  %v1499_v54 = vmul.f32 0.5, %v1483_v6  ;;  %v3620_v20 = vsub.f32 %v3192_v58, %v3619_v25  ;;  %v3623_v58 = vsub.f32 %v3621_v18, %v3622_v42 }
 0x1c1   :  { %v1503_v21 = vmul.f32 0.5, %v1487_v51  ;;  %v1567_v13 = vadd.f32 %v3128_v27, %v1469_v36  ;;  %v1563_v27 = vadd.f32 %v3096_v41, %v1445_v9  ;;  %v1580_v48 = vmul.f32 0.5, %v1564_v35  ;;  %v3626_v36 = vld [vmem:[#allocation23_spill] sm:$0xff] }
 0x1c2   :  { %2049 = vmatpush3.xpose.msra.mxu1 %v3616_v32  ;;  %v1482_v41 = vadd.f32 %v3384_v49, %v3014_v28  ;;  %v1578_v9 = vmul.f32 0.5, %v1562_v33  ;;  %v1481_v28 = vadd.f32 %v3000_v22, %v3372_v47  ;;  %v3624_v22 = vld [vmem:[#allocation7_spill] sm:$0xff] }
 0x1c3   :  { %2262 = vtanh.f32 %v1503_v21  ;;  %v1583_v30 = vmul.f32 0.5, %v1567_v13  ;;  %2050 = vmatprep.subr.mxu1 %v3582_v5  ;;  %v3618_v21 = vsub.f32 %v3206_v34, %v3204_v63  ;;  %v1579_v16 = vmul.f32 0.5, %v1563_v27 }
 0x1c4   :  { %2264 = vtanh.f32 %v1582_v43  ;;  %v1561_v34 = vadd.f32 %v3078_v17, %v3375_v62  ;;  %v1498_v49 = vmul.f32 0.5, %v1482_v41  ;;  %v1560_v17 = vadd.f32 %v3365_v10, %v3086_v59  ;;  %v3625_v43 = vld [vmem:[#allocation22_spill] sm:$0xff] }
 0x1c5   :  { %2266 = vtanh.f32 %v1583_v30  ;;  %v1480_v47 = vadd.f32 %v3360_v24, %v3624_v22  ;;  %v1497_v51 = vmul.f32 0.5, %v1481_v28  ;;  %v3627_v40 = vsub.f32 %v3625_v43, %v3626_v36 }
 0x1c6   :  { %2268 = vtanh.f32 %v1502_v56  ;;  %2051 = vmatpush3.xpose.msra.mxu1 %v3617_v29  ;;  %v1577_v62 = vmul.f32 0.5, %v1561_v34  ;;  %v1576_v10 = vmul.f32 0.5, %v1560_v17 }
 0x1c7   :  { %2052 = vmatprep.subr.mxu1 %v3582_v5  ;;  %2270 = vtanh.f32 %v1581_v31  ;;  %v1496_v31 = vmul.f32 0.5, %v1480_v47 }
 0x1c8   :  { %2272 = vtanh.f32 %v1501_v44 }
 0x1c9   :  { %2274 = vtanh.f32 %v1580_v48 }
 0x1ca   :  { %2053 = vmatpush3.xpose.msra.mxu1 %v3618_v21  ;;  %2276 = vtanh.f32 %v1500_v23 }
 0x1cb   :  { %2054 = vmatprep.subr.mxu1 %v3582_v5  ;;  %2278 = vtanh.f32 %v1579_v16 }
 0x1cc   :  { %2280 = vtanh.f32 %v1499_v54 }
 0x1cd   :  { %2282 = vtanh.f32 %v1578_v9 }
 0x1ce   :  { %2055 = vmatpush3.xpose.msra.mxu1 %v3620_v20  ;;  %2284 = vtanh.f32 %v1498_v49 }
 0x1cf   :  { %2056 = vmatprep.subr.mxu1 %v3582_v5  ;;  %2286 = vtanh.f32 %v1577_v62 }
 0x1d0   :  { %v2263_v63 = vpop.eup %2262  ;;  %2288 = vtanh.f32 %v1497_v51 }
 0x1d1   :  { %v2265_v1 = vpop.eup %2264  ;;  %v1535_v14 = vadd.f32 1.0, %v2263_v63  ;;  %2290 = vtanh.f32 %v1576_v10  ;;  %v3631_v10 = vsub.f32 %v3382_v38, %v3379_v19  ;;  %v3636_v19 = vld [vmem:[#allocation20_spill] sm:$0xff] }
 0x1d2   :  { %v2267_v37 = vpop.eup %2266  ;;  %2057 = vmatpush3.xpose.msra.mxu1 %v3623_v58  ;;  %v1614_v4 = vadd.f32 1.0, %v2265_v1  ;;  %2292 = vtanh.f32 %v1496_v31 }
 0x1d3   :  { %v2269_v13 = vpop.eup %2268  ;;  %v1615_v8 = vadd.f32 1.0, %v2267_v37  ;;  %2058 = vmatprep.subr.mxu1 %v3582_v5  ;;  %v1551_v39 = vmul.f32 0.5, %v1535_v14 }
 0x1d4   :  { %v2271_v46 = vpop.eup %2270  ;;  %v1534_v26 = vadd.f32 1.0, %v2269_v13  ;;  %v1630_v30 = vmul.f32 0.5, %v1614_v4 }
 0x1d5   :  { %v1631_v57 = vmul.f32 0.5, %v1615_v8  ;;  %v2273_v56 = vpop.eup %2272  ;;  %v1613_v32 = vadd.f32 1.0, %v2271_v46 }
 0x1d6   :  { %2059 = vmatpush3.xpose.msra.mxu1 %v3627_v40  ;;  %v2275_v35 = vpop.eup %2274  ;;  %v1533_v24 = vadd.f32 1.0, %v2273_v56  ;;  %v1550_v2 = vmul.f32 0.5, %v1534_v26  ;;  %v3628_v40 = vsub.f32 %v3407_v55, %v3409_v12  ;;  %v3629_v56 = vsub.f32 %v3400_v53, %v3402_v11 }
 0x1d7   :  { %2063 = vmatprep.subr.mxu1 %v3582_v5  ;;  %v1647_v59 = vsub.f32 %v1551_v39, %v1631_v57  ;;  %v2277_v44 = vpop.eup %2276  ;;  %v1612_v29 = vadd.f32 1.0, %v2275_v35  ;;  %v1629_v27 = vmul.f32 0.5, %v1613_v32  ;;  %v3632_v12 = vsub.f32 %v3368_v3, %v3370_v60 }
 0x1d8   :  { %v1646_v48 = vsub.f32 %v1550_v2, %v1630_v30  ;;  %v2279_v6 = vpop.eup %2278  ;;  %v1532_v23 = vadd.f32 1.0, %v2277_v44  ;;  %v1549_v21 = vmul.f32 0.5, %v1533_v24  ;;  %v3633_v11 = vsub.f32 %v3355_v50, %v3357_v7  ;;  %v778_v30 = vpop.permute.xlu0 %777 }
 0x1d9   :  { %2061 = vmatmul.mubr.f32.vlgmr.msra.gmra.mxu1 %v3325_v61  ;;  %v2281_v33 = vpop.eup %2280  ;;  %v1611_v16 = vadd.f32 1.0, %v2279_v6  ;;  %v1628_v41 = vmul.f32 0.5, %v1612_v29  ;;  %v3634_v53 = vsub.f32 %v3346_v0, %v3348_v45  ;;  %v780_v50 = vlaneseq  ;;  %v1718_v29 = vld [vmem:[%s3531_s3 + $0x2] sm:$0x1] }
 0x1da   :  { %2064 = vmatpush3.xpose.msra.mxu1 %v1647_v59  ;;  %2095 = vmatprep.mubr.msk.f32.mxu1 %vm2303_vm0, %v3582_v5  ;;  %v1645_v54 = vsub.f32 %v1549_v21, %v1629_v27  ;;  %v2283_v25 = vpop.eup %2282  ;;  %v1531_v20 = vadd.f32 1.0, %v2281_v33  ;;  %v1548_v63 = vmul.f32 0.5, %v1532_v23  ;;  %v3630_v59 = vsub.f32 %v3395_v15, %v3392_v52  ;;  %v3635_v15 = vld [vmem:[#allocation21_spill] sm:$0xff] }
 0x1db   :  { %2065 = vmatprep.subr.mxu1 %v3582_v5  ;;  %v2285_v34 = vpop.eup %2284  ;;  %v1610_v9 = vadd.f32 1.0, %v2283_v25  ;;  %v1627_v1 = vmul.f32 0.5, %v1611_v16  ;;  %v3637_v38 = vsub.f32 %v3635_v15, %v3636_v19  ;;  %v781_v7 = vshrl.u32 %v780_v50, 7 }
 0x1dc   :  { %v1644_v14 = vsub.f32 %v1548_v63, %v1628_v41  ;;  %v2287_v37 = vpop.eup %2286  ;;  %v1530_v28 = vadd.f32 1.0, %v2285_v34  ;;  %v1547_v49 = vmul.f32 0.5, %v1531_v20 }
 0x1dd   :  { %v2289_v18 = vpop.eup %2288  ;;  %v1609_v42 = vadd.f32 1.0, %v2287_v37  ;;  %v1626_v58 = vmul.f32 0.5, %v1610_v9  ;;  %v782_v32 = vsub.s32 0, %v781_v7 }
 0x1de   :  { %2066 = vmatpush3.xpose.msra.mxu1 %v1646_v48  ;;  %v1643_v13 = vsub.f32 %v1547_v49, %v1627_v1  ;;  %v2291_v8 = vpop.eup %2290  ;;  %v1529_v17 = vadd.f32 1.0, %v2289_v18  ;;  %v1546_v62 = vmul.f32 0.5, %v1530_v28 }
 0x1df   :  { %2067 = vmatprep.subr.mxu1 %v3582_v5  ;;  %v2293_v4 = vpop.eup %2292  ;;  %v1608_v46 = vadd.f32 1.0, %v2291_v8  ;;  %v1625_v39 = vmul.f32 0.5, %v1609_v42  ;;  %v783_v35 = vrot.slane %v778_v30, %v782_v32 }
 0x1e0   :  { %v1642_v57 = vsub.f32 %v1546_v62, %v1626_v58  ;;  %v1528_v22 = vadd.f32 1.0, %v2293_v4  ;;  %v1545_v47 = vmul.f32 0.5, %v1529_v17 }
 0x1e1   :  { %v1624_v51 = vmul.f32 0.5, %v1608_v46 }
 0x1e2   :  { %2068 = vmatpush3.xpose.msra.mxu1 %v1645_v54  ;;  %v1641_v26 = vsub.f32 %v1545_v47, %v1625_v39  ;;  %v1544_v43 = vmul.f32 0.5, %v1528_v22 }
 0x1e3   :  { %2069 = vmatprep.subr.mxu1 %v3582_v5 }
 0x1e4   :  { %v1640_v36 = vsub.f32 %v1544_v43, %v1624_v51 }
 0x1e6   :  { %2070 = vmatpush3.xpose.msra.mxu1 %v1644_v14 }
 0x1e7   :  { %2071 = vmatprep.subr.mxu1 %v3582_v5 }
 0x1ea   :  { %2072 = vmatpush3.xpose.msra.mxu1 %v1643_v13 }
 0x1eb   :  { %2073 = vmatprep.subr.mxu1 %v3582_v5 }
 0x1ee   :  { %2074 = vmatpush3.xpose.msra.mxu1 %v1642_v57 }
 0x1ef   :  { %2075 = vmatprep.subr.mxu1 %v3582_v5 }
 0x1f2   :  { %2076 = vmatpush3.xpose.msra.mxu1 %v1641_v26 }
 0x1f3   :  { %2077 = vmatprep.subr.mxu1 %v3582_v5 }
 0x1f6   :  { %2078 = vmatpush3.xpose.msra.mxu1 %v1640_v36 }
 0x1f7   :  { %2079 = vmatprep.subr.mxu1 %v3582_v5 }
 0x1fa   :  { %2080 = vmatpush3.xpose.msra.mxu1 %v3628_v40 }
 0x1fb   :  { %2081 = vmatprep.subr.mxu1 %v3582_v5 }
 0x1fe   :  { %2082 = vmatpush3.xpose.msra.mxu1 %v3629_v56 }
 0x1ff   :  { %2083 = vmatprep.subr.mxu1 %v3582_v5 }
 0x202   :  { %2084 = vmatpush3.xpose.msra.mxu1 %v3630_v59 }
 0x203   :  { %2085 = vmatprep.subr.mxu1 %v3582_v5 }
 0x206   :  { %2086 = vmatpush3.xpose.msra.mxu1 %v3631_v10 }
 0x207   :  { %2087 = vmatprep.subr.mxu1 %v3582_v5 }
 0x20a   :  { %2088 = vmatpush3.xpose.msra.mxu1 %v3632_v12 }
 0x20b   :  { %2089 = vmatprep.subr.mxu1 %v3582_v5 }
 0x20e   :  { %2090 = vmatpush3.xpose.msra.mxu1 %v3633_v11 }
 0x20f   :  { %2091 = vmatprep.subr.mxu1 %v3582_v5 }
 0x212   :  { %2092 = vmatpush3.xpose.msra.mxu1 %v3634_v53 }
 0x213   :  { %2093 = vmatprep.subr.mxu1 %v3582_v5  ;;  %v854_v5 = vld [vmem:[%s3531_s3] sm:$0x1] }
 0x216   :  { %2094 = vmatpush3.xpose.msra.mxu1 %v3637_v38 }
 0x219   :  { %2096 = vmatmul.mubr.f32.vlgmr.msra.gmra.mxu1 %v3325_v61  ;;  %v1286_v61 = vld [vmem:[%s3531_s3 + $0x1] sm:$0x1] }
 0x21a   :  { %v1293_v2 = vadd.f32 %v1286_v61, %v854_v5 }
 0x21c   :  { %v1725_v23 = vadd.f32 %v1718_v29, %v1293_v2 }
 0x21e   :  { %v1726_v21 = vmax.f32 %v1725_v23, 1.0 }
 0x259   :  { %v850_v3 = vpop.f32.mrf.mxu1 }
 0x25a   :  { %v851_v0 = vadd.f32 %v850_v3, %v783_v35 }
 0x25b   :  { %v2027_v60 = vpop.f32.mrf.mxu1 }
 0x25c   :  { %v855_v24 = vmul.f32 0.5, %v851_v0 }
 0x299   :  { %v1282_v52 = vpop.f32.mrf.mxu1 }
 0x29a   :  { %v1283_v31 = vadd.f32 %v1282_v52, %v783_v35 }
 0x29b   :  { %v2062_v55 = vpop.f32.mrf.mxu1 }
 0x29c   :  { %v1287_v45 = vmul.f32 0.5, %v1283_v31 }
 0x29e   :  { %2294 = vtanh.f32 %v1287_v45 }
 0x29f   :  { %2296 = vtanh.f32 %v855_v24 }
 0x2ab   :  { %v2295_v33 = vpop.eup %2294 }
 0x2ac   :  { %v2297_v16 = vpop.eup %2296  ;;  %v1289_v41 = vadd.f32 1.0, %v2295_v33 }
 0x2ad   :  { %v857_v54 = vadd.f32 1.0, %v2297_v16 }
 0x2ae   :  { %v1290_v25 = vmul.f32 0.5, %v1289_v41 }
 0x2af   :  { %v858_v20 = vmul.f32 0.5, %v857_v54 }
 0x2b0   :  { %v1291_v34 = vmul.f32 %v1290_v25, %v1286_v61 }
 0x2b1   :  { %v859_v1 = vmul.f32 %v858_v20, %v854_v5 }
 0x2b3   :  { %v1292_v37 = vadd.f32 %v1291_v34, %v859_v1 }
 0x2d9   :  { %v1714_v44 = vpop.f32.mrf.mxu1 }
 0x2da   :  { %v1715_v27 = vadd.f32 %v1714_v44, %v783_v35 }
 0x2db   :  { %v2097_v48 = vpop.f32.mrf.mxu1 }
 0x2dc   :  { %v1719_v6 = vmul.f32 0.5, %v1715_v27 }
 0x2de   :  { %2298 = vtanh.f32 %v1719_v6 }
 0x2df   :  { %2300 = vrcp.f32 %v1726_v21 }
 0x2eb   :  { %v2299_v63 = vpop.eup %2298 }
 0x2ec   :  { %v1721_v9 = vadd.f32 1.0, %v2299_v63  ;;  %v2301_v49 = vpop.eup %2300 }
 0x2ee   :  { %v1722_v14 = vmul.f32 0.5, %v1721_v9 }
 0x2f0   :  { %v1723_v28 = vmul.f32 %v1722_v14, %v1718_v29 }
 0x2f2   :  { %v1724_v18 = vadd.f32 %v1723_v28, %v1292_v37 }
 0x2f4   :  { %v1728_v42 = vmul.f32 %v2301_v49, %v1724_v18 }
 0x2f6   :  { %1729 = vst [vmem:[%s3532_s9] sm:$0x1] %v1728_v42 }

</bundles_post_ra>
